<compile_context>
chip_gen: v6e
topology: v6e:2x2x1
jax: 0.10.0
libtpu: 0.0.40
codegen_flags: <defaults>
</compile_context>

<pallas_src>
import jax
import jax.numpy as jnp
from jax import lax
from jax.experimental import pallas as pl
from jax.experimental.pallas import tpu as pltpu

L = 128                      # sequence length (16 * (L // 2) == 1024 feeds fc1)
C_IN = 6
C_OUT = 16
HID = 64
N_CLS = 2
OUT_PAD = 128                # lane-dense padded logits width
N_CONV_W = C_OUT * C_IN * 3  # 288 conv weights; conv biases follow in the SMEM table


# ---------------- fused kernel: conv1d + relu + maxpool + fc1 + relu + fc2 ----------------
def _make_fused_kernel(tb):
    def kernel(wsc_ref, x_ref, w1e_ref, b1_ref, w2p_ref, b2p_ref, o_ref):
        # wsc_ref : (304,) SMEM   wsc[(o*6+ci)*3 + k] = w_conv[o,ci,k]; wsc[288+o] = b_conv[o]
        # x_ref   : (6, tb, 128)  channel-major input block (batch in sublanes, seq in lanes)
        # w1e_ref : (16, 128, 64) fc1 weight expanded onto the un-compacted conv/pool layout;
        #                         odd lanes (pool don't-care positions) have zero weight
        # b1_ref  : (1, 64)
        # w2p_ref : (64, 128)     fc2 weight, transposed and zero-padded to 128 lanes
        # b2p_ref : (1, 128)
        # o_ref   : (tb, 128)     padded logits (cols 0..1 valid)
        lane = lax.broadcasted_iota(jnp.int32, (tb, L), 1)
        first = lane == 0
        last = lane == L - 1

        # in-kernel im2col: neighbour taps via XLU lane rotation + zero-pad edge mask,
        # computed once per input channel for the whole batch tile.
        xc, xm, xp = [], [], []
        for ci in range(C_IN):
            xi = x_ref[ci]                                              # (tb, 128)
            xc.append(xi)
            xm.append(jnp.where(first, 0.0, pltpu.roll(xi, shift=1, axis=1)))      # x[l-1]
            xp.append(jnp.where(last, 0.0, pltpu.roll(xi, shift=L - 1, axis=1)))   # x[l+1]

        # conv (VPU) -> ReLU -> pair-max pool -> fc1 partial matmul (MXU), per output channel.
        h = jnp.zeros((tb, HID), jnp.float32)
        for o in range(C_OUT):
            y = jnp.full((tb, L), wsc_ref[N_CONV_W + o], dtype=jnp.float32)        # conv bias
            for ci in range(C_IN):
                base = (o * C_IN + ci) * 3
                y = y + wsc_ref[base + 0] * xm[ci]
                y = y + wsc_ref[base + 1] * xc[ci]
                y = y + wsc_ref[base + 2] * xp[ci]
            y = jnp.maximum(y, 0.0)                                                # ReLU
            # MaxPool1d(2,2): valid results on even lanes; odd lanes are don't-care
            # (their fc1 weights are exactly zero).
            pooled = jnp.maximum(y, pltpu.roll(y, shift=L - 1, axis=1))            # (tb, 128)
            h = h + jnp.dot(pooled, w1e_ref[o], preferred_element_type=jnp.float32)

        h = jnp.maximum(h + b1_ref[...], 0.0)                                      # fc1 + ReLU
        o_ref[...] = jnp.dot(h, w2p_ref[...],
                             preferred_element_type=jnp.float32) + b2p_ref[...]    # fc2

    return kernel


# ---------------- one-time parameter re-layout (kept out of the forward path) ----------------
def prepare_params(params):
    w_conv = params["w_conv"].astype(jnp.float32)                   # (16, 6, 3)
    b_conv = params["b_conv"].astype(jnp.float32)                   # (16,)
    # scalar table for SMEM: flattened conv weights, then conv biases
    wsc = jnp.concatenate([w_conv.reshape(-1), b_conv.reshape(-1)])  # (304,)

    # Expand fc1 weights onto the (channel, 128-lane) conv/pool layout:
    # w1e[o, 2j, n] = w1[n, o*64 + j]; odd lanes stay zero (pool don't-care positions).
    w1 = params["w1"].astype(jnp.float32)                           # (64, 1024)
    w1r = w1.reshape(HID, C_OUT, L // 2)                            # (n, o, j)
    w1e = jnp.zeros((C_OUT, L, HID), jnp.float32)
    w1e = w1e.at[:, 0::2, :].set(jnp.transpose(w1r, (1, 2, 0)))     # (16, 128, 64)

    # fc2 weight transposed and zero-padded to 128 lanes (lane-dense output stores).
    w2p = jnp.zeros((HID, OUT_PAD), jnp.float32)
    w2p = w2p.at[:, :N_CLS].set(jnp.transpose(params["w2"]).astype(jnp.float32))
    b2p = jnp.zeros((1, OUT_PAD), jnp.float32)
    b2p = b2p.at[:, :N_CLS].set(params["b2"].reshape(1, N_CLS).astype(jnp.float32))

    return {
        "wsc": wsc,
        "w1e": w1e,
        "b1": params["b1"].reshape(1, HID).astype(jnp.float32),
        "w2p": w2p,
        "b2p": b2p,
    }


def _choose_tb(B):
    # Fill the MXU M dim (up to 128) while keeping TB a multiple of 8 (sublane layout) and
    # keeping >= 2 grid steps when B >= 9 so v7x's two TensorCores both get work.
    # (On v6e, raising the cap to 256 fills a full 256-wide MXU tile for very large B.)
    if B >= 256:
        return 128
    return max(8, 8 * ((B + 15) // 16))


def simple_cnn_forward(x, prep):
    B, C, Lx = x.shape
    assert C == C_IN and Lx == L
    TB = _choose_tb(B)
    B_pad = TB * pl.cdiv(B, TB)
    if B_pad != B:
        x = jnp.pad(x, ((0, B_pad - B), (0, 0), (0, 0)))       # pad batch, never shrink TB
    x_t = jnp.transpose(x, (1, 0, 2))                           # (6, B_pad, 128) channel-major

    out = pl.pallas_call(
        _make_fused_kernel(TB),
        out_shape=jax.ShapeDtypeStruct((B_pad, OUT_PAD), jnp.float32),
        grid=(B_pad // TB,),
        in_specs=[
            pl.BlockSpec(memory_space=pltpu.MemorySpace.SMEM),           # conv scalars
            pl.BlockSpec((C_IN, TB, L), lambda i: (0, i, 0)),            # x (batch-tiled)
            pl.BlockSpec((C_OUT, L, HID), lambda i: (0, 0, 0)),          # w1e
            pl.BlockSpec((1, HID), lambda i: (0, 0)),                    # b1
            pl.BlockSpec((HID, OUT_PAD), lambda i: (0, 0)),              # w2 (padded)
            pl.BlockSpec((1, OUT_PAD), lambda i: (0, 0)),                # b2 (padded)
        ],
        out_specs=pl.BlockSpec((TB, OUT_PAD), lambda i: (i, 0)),
        compiler_params=pltpu.CompilerParams(dimension_semantics=("parallel",)),
    )(prep["wsc"], x_t, prep["w1e"], prep["b1"], prep["w2p"], prep["b2p"])

    return out[:B, :N_CLS]


def init_params(key):
    ks = jax.random.split(key, 6)
    scale = 0.1
    return {
        "w_conv": jax.random.normal(ks[0], (C_OUT, C_IN, 3), jnp.float32) * scale,
        "b_conv": jax.random.normal(ks[1], (C_OUT,), jnp.float32) * scale,
        "w1": jax.random.normal(ks[2], (HID, C_OUT * (L // 2)), jnp.float32) * scale,
        "b1": jax.random.normal(ks[3], (HID,), jnp.float32) * scale,
        "w2": jax.random.normal(ks[4], (N_CLS, HID), jnp.float32) * scale,
        "b2": jax.random.normal(ks[5], (N_CLS,), jnp.float32) * scale,
    }


def reference_forward(x, p):
    # Pure-JAX reference mirroring the PyTorch forward.
    y = lax.conv_general_dilated(
        x, p["w_conv"], window_strides=(1,), padding=[(1, 1)],
        dimension_numbers=("NCH", "OIH", "NCH"))
    y = y + p["b_conv"][None, :, None]
    y = jnp.maximum(y, 0.0)
    y = y.reshape(x.shape[0], C_OUT, L // 2, 2).max(axis=-1)
    f = y.reshape(x.shape[0], C_OUT * (L // 2))
    h = jnp.maximum(f @ p["w1"].T + p["b1"], 0.0)
    return h @ p["w2"].T + p["b2"]


if __name__ == "__main__":
    key = jax.random.PRNGKey(0)
    k_x, k_p = jax.random.split(key)

    B = 2   # length 128 so that 16 * (128 // 2) == 1024 feeds fc1
    x = jax.random.normal(k_x, (B, C_IN, L), jnp.float32)
    params = init_params(k_p)
    prep = prepare_params(params)          # one-time weight re-layout, outside the hot path

    out = jax.jit(simple_cnn_forward)(x, prep)
    out = jax.block_until_ready(out)

    ref = reference_forward(x, params)
    assert out.shape == (B, N_CLS)
    assert jnp.allclose(out, ref, atol=1e-4, rtol=1e-4), (out, ref)

    print("KERNEL_OK")
</pallas_src>

<mosaic_0001>
module attributes {stable_mosaic.version = 11 : i64} {
  func.func @kernel(%arg0: i32, %arg1: memref<304xf32, #tpu.memory_space<smem>>, %arg2: memref<6x8x128xf32, #tpu.memory_space<vmem>>, %arg3: memref<16x128x64xf32, #tpu.memory_space<vmem>>, %arg4: memref<1x64xf32, #tpu.memory_space<vmem>>, %arg5: memref<64x128xf32, #tpu.memory_space<vmem>>, %arg6: memref<1x128xf32, #tpu.memory_space<vmem>>, %arg7: memref<8x128xf32, #tpu.memory_space<vmem>>) attributes {dimension_semantics = [#tpu.dimension_semantics<parallel>], iteration_bounds = array<i64: 1>, scalar_prefetch = 0 : i64, scratch_operands = 0 : i64, tpu.core_type = #tpu.core_type<tc>, window_params = [{transform_indices = @transform_0, window_bounds = array<i64: 304>}, {transform_indices = @transform_1, window_bounds = array<i64: 6, 8, 128>}, {pipeline_mode = #tpu.pipeline_mode<synchronous>, transform_indices = @transform_2, window_bounds = array<i64: 16, 128, 64>}, {pipeline_mode = #tpu.pipeline_mode<synchronous>, transform_indices = @transform_3, window_bounds = array<i64: 1, 64>}, {pipeline_mode = #tpu.pipeline_mode<synchronous>, transform_indices = @transform_4, window_bounds = array<i64: 64, 128>}, {pipeline_mode = #tpu.pipeline_mode<synchronous>, transform_indices = @transform_5, window_bounds = array<i64: 1, 128>}, {transform_indices = @transform_6, window_bounds = array<i64: 8, 128>}]} {
    %0 = tpu.iota {dimensions = array<i32: 1>} : vector<8x128xi32>
    %c0_i32 = arith.constant 0 : i32
    %1 = vector.broadcast %c0_i32 : i32 to vector<8x128xi32>
    %2 = arith.cmpi eq, %0, %1 : vector<8x128xi32>
    %c127_i32 = arith.constant 127 : i32
    %3 = vector.broadcast %c127_i32 : i32 to vector<8x128xi32>
    %4 = arith.cmpi eq, %0, %3 : vector<8x128xi32>
    %c0 = arith.constant 0 : index
    %c0_0 = arith.constant 0 : index
    %c0_1 = arith.constant 0 : index
    %5 = vector.load %arg2[%c0, %c0_0, %c0_1] : memref<6x8x128xf32, #tpu.memory_space<vmem>>, vector<1x8x128xf32>
    %6 = vector.shape_cast %5 : vector<1x8x128xf32> to vector<8x128xf32>
    %c1_i32 = arith.constant 1 : i32
    %7 = tpu.dynamic_rotate %6 by %c1_i32 dim 1 : vector<8x128xf32>, i32 -> vector<8x128xf32>
    %cst = arith.constant 0.000000e+00 : f32
    %8 = vector.broadcast %cst : f32 to vector<8x128xf32>
    %9 = arith.select %2, %8, %7 : vector<8x128xi1>, vector<8x128xf32>
    %c127_i32_2 = arith.constant 127 : i32
    %10 = tpu.dynamic_rotate %6 by %c127_i32_2 dim 1 : vector<8x128xf32>, i32 -> vector<8x128xf32>
    %cst_3 = arith.constant 0.000000e+00 : f32
    %11 = vector.broadcast %cst_3 : f32 to vector<8x128xf32>
    %12 = arith.select %4, %11, %10 : vector<8x128xi1>, vector<8x128xf32>
    %c1 = arith.constant 1 : index
    %c0_4 = arith.constant 0 : index
    %c0_5 = arith.constant 0 : index
    %13 = vector.load %arg2[%c1, %c0_4, %c0_5] : memref<6x8x128xf32, #tpu.memory_space<vmem>>, vector<1x8x128xf32>
    %14 = vector.shape_cast %13 : vector<1x8x128xf32> to vector<8x128xf32>
    %c1_i32_6 = arith.constant 1 : i32
    %15 = tpu.dynamic_rotate %14 by %c1_i32_6 dim 1 : vector<8x128xf32>, i32 -> vector<8x128xf32>
    %cst_7 = arith.constant 0.000000e+00 : f32
    %16 = vector.broadcast %cst_7 : f32 to vector<8x128xf32>
    %17 = arith.select %2, %16, %15 : vector<8x128xi1>, vector<8x128xf32>
    %c127_i32_8 = arith.constant 127 : i32
    %18 = tpu.dynamic_rotate %14 by %c127_i32_8 dim 1 : vector<8x128xf32>, i32 -> vector<8x128xf32>
    %cst_9 = arith.constant 0.000000e+00 : f32
    %19 = vector.broadcast %cst_9 : f32 to vector<8x128xf32>
    %20 = arith.select %4, %19, %18 : vector<8x128xi1>, vector<8x128xf32>
    %c2 = arith.constant 2 : index
    %c0_10 = arith.constant 0 : index
    %c0_11 = arith.constant 0 : index
    %21 = vector.load %arg2[%c2, %c0_10, %c0_11] : memref<6x8x128xf32, #tpu.memory_space<vmem>>, vector<1x8x128xf32>
    %22 = vector.shape_cast %21 : vector<1x8x128xf32> to vector<8x128xf32>
    %c1_i32_12 = arith.constant 1 : i32
    %23 = tpu.dynamic_rotate %22 by %c1_i32_12 dim 1 : vector<8x128xf32>, i32 -> vector<8x128xf32>
    %cst_13 = arith.constant 0.000000e+00 : f32
    %24 = vector.broadcast %cst_13 : f32 to vector<8x128xf32>
    %25 = arith.select %2, %24, %23 : vector<8x128xi1>, vector<8x128xf32>
    %c127_i32_14 = arith.constant 127 : i32
    %26 = tpu.dynamic_rotate %22 by %c127_i32_14 dim 1 : vector<8x128xf32>, i32 -> vector<8x128xf32>
    %cst_15 = arith.constant 0.000000e+00 : f32
    %27 = vector.broadcast %cst_15 : f32 to vector<8x128xf32>
    %28 = arith.select %4, %27, %26 : vector<8x128xi1>, vector<8x128xf32>
    %c3 = arith.constant 3 : index
    %c0_16 = arith.constant 0 : index
    %c0_17 = arith.constant 0 : index
    %29 = vector.load %arg2[%c3, %c0_16, %c0_17] : memref<6x8x128xf32, #tpu.memory_space<vmem>>, vector<1x8x128xf32>
    %30 = vector.shape_cast %29 : vector<1x8x128xf32> to vector<8x128xf32>
    %c1_i32_18 = arith.constant 1 : i32
    %31 = tpu.dynamic_rotate %30 by %c1_i32_18 dim 1 : vector<8x128xf32>, i32 -> vector<8x128xf32>
    %cst_19 = arith.constant 0.000000e+00 : f32
    %32 = vector.broadcast %cst_19 : f32 to vector<8x128xf32>
    %33 = arith.select %2, %32, %31 : vector<8x128xi1>, vector<8x128xf32>
    %c127_i32_20 = arith.constant 127 : i32
    %34 = tpu.dynamic_rotate %30 by %c127_i32_20 dim 1 : vector<8x128xf32>, i32 -> vector<8x128xf32>
    %cst_21 = arith.constant 0.000000e+00 : f32
    %35 = vector.broadcast %cst_21 : f32 to vector<8x128xf32>
    %36 = arith.select %4, %35, %34 : vector<8x128xi1>, vector<8x128xf32>
    %c4 = arith.constant 4 : index
    %c0_22 = arith.constant 0 : index
    %c0_23 = arith.constant 0 : index
    %37 = vector.load %arg2[%c4, %c0_22, %c0_23] : memref<6x8x128xf32, #tpu.memory_space<vmem>>, vector<1x8x128xf32>
    %38 = vector.shape_cast %37 : vector<1x8x128xf32> to vector<8x128xf32>
    %c1_i32_24 = arith.constant 1 : i32
    %39 = tpu.dynamic_rotate %38 by %c1_i32_24 dim 1 : vector<8x128xf32>, i32 -> vector<8x128xf32>
    %cst_25 = arith.constant 0.000000e+00 : f32
    %40 = vector.broadcast %cst_25 : f32 to vector<8x128xf32>
    %41 = arith.select %2, %40, %39 : vector<8x128xi1>, vector<8x128xf32>
    %c127_i32_26 = arith.constant 127 : i32
    %42 = tpu.dynamic_rotate %38 by %c127_i32_26 dim 1 : vector<8x128xf32>, i32 -> vector<8x128xf32>
    %cst_27 = arith.constant 0.000000e+00 : f32
    %43 = vector.broadcast %cst_27 : f32 to vector<8x128xf32>
    %44 = arith.select %4, %43, %42 : vector<8x128xi1>, vector<8x128xf32>
    %c5 = arith.constant 5 : index
    %c0_28 = arith.constant 0 : index
    %c0_29 = arith.constant 0 : index
    %45 = vector.load %arg2[%c5, %c0_28, %c0_29] : memref<6x8x128xf32, #tpu.memory_space<vmem>>, vector<1x8x128xf32>
    %46 = vector.shape_cast %45 : vector<1x8x128xf32> to vector<8x128xf32>
    %c1_i32_30 = arith.constant 1 : i32
    %47 = tpu.dynamic_rotate %46 by %c1_i32_30 dim 1 : vector<8x128xf32>, i32 -> vector<8x128xf32>
    %cst_31 = arith.constant 0.000000e+00 : f32
    %48 = vector.broadcast %cst_31 : f32 to vector<8x128xf32>
    %49 = arith.select %2, %48, %47 : vector<8x128xi1>, vector<8x128xf32>
    %c127_i32_32 = arith.constant 127 : i32
    %50 = tpu.dynamic_rotate %46 by %c127_i32_32 dim 1 : vector<8x128xf32>, i32 -> vector<8x128xf32>
    %cst_33 = arith.constant 0.000000e+00 : f32
    %51 = vector.broadcast %cst_33 : f32 to vector<8x128xf32>
    %52 = arith.select %4, %51, %50 : vector<8x128xi1>, vector<8x128xf32>
    %cst_34 = arith.constant 0.000000e+00 : f32
    %53 = vector.broadcast %cst_34 : f32 to vector<8x64xf32>
    %c288 = arith.constant 288 : index
    %54 = memref.load %arg1[%c288] : memref<304xf32, #tpu.memory_space<smem>>
    %55 = vector.broadcast %54 : f32 to vector<8x128xf32>
    %c0_35 = arith.constant 0 : index
    %56 = memref.load %arg1[%c0_35] : memref<304xf32, #tpu.memory_space<smem>>
    %57 = vector.broadcast %56 : f32 to vector<8x128xf32>
    %58 = arith.mulf %57, %9 : vector<8x128xf32>
    %59 = arith.addf %55, %58 : vector<8x128xf32>
    %c1_36 = arith.constant 1 : index
    %60 = memref.load %arg1[%c1_36] : memref<304xf32, #tpu.memory_space<smem>>
    %61 = vector.broadcast %60 : f32 to vector<8x128xf32>
    %62 = arith.mulf %61, %6 : vector<8x128xf32>
    %63 = arith.addf %59, %62 : vector<8x128xf32>
    %c2_37 = arith.constant 2 : index
    %64 = memref.load %arg1[%c2_37] : memref<304xf32, #tpu.memory_space<smem>>
    %65 = vector.broadcast %64 : f32 to vector<8x128xf32>
    %66 = arith.mulf %65, %12 : vector<8x128xf32>
    %67 = arith.addf %63, %66 : vector<8x128xf32>
    %c3_38 = arith.constant 3 : index
    %68 = memref.load %arg1[%c3_38] : memref<304xf32, #tpu.memory_space<smem>>
    %69 = vector.broadcast %68 : f32 to vector<8x128xf32>
    %70 = arith.mulf %69, %17 : vector<8x128xf32>
    %71 = arith.addf %67, %70 : vector<8x128xf32>
    %c4_39 = arith.constant 4 : index
    %72 = memref.load %arg1[%c4_39] : memref<304xf32, #tpu.memory_space<smem>>
    %73 = vector.broadcast %72 : f32 to vector<8x128xf32>
    %74 = arith.mulf %73, %14 : vector<8x128xf32>
    %75 = arith.addf %71, %74 : vector<8x128xf32>
    %c5_40 = arith.constant 5 : index
    %76 = memref.load %arg1[%c5_40] : memref<304xf32, #tpu.memory_space<smem>>
    %77 = vector.broadcast %76 : f32 to vector<8x128xf32>
    %78 = arith.mulf %77, %20 : vector<8x128xf32>
    %79 = arith.addf %75, %78 : vector<8x128xf32>
    %c6 = arith.constant 6 : index
    %80 = memref.load %arg1[%c6] : memref<304xf32, #tpu.memory_space<smem>>
    %81 = vector.broadcast %80 : f32 to vector<8x128xf32>
    %82 = arith.mulf %81, %25 : vector<8x128xf32>
    %83 = arith.addf %79, %82 : vector<8x128xf32>
    %c7 = arith.constant 7 : index
    %84 = memref.load %arg1[%c7] : memref<304xf32, #tpu.memory_space<smem>>
    %85 = vector.broadcast %84 : f32 to vector<8x128xf32>
    %86 = arith.mulf %85, %22 : vector<8x128xf32>
    %87 = arith.addf %83, %86 : vector<8x128xf32>
    %c8 = arith.constant 8 : index
    %88 = memref.load %arg1[%c8] : memref<304xf32, #tpu.memory_space<smem>>
    %89 = vector.broadcast %88 : f32 to vector<8x128xf32>
    %90 = arith.mulf %89, %28 : vector<8x128xf32>
    %91 = arith.addf %87, %90 : vector<8x128xf32>
    %c9 = arith.constant 9 : index
    %92 = memref.load %arg1[%c9] : memref<304xf32, #tpu.memory_space<smem>>
    %93 = vector.broadcast %92 : f32 to vector<8x128xf32>
    %94 = arith.mulf %93, %33 : vector<8x128xf32>
    %95 = arith.addf %91, %94 : vector<8x128xf32>
    %c10 = arith.constant 10 : index
    %96 = memref.load %arg1[%c10] : memref<304xf32, #tpu.memory_space<smem>>
    %97 = vector.broadcast %96 : f32 to vector<8x128xf32>
    %98 = arith.mulf %97, %30 : vector<8x128xf32>
    %99 = arith.addf %95, %98 : vector<8x128xf32>
    %c11 = arith.constant 11 : index
    %100 = memref.load %arg1[%c11] : memref<304xf32, #tpu.memory_space<smem>>
    %101 = vector.broadcast %100 : f32 to vector<8x128xf32>
    %102 = arith.mulf %101, %36 : vector<8x128xf32>
    %103 = arith.addf %99, %102 : vector<8x128xf32>
    %c12 = arith.constant 12 : index
    %104 = memref.load %arg1[%c12] : memref<304xf32, #tpu.memory_space<smem>>
    %105 = vector.broadcast %104 : f32 to vector<8x128xf32>
    %106 = arith.mulf %105, %41 : vector<8x128xf32>
    %107 = arith.addf %103, %106 : vector<8x128xf32>
    %c13 = arith.constant 13 : index
    %108 = memref.load %arg1[%c13] : memref<304xf32, #tpu.memory_space<smem>>
    %109 = vector.broadcast %108 : f32 to vector<8x128xf32>
    %110 = arith.mulf %109, %38 : vector<8x128xf32>
    %111 = arith.addf %107, %110 : vector<8x128xf32>
    %c14 = arith.constant 14 : index
    %112 = memref.load %arg1[%c14] : memref<304xf32, #tpu.memory_space<smem>>
    %113 = vector.broadcast %112 : f32 to vector<8x128xf32>
    %114 = arith.mulf %113, %44 : vector<8x128xf32>
    %115 = arith.addf %111, %114 : vector<8x128xf32>
    %c15 = arith.constant 15 : index
    %116 = memref.load %arg1[%c15] : memref<304xf32, #tpu.memory_space<smem>>
    %117 = vector.broadcast %116 : f32 to vector<8x128xf32>
    %118 = arith.mulf %117, %49 : vector<8x128xf32>
    %119 = arith.addf %115, %118 : vector<8x128xf32>
    %c16 = arith.constant 16 : index
    %120 = memref.load %arg1[%c16] : memref<304xf32, #tpu.memory_space<smem>>
    %121 = vector.broadcast %120 : f32 to vector<8x128xf32>
    %122 = arith.mulf %121, %46 : vector<8x128xf32>
    %123 = arith.addf %119, %122 : vector<8x128xf32>
    %c17 = arith.constant 17 : index
    %124 = memref.load %arg1[%c17] : memref<304xf32, #tpu.memory_space<smem>>
    %125 = vector.broadcast %124 : f32 to vector<8x128xf32>
    %126 = arith.mulf %125, %52 : vector<8x128xf32>
    %127 = arith.addf %123, %126 : vector<8x128xf32>
    %cst_41 = arith.constant 0.000000e+00 : f32
    %128 = vector.broadcast %cst_41 : f32 to vector<8x128xf32>
    %129 = arith.maximumf %127, %128 : vector<8x128xf32>
    %c127_i32_42 = arith.constant 127 : i32
    %130 = tpu.dynamic_rotate %129 by %c127_i32_42 dim 1 : vector<8x128xf32>, i32 -> vector<8x128xf32>
    %131 = arith.maximumf %129, %130 : vector<8x128xf32>
    %c0_43 = arith.constant 0 : index
    %c0_44 = arith.constant 0 : index
    %c0_45 = arith.constant 0 : index
    %132 = vector.load %arg3[%c0_43, %c0_44, %c0_45] : memref<16x128x64xf32, #tpu.memory_space<vmem>>, vector<1x128x64xf32>
    %133 = vector.shape_cast %132 : vector<1x128x64xf32> to vector<128x64xf32>
    %cst_46 = arith.constant dense<0.000000e+00> : vector<8x64xf32>
    %134 = tpu.matmul %131, %133, %cst_46 {dimension_numbers = #tpu.dot_dimension_numbers<[1], [0], [0], [1], [0, 0, 1, 1], [], []>} : vector<8x128xf32>, vector<128x64xf32>, vector<8x64xf32> -> vector<8x64xf32>
    %135 = arith.addf %53, %134 : vector<8x64xf32>
    %c289 = arith.constant 289 : index
    %136 = memref.load %arg1[%c289] : memref<304xf32, #tpu.memory_space<smem>>
    %137 = vector.broadcast %136 : f32 to vector<8x128xf32>
    %c18 = arith.constant 18 : index
    %138 = memref.load %arg1[%c18] : memref<304xf32, #tpu.memory_space<smem>>
    %139 = vector.broadcast %138 : f32 to vector<8x128xf32>
    %140 = arith.mulf %139, %9 : vector<8x128xf32>
    %141 = arith.addf %137, %140 : vector<8x128xf32>
    %c19 = arith.constant 19 : index
    %142 = memref.load %arg1[%c19] : memref<304xf32, #tpu.memory_space<smem>>
    %143 = vector.broadcast %142 : f32 to vector<8x128xf32>
    %144 = arith.mulf %143, %6 : vector<8x128xf32>
    %145 = arith.addf %141, %144 : vector<8x128xf32>
    %c20 = arith.constant 20 : index
    %146 = memref.load %arg1[%c20] : memref<304xf32, #tpu.memory_space<smem>>
    %147 = vector.broadcast %146 : f32 to vector<8x128xf32>
    %148 = arith.mulf %147, %12 : vector<8x128xf32>
    %149 = arith.addf %145, %148 : vector<8x128xf32>
    %c21 = arith.constant 21 : index
    %150 = memref.load %arg1[%c21] : memref<304xf32, #tpu.memory_space<smem>>
    %151 = vector.broadcast %150 : f32 to vector<8x128xf32>
    %152 = arith.mulf %151, %17 : vector<8x128xf32>
    %153 = arith.addf %149, %152 : vector<8x128xf32>
    %c22 = arith.constant 22 : index
    %154 = memref.load %arg1[%c22] : memref<304xf32, #tpu.memory_space<smem>>
    %155 = vector.broadcast %154 : f32 to vector<8x128xf32>
    %156 = arith.mulf %155, %14 : vector<8x128xf32>
    %157 = arith.addf %153, %156 : vector<8x128xf32>
    %c23 = arith.constant 23 : index
    %158 = memref.load %arg1[%c23] : memref<304xf32, #tpu.memory_space<smem>>
    %159 = vector.broadcast %158 : f32 to vector<8x128xf32>
    %160 = arith.mulf %159, %20 : vector<8x128xf32>
    %161 = arith.addf %157, %160 : vector<8x128xf32>
    %c24 = arith.constant 24 : index
    %162 = memref.load %arg1[%c24] : memref<304xf32, #tpu.memory_space<smem>>
    %163 = vector.broadcast %162 : f32 to vector<8x128xf32>
    %164 = arith.mulf %163, %25 : vector<8x128xf32>
    %165 = arith.addf %161, %164 : vector<8x128xf32>
    %c25 = arith.constant 25 : index
    %166 = memref.load %arg1[%c25] : memref<304xf32, #tpu.memory_space<smem>>
    %167 = vector.broadcast %166 : f32 to vector<8x128xf32>
    %168 = arith.mulf %167, %22 : vector<8x128xf32>
    %169 = arith.addf %165, %168 : vector<8x128xf32>
    %c26 = arith.constant 26 : index
    %170 = memref.load %arg1[%c26] : memref<304xf32, #tpu.memory_space<smem>>
    %171 = vector.broadcast %170 : f32 to vector<8x128xf32>
    %172 = arith.mulf %171, %28 : vector<8x128xf32>
    %173 = arith.addf %169, %172 : vector<8x128xf32>
    %c27 = arith.constant 27 : index
    %174 = memref.load %arg1[%c27] : memref<304xf32, #tpu.memory_space<smem>>
    %175 = vector.broadcast %174 : f32 to vector<8x128xf32>
    %176 = arith.mulf %175, %33 : vector<8x128xf32>
    %177 = arith.addf %173, %176 : vector<8x128xf32>
    %c28 = arith.constant 28 : index
    %178 = memref.load %arg1[%c28] : memref<304xf32, #tpu.memory_space<smem>>
    %179 = vector.broadcast %178 : f32 to vector<8x128xf32>
    %180 = arith.mulf %179, %30 : vector<8x128xf32>
    %181 = arith.addf %177, %180 : vector<8x128xf32>
    %c29 = arith.constant 29 : index
    %182 = memref.load %arg1[%c29] : memref<304xf32, #tpu.memory_space<smem>>
    %183 = vector.broadcast %182 : f32 to vector<8x128xf32>
    %184 = arith.mulf %183, %36 : vector<8x128xf32>
    %185 = arith.addf %181, %184 : vector<8x128xf32>
    %c30 = arith.constant 30 : index
    %186 = memref.load %arg1[%c30] : memref<304xf32, #tpu.memory_space<smem>>
    %187 = vector.broadcast %186 : f32 to vector<8x128xf32>
    %188 = arith.mulf %187, %41 : vector<8x128xf32>
    %189 = arith.addf %185, %188 : vector<8x128xf32>
    %c31 = arith.constant 31 : index
    %190 = memref.load %arg1[%c31] : memref<304xf32, #tpu.memory_space<smem>>
    %191 = vector.broadcast %190 : f32 to vector<8x128xf32>
    %192 = arith.mulf %191, %38 : vector<8x128xf32>
    %193 = arith.addf %189, %192 : vector<8x128xf32>
    %c32 = arith.constant 32 : index
    %194 = memref.load %arg1[%c32] : memref<304xf32, #tpu.memory_space<smem>>
    %195 = vector.broadcast %194 : f32 to vector<8x128xf32>
    %196 = arith.mulf %195, %44 : vector<8x128xf32>
    %197 = arith.addf %193, %196 : vector<8x128xf32>
    %c33 = arith.constant 33 : index
    %198 = memref.load %arg1[%c33] : memref<304xf32, #tpu.memory_space<smem>>
    %199 = vector.broadcast %198 : f32 to vector<8x128xf32>
    %200 = arith.mulf %199, %49 : vector<8x128xf32>
    %201 = arith.addf %197, %200 : vector<8x128xf32>
    %c34 = arith.constant 34 : index
    %202 = memref.load %arg1[%c34] : memref<304xf32, #tpu.memory_space<smem>>
    %203 = vector.broadcast %202 : f32 to vector<8x128xf32>
    %204 = arith.mulf %203, %46 : vector<8x128xf32>
    %205 = arith.addf %201, %204 : vector<8x128xf32>
    %c35 = arith.constant 35 : index
    %206 = memref.load %arg1[%c35] : memref<304xf32, #tpu.memory_space<smem>>
    %207 = vector.broadcast %206 : f32 to vector<8x128xf32>
    %208 = arith.mulf %207, %52 : vector<8x128xf32>
    %209 = arith.addf %205, %208 : vector<8x128xf32>
    %cst_47 = arith.constant 0.000000e+00 : f32
    %210 = vector.broadcast %cst_47 : f32 to vector<8x128xf32>
    %211 = arith.maximumf %209, %210 : vector<8x128xf32>
    %c127_i32_48 = arith.constant 127 : i32
    %212 = tpu.dynamic_rotate %211 by %c127_i32_48 dim 1 : vector<8x128xf32>, i32 -> vector<8x128xf32>
    %213 = arith.maximumf %211, %212 : vector<8x128xf32>
    %c1_49 = arith.constant 1 : index
    %c0_50 = arith.constant 0 : index
    %c0_51 = arith.constant 0 : index
    %214 = vector.load %arg3[%c1_49, %c0_50, %c0_51] : memref<16x128x64xf32, #tpu.memory_space<vmem>>, vector<1x128x64xf32>
    %215 = vector.shape_cast %214 : vector<1x128x64xf32> to vector<128x64xf32>
    %cst_52 = arith.constant dense<0.000000e+00> : vector<8x64xf32>
    %216 = tpu.matmul %213, %215, %cst_52 {dimension_numbers = #tpu.dot_dimension_numbers<[1], [0], [0], [1], [0, 0, 1, 1], [], []>} : vector<8x128xf32>, vector<128x64xf32>, vector<8x64xf32> -> vector<8x64xf32>
    %217 = arith.addf %135, %216 : vector<8x64xf32>
    %c290 = arith.constant 290 : index
    %218 = memref.load %arg1[%c290] : memref<304xf32, #tpu.memory_space<smem>>
    %219 = vector.broadcast %218 : f32 to vector<8x128xf32>
    %c36 = arith.constant 36 : index
    %220 = memref.load %arg1[%c36] : memref<304xf32, #tpu.memory_space<smem>>
    %221 = vector.broadcast %220 : f32 to vector<8x128xf32>
    %222 = arith.mulf %221, %9 : vector<8x128xf32>
    %223 = arith.addf %219, %222 : vector<8x128xf32>
    %c37 = arith.constant 37 : index
    %224 = memref.load %arg1[%c37] : memref<304xf32, #tpu.memory_space<smem>>
    %225 = vector.broadcast %224 : f32 to vector<8x128xf32>
    %226 = arith.mulf %225, %6 : vector<8x128xf32>
    %227 = arith.addf %223, %226 : vector<8x128xf32>
    %c38 = arith.constant 38 : index
    %228 = memref.load %arg1[%c38] : memref<304xf32, #tpu.memory_space<smem>>
    %229 = vector.broadcast %228 : f32 to vector<8x128xf32>
    %230 = arith.mulf %229, %12 : vector<8x128xf32>
    %231 = arith.addf %227, %230 : vector<8x128xf32>
    %c39 = arith.constant 39 : index
    %232 = memref.load %arg1[%c39] : memref<304xf32, #tpu.memory_space<smem>>
    %233 = vector.broadcast %232 : f32 to vector<8x128xf32>
    %234 = arith.mulf %233, %17 : vector<8x128xf32>
    %235 = arith.addf %231, %234 : vector<8x128xf32>
    %c40 = arith.constant 40 : index
    %236 = memref.load %arg1[%c40] : memref<304xf32, #tpu.memory_space<smem>>
    %237 = vector.broadcast %236 : f32 to vector<8x128xf32>
    %238 = arith.mulf %237, %14 : vector<8x128xf32>
    %239 = arith.addf %235, %238 : vector<8x128xf32>
    %c41 = arith.constant 41 : index
    %240 = memref.load %arg1[%c41] : memref<304xf32, #tpu.memory_space<smem>>
    %241 = vector.broadcast %240 : f32 to vector<8x128xf32>
    %242 = arith.mulf %241, %20 : vector<8x128xf32>
    %243 = arith.addf %239, %242 : vector<8x128xf32>
    %c42 = arith.constant 42 : index
    %244 = memref.load %arg1[%c42] : memref<304xf32, #tpu.memory_space<smem>>
    %245 = vector.broadcast %244 : f32 to vector<8x128xf32>
    %246 = arith.mulf %245, %25 : vector<8x128xf32>
    %247 = arith.addf %243, %246 : vector<8x128xf32>
    %c43 = arith.constant 43 : index
    %248 = memref.load %arg1[%c43] : memref<304xf32, #tpu.memory_space<smem>>
    %249 = vector.broadcast %248 : f32 to vector<8x128xf32>
    %250 = arith.mulf %249, %22 : vector<8x128xf32>
    %251 = arith.addf %247, %250 : vector<8x128xf32>
    %c44 = arith.constant 44 : index
    %252 = memref.load %arg1[%c44] : memref<304xf32, #tpu.memory_space<smem>>
    %253 = vector.broadcast %252 : f32 to vector<8x128xf32>
    %254 = arith.mulf %253, %28 : vector<8x128xf32>
    %255 = arith.addf %251, %254 : vector<8x128xf32>
    %c45 = arith.constant 45 : index
    %256 = memref.load %arg1[%c45] : memref<304xf32, #tpu.memory_space<smem>>
    %257 = vector.broadcast %256 : f32 to vector<8x128xf32>
    %258 = arith.mulf %257, %33 : vector<8x128xf32>
    %259 = arith.addf %255, %258 : vector<8x128xf32>
    %c46 = arith.constant 46 : index
    %260 = memref.load %arg1[%c46] : memref<304xf32, #tpu.memory_space<smem>>
    %261 = vector.broadcast %260 : f32 to vector<8x128xf32>
    %262 = arith.mulf %261, %30 : vector<8x128xf32>
    %263 = arith.addf %259, %262 : vector<8x128xf32>
    %c47 = arith.constant 47 : index
    %264 = memref.load %arg1[%c47] : memref<304xf32, #tpu.memory_space<smem>>
    %265 = vector.broadcast %264 : f32 to vector<8x128xf32>
    %266 = arith.mulf %265, %36 : vector<8x128xf32>
    %267 = arith.addf %263, %266 : vector<8x128xf32>
    %c48 = arith.constant 48 : index
    %268 = memref.load %arg1[%c48] : memref<304xf32, #tpu.memory_space<smem>>
    %269 = vector.broadcast %268 : f32 to vector<8x128xf32>
    %270 = arith.mulf %269, %41 : vector<8x128xf32>
    %271 = arith.addf %267, %270 : vector<8x128xf32>
    %c49 = arith.constant 49 : index
    %272 = memref.load %arg1[%c49] : memref<304xf32, #tpu.memory_space<smem>>
    %273 = vector.broadcast %272 : f32 to vector<8x128xf32>
    %274 = arith.mulf %273, %38 : vector<8x128xf32>
    %275 = arith.addf %271, %274 : vector<8x128xf32>
    %c50 = arith.constant 50 : index
    %276 = memref.load %arg1[%c50] : memref<304xf32, #tpu.memory_space<smem>>
    %277 = vector.broadcast %276 : f32 to vector<8x128xf32>
    %278 = arith.mulf %277, %44 : vector<8x128xf32>
    %279 = arith.addf %275, %278 : vector<8x128xf32>
    %c51 = arith.constant 51 : index
    %280 = memref.load %arg1[%c51] : memref<304xf32, #tpu.memory_space<smem>>
    %281 = vector.broadcast %280 : f32 to vector<8x128xf32>
    %282 = arith.mulf %281, %49 : vector<8x128xf32>
    %283 = arith.addf %279, %282 : vector<8x128xf32>
    %c52 = arith.constant 52 : index
    %284 = memref.load %arg1[%c52] : memref<304xf32, #tpu.memory_space<smem>>
    %285 = vector.broadcast %284 : f32 to vector<8x128xf32>
    %286 = arith.mulf %285, %46 : vector<8x128xf32>
    %287 = arith.addf %283, %286 : vector<8x128xf32>
    %c53 = arith.constant 53 : index
    %288 = memref.load %arg1[%c53] : memref<304xf32, #tpu.memory_space<smem>>
    %289 = vector.broadcast %288 : f32 to vector<8x128xf32>
    %290 = arith.mulf %289, %52 : vector<8x128xf32>
    %291 = arith.addf %287, %290 : vector<8x128xf32>
    %cst_53 = arith.constant 0.000000e+00 : f32
    %292 = vector.broadcast %cst_53 : f32 to vector<8x128xf32>
    %293 = arith.maximumf %291, %292 : vector<8x128xf32>
    %c127_i32_54 = arith.constant 127 : i32
    %294 = tpu.dynamic_rotate %293 by %c127_i32_54 dim 1 : vector<8x128xf32>, i32 -> vector<8x128xf32>
    %295 = arith.maximumf %293, %294 : vector<8x128xf32>
    %c2_55 = arith.constant 2 : index
    %c0_56 = arith.constant 0 : index
    %c0_57 = arith.constant 0 : index
    %296 = vector.load %arg3[%c2_55, %c0_56, %c0_57] : memref<16x128x64xf32, #tpu.memory_space<vmem>>, vector<1x128x64xf32>
    %297 = vector.shape_cast %296 : vector<1x128x64xf32> to vector<128x64xf32>
    %cst_58 = arith.constant dense<0.000000e+00> : vector<8x64xf32>
    %298 = tpu.matmul %295, %297, %cst_58 {dimension_numbers = #tpu.dot_dimension_numbers<[1], [0], [0], [1], [0, 0, 1, 1], [], []>} : vector<8x128xf32>, vector<128x64xf32>, vector<8x64xf32> -> vector<8x64xf32>
    %299 = arith.addf %217, %298 : vector<8x64xf32>
    %c291 = arith.constant 291 : index
    %300 = memref.load %arg1[%c291] : memref<304xf32, #tpu.memory_space<smem>>
    %301 = vector.broadcast %300 : f32 to vector<8x128xf32>
    %c54 = arith.constant 54 : index
    %302 = memref.load %arg1[%c54] : memref<304xf32, #tpu.memory_space<smem>>
    %303 = vector.broadcast %302 : f32 to vector<8x128xf32>
    %304 = arith.mulf %303, %9 : vector<8x128xf32>
    %305 = arith.addf %301, %304 : vector<8x128xf32>
    %c55 = arith.constant 55 : index
    %306 = memref.load %arg1[%c55] : memref<304xf32, #tpu.memory_space<smem>>
    %307 = vector.broadcast %306 : f32 to vector<8x128xf32>
    %308 = arith.mulf %307, %6 : vector<8x128xf32>
    %309 = arith.addf %305, %308 : vector<8x128xf32>
    %c56 = arith.constant 56 : index
    %310 = memref.load %arg1[%c56] : memref<304xf32, #tpu.memory_space<smem>>
    %311 = vector.broadcast %310 : f32 to vector<8x128xf32>
    %312 = arith.mulf %311, %12 : vector<8x128xf32>
    %313 = arith.addf %309, %312 : vector<8x128xf32>
    %c57 = arith.constant 57 : index
    %314 = memref.load %arg1[%c57] : memref<304xf32, #tpu.memory_space<smem>>
    %315 = vector.broadcast %314 : f32 to vector<8x128xf32>
    %316 = arith.mulf %315, %17 : vector<8x128xf32>
    %317 = arith.addf %313, %316 : vector<8x128xf32>
    %c58 = arith.constant 58 : index
    %318 = memref.load %arg1[%c58] : memref<304xf32, #tpu.memory_space<smem>>
    %319 = vector.broadcast %318 : f32 to vector<8x128xf32>
    %320 = arith.mulf %319, %14 : vector<8x128xf32>
    %321 = arith.addf %317, %320 : vector<8x128xf32>
    %c59 = arith.constant 59 : index
    %322 = memref.load %arg1[%c59] : memref<304xf32, #tpu.memory_space<smem>>
    %323 = vector.broadcast %322 : f32 to vector<8x128xf32>
    %324 = arith.mulf %323, %20 : vector<8x128xf32>
    %325 = arith.addf %321, %324 : vector<8x128xf32>
    %c60 = arith.constant 60 : index
    %326 = memref.load %arg1[%c60] : memref<304xf32, #tpu.memory_space<smem>>
    %327 = vector.broadcast %326 : f32 to vector<8x128xf32>
    %328 = arith.mulf %327, %25 : vector<8x128xf32>
    %329 = arith.addf %325, %328 : vector<8x128xf32>
    %c61 = arith.constant 61 : index
    %330 = memref.load %arg1[%c61] : memref<304xf32, #tpu.memory_space<smem>>
    %331 = vector.broadcast %330 : f32 to vector<8x128xf32>
    %332 = arith.mulf %331, %22 : vector<8x128xf32>
    %333 = arith.addf %329, %332 : vector<8x128xf32>
    %c62 = arith.constant 62 : index
    %334 = memref.load %arg1[%c62] : memref<304xf32, #tpu.memory_space<smem>>
    %335 = vector.broadcast %334 : f32 to vector<8x128xf32>
    %336 = arith.mulf %335, %28 : vector<8x128xf32>
    %337 = arith.addf %333, %336 : vector<8x128xf32>
    %c63 = arith.constant 63 : index
    %338 = memref.load %arg1[%c63] : memref<304xf32, #tpu.memory_space<smem>>
    %339 = vector.broadcast %338 : f32 to vector<8x128xf32>
    %340 = arith.mulf %339, %33 : vector<8x128xf32>
    %341 = arith.addf %337, %340 : vector<8x128xf32>
    %c64 = arith.constant 64 : index
    %342 = memref.load %arg1[%c64] : memref<304xf32, #tpu.memory_space<smem>>
    %343 = vector.broadcast %342 : f32 to vector<8x128xf32>
    %344 = arith.mulf %343, %30 : vector<8x128xf32>
    %345 = arith.addf %341, %344 : vector<8x128xf32>
    %c65 = arith.constant 65 : index
    %346 = memref.load %arg1[%c65] : memref<304xf32, #tpu.memory_space<smem>>
    %347 = vector.broadcast %346 : f32 to vector<8x128xf32>
    %348 = arith.mulf %347, %36 : vector<8x128xf32>
    %349 = arith.addf %345, %348 : vector<8x128xf32>
    %c66 = arith.constant 66 : index
    %350 = memref.load %arg1[%c66] : memref<304xf32, #tpu.memory_space<smem>>
    %351 = vector.broadcast %350 : f32 to vector<8x128xf32>
    %352 = arith.mulf %351, %41 : vector<8x128xf32>
    %353 = arith.addf %349, %352 : vector<8x128xf32>
    %c67 = arith.constant 67 : index
    %354 = memref.load %arg1[%c67] : memref<304xf32, #tpu.memory_space<smem>>
    %355 = vector.broadcast %354 : f32 to vector<8x128xf32>
    %356 = arith.mulf %355, %38 : vector<8x128xf32>
    %357 = arith.addf %353, %356 : vector<8x128xf32>
    %c68 = arith.constant 68 : index
    %358 = memref.load %arg1[%c68] : memref<304xf32, #tpu.memory_space<smem>>
    %359 = vector.broadcast %358 : f32 to vector<8x128xf32>
    %360 = arith.mulf %359, %44 : vector<8x128xf32>
    %361 = arith.addf %357, %360 : vector<8x128xf32>
    %c69 = arith.constant 69 : index
    %362 = memref.load %arg1[%c69] : memref<304xf32, #tpu.memory_space<smem>>
    %363 = vector.broadcast %362 : f32 to vector<8x128xf32>
    %364 = arith.mulf %363, %49 : vector<8x128xf32>
    %365 = arith.addf %361, %364 : vector<8x128xf32>
    %c70 = arith.constant 70 : index
    %366 = memref.load %arg1[%c70] : memref<304xf32, #tpu.memory_space<smem>>
    %367 = vector.broadcast %366 : f32 to vector<8x128xf32>
    %368 = arith.mulf %367, %46 : vector<8x128xf32>
    %369 = arith.addf %365, %368 : vector<8x128xf32>
    %c71 = arith.constant 71 : index
    %370 = memref.load %arg1[%c71] : memref<304xf32, #tpu.memory_space<smem>>
    %371 = vector.broadcast %370 : f32 to vector<8x128xf32>
    %372 = arith.mulf %371, %52 : vector<8x128xf32>
    %373 = arith.addf %369, %372 : vector<8x128xf32>
    %cst_59 = arith.constant 0.000000e+00 : f32
    %374 = vector.broadcast %cst_59 : f32 to vector<8x128xf32>
    %375 = arith.maximumf %373, %374 : vector<8x128xf32>
    %c127_i32_60 = arith.constant 127 : i32
    %376 = tpu.dynamic_rotate %375 by %c127_i32_60 dim 1 : vector<8x128xf32>, i32 -> vector<8x128xf32>
    %377 = arith.maximumf %375, %376 : vector<8x128xf32>
    %c3_61 = arith.constant 3 : index
    %c0_62 = arith.constant 0 : index
    %c0_63 = arith.constant 0 : index
    %378 = vector.load %arg3[%c3_61, %c0_62, %c0_63] : memref<16x128x64xf32, #tpu.memory_space<vmem>>, vector<1x128x64xf32>
    %379 = vector.shape_cast %378 : vector<1x128x64xf32> to vector<128x64xf32>
    %cst_64 = arith.constant dense<0.000000e+00> : vector<8x64xf32>
    %380 = tpu.matmul %377, %379, %cst_64 {dimension_numbers = #tpu.dot_dimension_numbers<[1], [0], [0], [1], [0, 0, 1, 1], [], []>} : vector<8x128xf32>, vector<128x64xf32>, vector<8x64xf32> -> vector<8x64xf32>
    %381 = arith.addf %299, %380 : vector<8x64xf32>
    %c292 = arith.constant 292 : index
    %382 = memref.load %arg1[%c292] : memref<304xf32, #tpu.memory_space<smem>>
    %383 = vector.broadcast %382 : f32 to vector<8x128xf32>
    %c72 = arith.constant 72 : index
    %384 = memref.load %arg1[%c72] : memref<304xf32, #tpu.memory_space<smem>>
    %385 = vector.broadcast %384 : f32 to vector<8x128xf32>
    %386 = arith.mulf %385, %9 : vector<8x128xf32>
    %387 = arith.addf %383, %386 : vector<8x128xf32>
    %c73 = arith.constant 73 : index
    %388 = memref.load %arg1[%c73] : memref<304xf32, #tpu.memory_space<smem>>
    %389 = vector.broadcast %388 : f32 to vector<8x128xf32>
    %390 = arith.mulf %389, %6 : vector<8x128xf32>
    %391 = arith.addf %387, %390 : vector<8x128xf32>
    %c74 = arith.constant 74 : index
    %392 = memref.load %arg1[%c74] : memref<304xf32, #tpu.memory_space<smem>>
    %393 = vector.broadcast %392 : f32 to vector<8x128xf32>
    %394 = arith.mulf %393, %12 : vector<8x128xf32>
    %395 = arith.addf %391, %394 : vector<8x128xf32>
    %c75 = arith.constant 75 : index
    %396 = memref.load %arg1[%c75] : memref<304xf32, #tpu.memory_space<smem>>
    %397 = vector.broadcast %396 : f32 to vector<8x128xf32>
    %398 = arith.mulf %397, %17 : vector<8x128xf32>
    %399 = arith.addf %395, %398 : vector<8x128xf32>
    %c76 = arith.constant 76 : index
    %400 = memref.load %arg1[%c76] : memref<304xf32, #tpu.memory_space<smem>>
    %401 = vector.broadcast %400 : f32 to vector<8x128xf32>
    %402 = arith.mulf %401, %14 : vector<8x128xf32>
    %403 = arith.addf %399, %402 : vector<8x128xf32>
    %c77 = arith.constant 77 : index
    %404 = memref.load %arg1[%c77] : memref<304xf32, #tpu.memory_space<smem>>
    %405 = vector.broadcast %404 : f32 to vector<8x128xf32>
    %406 = arith.mulf %405, %20 : vector<8x128xf32>
    %407 = arith.addf %403, %406 : vector<8x128xf32>
    %c78 = arith.constant 78 : index
    %408 = memref.load %arg1[%c78] : memref<304xf32, #tpu.memory_space<smem>>
    %409 = vector.broadcast %408 : f32 to vector<8x128xf32>
    %410 = arith.mulf %409, %25 : vector<8x128xf32>
    %411 = arith.addf %407, %410 : vector<8x128xf32>
    %c79 = arith.constant 79 : index
    %412 = memref.load %arg1[%c79] : memref<304xf32, #tpu.memory_space<smem>>
    %413 = vector.broadcast %412 : f32 to vector<8x128xf32>
    %414 = arith.mulf %413, %22 : vector<8x128xf32>
    %415 = arith.addf %411, %414 : vector<8x128xf32>
    %c80 = arith.constant 80 : index
    %416 = memref.load %arg1[%c80] : memref<304xf32, #tpu.memory_space<smem>>
    %417 = vector.broadcast %416 : f32 to vector<8x128xf32>
    %418 = arith.mulf %417, %28 : vector<8x128xf32>
    %419 = arith.addf %415, %418 : vector<8x128xf32>
    %c81 = arith.constant 81 : index
    %420 = memref.load %arg1[%c81] : memref<304xf32, #tpu.memory_space<smem>>
    %421 = vector.broadcast %420 : f32 to vector<8x128xf32>
    %422 = arith.mulf %421, %33 : vector<8x128xf32>
    %423 = arith.addf %419, %422 : vector<8x128xf32>
    %c82 = arith.constant 82 : index
    %424 = memref.load %arg1[%c82] : memref<304xf32, #tpu.memory_space<smem>>
    %425 = vector.broadcast %424 : f32 to vector<8x128xf32>
    %426 = arith.mulf %425, %30 : vector<8x128xf32>
    %427 = arith.addf %423, %426 : vector<8x128xf32>
    %c83 = arith.constant 83 : index
    %428 = memref.load %arg1[%c83] : memref<304xf32, #tpu.memory_space<smem>>
    %429 = vector.broadcast %428 : f32 to vector<8x128xf32>
    %430 = arith.mulf %429, %36 : vector<8x128xf32>
    %431 = arith.addf %427, %430 : vector<8x128xf32>
    %c84 = arith.constant 84 : index
    %432 = memref.load %arg1[%c84] : memref<304xf32, #tpu.memory_space<smem>>
    %433 = vector.broadcast %432 : f32 to vector<8x128xf32>
    %434 = arith.mulf %433, %41 : vector<8x128xf32>
    %435 = arith.addf %431, %434 : vector<8x128xf32>
    %c85 = arith.constant 85 : index
    %436 = memref.load %arg1[%c85] : memref<304xf32, #tpu.memory_space<smem>>
    %437 = vector.broadcast %436 : f32 to vector<8x128xf32>
    %438 = arith.mulf %437, %38 : vector<8x128xf32>
    %439 = arith.addf %435, %438 : vector<8x128xf32>
    %c86 = arith.constant 86 : index
    %440 = memref.load %arg1[%c86] : memref<304xf32, #tpu.memory_space<smem>>
    %441 = vector.broadcast %440 : f32 to vector<8x128xf32>
    %442 = arith.mulf %441, %44 : vector<8x128xf32>
    %443 = arith.addf %439, %442 : vector<8x128xf32>
    %c87 = arith.constant 87 : index
    %444 = memref.load %arg1[%c87] : memref<304xf32, #tpu.memory_space<smem>>
    %445 = vector.broadcast %444 : f32 to vector<8x128xf32>
    %446 = arith.mulf %445, %49 : vector<8x128xf32>
    %447 = arith.addf %443, %446 : vector<8x128xf32>
    %c88 = arith.constant 88 : index
    %448 = memref.load %arg1[%c88] : memref<304xf32, #tpu.memory_space<smem>>
    %449 = vector.broadcast %448 : f32 to vector<8x128xf32>
    %450 = arith.mulf %449, %46 : vector<8x128xf32>
    %451 = arith.addf %447, %450 : vector<8x128xf32>
    %c89 = arith.constant 89 : index
    %452 = memref.load %arg1[%c89] : memref<304xf32, #tpu.memory_space<smem>>
    %453 = vector.broadcast %452 : f32 to vector<8x128xf32>
    %454 = arith.mulf %453, %52 : vector<8x128xf32>
    %455 = arith.addf %451, %454 : vector<8x128xf32>
    %cst_65 = arith.constant 0.000000e+00 : f32
    %456 = vector.broadcast %cst_65 : f32 to vector<8x128xf32>
    %457 = arith.maximumf %455, %456 : vector<8x128xf32>
    %c127_i32_66 = arith.constant 127 : i32
    %458 = tpu.dynamic_rotate %457 by %c127_i32_66 dim 1 : vector<8x128xf32>, i32 -> vector<8x128xf32>
    %459 = arith.maximumf %457, %458 : vector<8x128xf32>
    %c4_67 = arith.constant 4 : index
    %c0_68 = arith.constant 0 : index
    %c0_69 = arith.constant 0 : index
    %460 = vector.load %arg3[%c4_67, %c0_68, %c0_69] : memref<16x128x64xf32, #tpu.memory_space<vmem>>, vector<1x128x64xf32>
    %461 = vector.shape_cast %460 : vector<1x128x64xf32> to vector<128x64xf32>
    %cst_70 = arith.constant dense<0.000000e+00> : vector<8x64xf32>
    %462 = tpu.matmul %459, %461, %cst_70 {dimension_numbers = #tpu.dot_dimension_numbers<[1], [0], [0], [1], [0, 0, 1, 1], [], []>} : vector<8x128xf32>, vector<128x64xf32>, vector<8x64xf32> -> vector<8x64xf32>
    %463 = arith.addf %381, %462 : vector<8x64xf32>
    %c293 = arith.constant 293 : index
    %464 = memref.load %arg1[%c293] : memref<304xf32, #tpu.memory_space<smem>>
    %465 = vector.broadcast %464 : f32 to vector<8x128xf32>
    %c90 = arith.constant 90 : index
    %466 = memref.load %arg1[%c90] : memref<304xf32, #tpu.memory_space<smem>>
    %467 = vector.broadcast %466 : f32 to vector<8x128xf32>
    %468 = arith.mulf %467, %9 : vector<8x128xf32>
    %469 = arith.addf %465, %468 : vector<8x128xf32>
    %c91 = arith.constant 91 : index
    %470 = memref.load %arg1[%c91] : memref<304xf32, #tpu.memory_space<smem>>
    %471 = vector.broadcast %470 : f32 to vector<8x128xf32>
    %472 = arith.mulf %471, %6 : vector<8x128xf32>
    %473 = arith.addf %469, %472 : vector<8x128xf32>
    %c92 = arith.constant 92 : index
    %474 = memref.load %arg1[%c92] : memref<304xf32, #tpu.memory_space<smem>>
    %475 = vector.broadcast %474 : f32 to vector<8x128xf32>
    %476 = arith.mulf %475, %12 : vector<8x128xf32>
    %477 = arith.addf %473, %476 : vector<8x128xf32>
    %c93 = arith.constant 93 : index
    %478 = memref.load %arg1[%c93] : memref<304xf32, #tpu.memory_space<smem>>
    %479 = vector.broadcast %478 : f32 to vector<8x128xf32>
    %480 = arith.mulf %479, %17 : vector<8x128xf32>
    %481 = arith.addf %477, %480 : vector<8x128xf32>
    %c94 = arith.constant 94 : index
    %482 = memref.load %arg1[%c94] : memref<304xf32, #tpu.memory_space<smem>>
    %483 = vector.broadcast %482 : f32 to vector<8x128xf32>
    %484 = arith.mulf %483, %14 : vector<8x128xf32>
    %485 = arith.addf %481, %484 : vector<8x128xf32>
    %c95 = arith.constant 95 : index
    %486 = memref.load %arg1[%c95] : memref<304xf32, #tpu.memory_space<smem>>
    %487 = vector.broadcast %486 : f32 to vector<8x128xf32>
    %488 = arith.mulf %487, %20 : vector<8x128xf32>
    %489 = arith.addf %485, %488 : vector<8x128xf32>
    %c96 = arith.constant 96 : index
    %490 = memref.load %arg1[%c96] : memref<304xf32, #tpu.memory_space<smem>>
    %491 = vector.broadcast %490 : f32 to vector<8x128xf32>
    %492 = arith.mulf %491, %25 : vector<8x128xf32>
    %493 = arith.addf %489, %492 : vector<8x128xf32>
    %c97 = arith.constant 97 : index
    %494 = memref.load %arg1[%c97] : memref<304xf32, #tpu.memory_space<smem>>
    %495 = vector.broadcast %494 : f32 to vector<8x128xf32>
    %496 = arith.mulf %495, %22 : vector<8x128xf32>
    %497 = arith.addf %493, %496 : vector<8x128xf32>
    %c98 = arith.constant 98 : index
    %498 = memref.load %arg1[%c98] : memref<304xf32, #tpu.memory_space<smem>>
    %499 = vector.broadcast %498 : f32 to vector<8x128xf32>
    %500 = arith.mulf %499, %28 : vector<8x128xf32>
    %501 = arith.addf %497, %500 : vector<8x128xf32>
    %c99 = arith.constant 99 : index
    %502 = memref.load %arg1[%c99] : memref<304xf32, #tpu.memory_space<smem>>
    %503 = vector.broadcast %502 : f32 to vector<8x128xf32>
    %504 = arith.mulf %503, %33 : vector<8x128xf32>
    %505 = arith.addf %501, %504 : vector<8x128xf32>
    %c100 = arith.constant 100 : index
    %506 = memref.load %arg1[%c100] : memref<304xf32, #tpu.memory_space<smem>>
    %507 = vector.broadcast %506 : f32 to vector<8x128xf32>
    %508 = arith.mulf %507, %30 : vector<8x128xf32>
    %509 = arith.addf %505, %508 : vector<8x128xf32>
    %c101 = arith.constant 101 : index
    %510 = memref.load %arg1[%c101] : memref<304xf32, #tpu.memory_space<smem>>
    %511 = vector.broadcast %510 : f32 to vector<8x128xf32>
    %512 = arith.mulf %511, %36 : vector<8x128xf32>
    %513 = arith.addf %509, %512 : vector<8x128xf32>
    %c102 = arith.constant 102 : index
    %514 = memref.load %arg1[%c102] : memref<304xf32, #tpu.memory_space<smem>>
    %515 = vector.broadcast %514 : f32 to vector<8x128xf32>
    %516 = arith.mulf %515, %41 : vector<8x128xf32>
    %517 = arith.addf %513, %516 : vector<8x128xf32>
    %c103 = arith.constant 103 : index
    %518 = memref.load %arg1[%c103] : memref<304xf32, #tpu.memory_space<smem>>
    %519 = vector.broadcast %518 : f32 to vector<8x128xf32>
    %520 = arith.mulf %519, %38 : vector<8x128xf32>
    %521 = arith.addf %517, %520 : vector<8x128xf32>
    %c104 = arith.constant 104 : index
    %522 = memref.load %arg1[%c104] : memref<304xf32, #tpu.memory_space<smem>>
    %523 = vector.broadcast %522 : f32 to vector<8x128xf32>
    %524 = arith.mulf %523, %44 : vector<8x128xf32>
    %525 = arith.addf %521, %524 : vector<8x128xf32>
    %c105 = arith.constant 105 : index
    %526 = memref.load %arg1[%c105] : memref<304xf32, #tpu.memory_space<smem>>
    %527 = vector.broadcast %526 : f32 to vector<8x128xf32>
    %528 = arith.mulf %527, %49 : vector<8x128xf32>
    %529 = arith.addf %525, %528 : vector<8x128xf32>
    %c106 = arith.constant 106 : index
    %530 = memref.load %arg1[%c106] : memref<304xf32, #tpu.memory_space<smem>>
    %531 = vector.broadcast %530 : f32 to vector<8x128xf32>
    %532 = arith.mulf %531, %46 : vector<8x128xf32>
    %533 = arith.addf %529, %532 : vector<8x128xf32>
    %c107 = arith.constant 107 : index
    %534 = memref.load %arg1[%c107] : memref<304xf32, #tpu.memory_space<smem>>
    %535 = vector.broadcast %534 : f32 to vector<8x128xf32>
    %536 = arith.mulf %535, %52 : vector<8x128xf32>
    %537 = arith.addf %533, %536 : vector<8x128xf32>
    %cst_71 = arith.constant 0.000000e+00 : f32
    %538 = vector.broadcast %cst_71 : f32 to vector<8x128xf32>
    %539 = arith.maximumf %537, %538 : vector<8x128xf32>
    %c127_i32_72 = arith.constant 127 : i32
    %540 = tpu.dynamic_rotate %539 by %c127_i32_72 dim 1 : vector<8x128xf32>, i32 -> vector<8x128xf32>
    %541 = arith.maximumf %539, %540 : vector<8x128xf32>
    %c5_73 = arith.constant 5 : index
    %c0_74 = arith.constant 0 : index
    %c0_75 = arith.constant 0 : index
    %542 = vector.load %arg3[%c5_73, %c0_74, %c0_75] : memref<16x128x64xf32, #tpu.memory_space<vmem>>, vector<1x128x64xf32>
    %543 = vector.shape_cast %542 : vector<1x128x64xf32> to vector<128x64xf32>
    %cst_76 = arith.constant dense<0.000000e+00> : vector<8x64xf32>
    %544 = tpu.matmul %541, %543, %cst_76 {dimension_numbers = #tpu.dot_dimension_numbers<[1], [0], [0], [1], [0, 0, 1, 1], [], []>} : vector<8x128xf32>, vector<128x64xf32>, vector<8x64xf32> -> vector<8x64xf32>
    %545 = arith.addf %463, %544 : vector<8x64xf32>
    %c294 = arith.constant 294 : index
    %546 = memref.load %arg1[%c294] : memref<304xf32, #tpu.memory_space<smem>>
    %547 = vector.broadcast %546 : f32 to vector<8x128xf32>
    %c108 = arith.constant 108 : index
    %548 = memref.load %arg1[%c108] : memref<304xf32, #tpu.memory_space<smem>>
    %549 = vector.broadcast %548 : f32 to vector<8x128xf32>
    %550 = arith.mulf %549, %9 : vector<8x128xf32>
    %551 = arith.addf %547, %550 : vector<8x128xf32>
    %c109 = arith.constant 109 : index
    %552 = memref.load %arg1[%c109] : memref<304xf32, #tpu.memory_space<smem>>
    %553 = vector.broadcast %552 : f32 to vector<8x128xf32>
    %554 = arith.mulf %553, %6 : vector<8x128xf32>
    %555 = arith.addf %551, %554 : vector<8x128xf32>
    %c110 = arith.constant 110 : index
    %556 = memref.load %arg1[%c110] : memref<304xf32, #tpu.memory_space<smem>>
    %557 = vector.broadcast %556 : f32 to vector<8x128xf32>
    %558 = arith.mulf %557, %12 : vector<8x128xf32>
    %559 = arith.addf %555, %558 : vector<8x128xf32>
    %c111 = arith.constant 111 : index
    %560 = memref.load %arg1[%c111] : memref<304xf32, #tpu.memory_space<smem>>
    %561 = vector.broadcast %560 : f32 to vector<8x128xf32>
    %562 = arith.mulf %561, %17 : vector<8x128xf32>
    %563 = arith.addf %559, %562 : vector<8x128xf32>
    %c112 = arith.constant 112 : index
    %564 = memref.load %arg1[%c112] : memref<304xf32, #tpu.memory_space<smem>>
    %565 = vector.broadcast %564 : f32 to vector<8x128xf32>
    %566 = arith.mulf %565, %14 : vector<8x128xf32>
    %567 = arith.addf %563, %566 : vector<8x128xf32>
    %c113 = arith.constant 113 : index
    %568 = memref.load %arg1[%c113] : memref<304xf32, #tpu.memory_space<smem>>
    %569 = vector.broadcast %568 : f32 to vector<8x128xf32>
    %570 = arith.mulf %569, %20 : vector<8x128xf32>
    %571 = arith.addf %567, %570 : vector<8x128xf32>
    %c114 = arith.constant 114 : index
    %572 = memref.load %arg1[%c114] : memref<304xf32, #tpu.memory_space<smem>>
    %573 = vector.broadcast %572 : f32 to vector<8x128xf32>
    %574 = arith.mulf %573, %25 : vector<8x128xf32>
    %575 = arith.addf %571, %574 : vector<8x128xf32>
    %c115 = arith.constant 115 : index
    %576 = memref.load %arg1[%c115] : memref<304xf32, #tpu.memory_space<smem>>
    %577 = vector.broadcast %576 : f32 to vector<8x128xf32>
    %578 = arith.mulf %577, %22 : vector<8x128xf32>
    %579 = arith.addf %575, %578 : vector<8x128xf32>
    %c116 = arith.constant 116 : index
    %580 = memref.load %arg1[%c116] : memref<304xf32, #tpu.memory_space<smem>>
    %581 = vector.broadcast %580 : f32 to vector<8x128xf32>
    %582 = arith.mulf %581, %28 : vector<8x128xf32>
    %583 = arith.addf %579, %582 : vector<8x128xf32>
    %c117 = arith.constant 117 : index
    %584 = memref.load %arg1[%c117] : memref<304xf32, #tpu.memory_space<smem>>
    %585 = vector.broadcast %584 : f32 to vector<8x128xf32>
    %586 = arith.mulf %585, %33 : vector<8x128xf32>
    %587 = arith.addf %583, %586 : vector<8x128xf32>
    %c118 = arith.constant 118 : index
    %588 = memref.load %arg1[%c118] : memref<304xf32, #tpu.memory_space<smem>>
    %589 = vector.broadcast %588 : f32 to vector<8x128xf32>
    %590 = arith.mulf %589, %30 : vector<8x128xf32>
    %591 = arith.addf %587, %590 : vector<8x128xf32>
    %c119 = arith.constant 119 : index
    %592 = memref.load %arg1[%c119] : memref<304xf32, #tpu.memory_space<smem>>
    %593 = vector.broadcast %592 : f32 to vector<8x128xf32>
    %594 = arith.mulf %593, %36 : vector<8x128xf32>
    %595 = arith.addf %591, %594 : vector<8x128xf32>
    %c120 = arith.constant 120 : index
    %596 = memref.load %arg1[%c120] : memref<304xf32, #tpu.memory_space<smem>>
    %597 = vector.broadcast %596 : f32 to vector<8x128xf32>
    %598 = arith.mulf %597, %41 : vector<8x128xf32>
    %599 = arith.addf %595, %598 : vector<8x128xf32>
    %c121 = arith.constant 121 : index
    %600 = memref.load %arg1[%c121] : memref<304xf32, #tpu.memory_space<smem>>
    %601 = vector.broadcast %600 : f32 to vector<8x128xf32>
    %602 = arith.mulf %601, %38 : vector<8x128xf32>
    %603 = arith.addf %599, %602 : vector<8x128xf32>
    %c122 = arith.constant 122 : index
    %604 = memref.load %arg1[%c122] : memref<304xf32, #tpu.memory_space<smem>>
    %605 = vector.broadcast %604 : f32 to vector<8x128xf32>
    %606 = arith.mulf %605, %44 : vector<8x128xf32>
    %607 = arith.addf %603, %606 : vector<8x128xf32>
    %c123 = arith.constant 123 : index
    %608 = memref.load %arg1[%c123] : memref<304xf32, #tpu.memory_space<smem>>
    %609 = vector.broadcast %608 : f32 to vector<8x128xf32>
    %610 = arith.mulf %609, %49 : vector<8x128xf32>
    %611 = arith.addf %607, %610 : vector<8x128xf32>
    %c124 = arith.constant 124 : index
    %612 = memref.load %arg1[%c124] : memref<304xf32, #tpu.memory_space<smem>>
    %613 = vector.broadcast %612 : f32 to vector<8x128xf32>
    %614 = arith.mulf %613, %46 : vector<8x128xf32>
    %615 = arith.addf %611, %614 : vector<8x128xf32>
    %c125 = arith.constant 125 : index
    %616 = memref.load %arg1[%c125] : memref<304xf32, #tpu.memory_space<smem>>
    %617 = vector.broadcast %616 : f32 to vector<8x128xf32>
    %618 = arith.mulf %617, %52 : vector<8x128xf32>
    %619 = arith.addf %615, %618 : vector<8x128xf32>
    %cst_77 = arith.constant 0.000000e+00 : f32
    %620 = vector.broadcast %cst_77 : f32 to vector<8x128xf32>
    %621 = arith.maximumf %619, %620 : vector<8x128xf32>
    %c127_i32_78 = arith.constant 127 : i32
    %622 = tpu.dynamic_rotate %621 by %c127_i32_78 dim 1 : vector<8x128xf32>, i32 -> vector<8x128xf32>
    %623 = arith.maximumf %621, %622 : vector<8x128xf32>
    %c6_79 = arith.constant 6 : index
    %c0_80 = arith.constant 0 : index
    %c0_81 = arith.constant 0 : index
    %624 = vector.load %arg3[%c6_79, %c0_80, %c0_81] : memref<16x128x64xf32, #tpu.memory_space<vmem>>, vector<1x128x64xf32>
    %625 = vector.shape_cast %624 : vector<1x128x64xf32> to vector<128x64xf32>
    %cst_82 = arith.constant dense<0.000000e+00> : vector<8x64xf32>
    %626 = tpu.matmul %623, %625, %cst_82 {dimension_numbers = #tpu.dot_dimension_numbers<[1], [0], [0], [1], [0, 0, 1, 1], [], []>} : vector<8x128xf32>, vector<128x64xf32>, vector<8x64xf32> -> vector<8x64xf32>
    %627 = arith.addf %545, %626 : vector<8x64xf32>
    %c295 = arith.constant 295 : index
    %628 = memref.load %arg1[%c295] : memref<304xf32, #tpu.memory_space<smem>>
    %629 = vector.broadcast %628 : f32 to vector<8x128xf32>
    %c126 = arith.constant 126 : index
    %630 = memref.load %arg1[%c126] : memref<304xf32, #tpu.memory_space<smem>>
    %631 = vector.broadcast %630 : f32 to vector<8x128xf32>
    %632 = arith.mulf %631, %9 : vector<8x128xf32>
    %633 = arith.addf %629, %632 : vector<8x128xf32>
    %c127 = arith.constant 127 : index
    %634 = memref.load %arg1[%c127] : memref<304xf32, #tpu.memory_space<smem>>
    %635 = vector.broadcast %634 : f32 to vector<8x128xf32>
    %636 = arith.mulf %635, %6 : vector<8x128xf32>
    %637 = arith.addf %633, %636 : vector<8x128xf32>
    %c128 = arith.constant 128 : index
    %638 = memref.load %arg1[%c128] : memref<304xf32, #tpu.memory_space<smem>>
    %639 = vector.broadcast %638 : f32 to vector<8x128xf32>
    %640 = arith.mulf %639, %12 : vector<8x128xf32>
    %641 = arith.addf %637, %640 : vector<8x128xf32>
    %c129 = arith.constant 129 : index
    %642 = memref.load %arg1[%c129] : memref<304xf32, #tpu.memory_space<smem>>
    %643 = vector.broadcast %642 : f32 to vector<8x128xf32>
    %644 = arith.mulf %643, %17 : vector<8x128xf32>
    %645 = arith.addf %641, %644 : vector<8x128xf32>
    %c130 = arith.constant 130 : index
    %646 = memref.load %arg1[%c130] : memref<304xf32, #tpu.memory_space<smem>>
    %647 = vector.broadcast %646 : f32 to vector<8x128xf32>
    %648 = arith.mulf %647, %14 : vector<8x128xf32>
    %649 = arith.addf %645, %648 : vector<8x128xf32>
    %c131 = arith.constant 131 : index
    %650 = memref.load %arg1[%c131] : memref<304xf32, #tpu.memory_space<smem>>
    %651 = vector.broadcast %650 : f32 to vector<8x128xf32>
    %652 = arith.mulf %651, %20 : vector<8x128xf32>
    %653 = arith.addf %649, %652 : vector<8x128xf32>
    %c132 = arith.constant 132 : index
    %654 = memref.load %arg1[%c132] : memref<304xf32, #tpu.memory_space<smem>>
    %655 = vector.broadcast %654 : f32 to vector<8x128xf32>
    %656 = arith.mulf %655, %25 : vector<8x128xf32>
    %657 = arith.addf %653, %656 : vector<8x128xf32>
    %c133 = arith.constant 133 : index
    %658 = memref.load %arg1[%c133] : memref<304xf32, #tpu.memory_space<smem>>
    %659 = vector.broadcast %658 : f32 to vector<8x128xf32>
    %660 = arith.mulf %659, %22 : vector<8x128xf32>
    %661 = arith.addf %657, %660 : vector<8x128xf32>
    %c134 = arith.constant 134 : index
    %662 = memref.load %arg1[%c134] : memref<304xf32, #tpu.memory_space<smem>>
    %663 = vector.broadcast %662 : f32 to vector<8x128xf32>
    %664 = arith.mulf %663, %28 : vector<8x128xf32>
    %665 = arith.addf %661, %664 : vector<8x128xf32>
    %c135 = arith.constant 135 : index
    %666 = memref.load %arg1[%c135] : memref<304xf32, #tpu.memory_space<smem>>
    %667 = vector.broadcast %666 : f32 to vector<8x128xf32>
    %668 = arith.mulf %667, %33 : vector<8x128xf32>
    %669 = arith.addf %665, %668 : vector<8x128xf32>
    %c136 = arith.constant 136 : index
    %670 = memref.load %arg1[%c136] : memref<304xf32, #tpu.memory_space<smem>>
    %671 = vector.broadcast %670 : f32 to vector<8x128xf32>
    %672 = arith.mulf %671, %30 : vector<8x128xf32>
    %673 = arith.addf %669, %672 : vector<8x128xf32>
    %c137 = arith.constant 137 : index
    %674 = memref.load %arg1[%c137] : memref<304xf32, #tpu.memory_space<smem>>
    %675 = vector.broadcast %674 : f32 to vector<8x128xf32>
    %676 = arith.mulf %675, %36 : vector<8x128xf32>
    %677 = arith.addf %673, %676 : vector<8x128xf32>
    %c138 = arith.constant 138 : index
    %678 = memref.load %arg1[%c138] : memref<304xf32, #tpu.memory_space<smem>>
    %679 = vector.broadcast %678 : f32 to vector<8x128xf32>
    %680 = arith.mulf %679, %41 : vector<8x128xf32>
    %681 = arith.addf %677, %680 : vector<8x128xf32>
    %c139 = arith.constant 139 : index
    %682 = memref.load %arg1[%c139] : memref<304xf32, #tpu.memory_space<smem>>
    %683 = vector.broadcast %682 : f32 to vector<8x128xf32>
    %684 = arith.mulf %683, %38 : vector<8x128xf32>
    %685 = arith.addf %681, %684 : vector<8x128xf32>
    %c140 = arith.constant 140 : index
    %686 = memref.load %arg1[%c140] : memref<304xf32, #tpu.memory_space<smem>>
    %687 = vector.broadcast %686 : f32 to vector<8x128xf32>
    %688 = arith.mulf %687, %44 : vector<8x128xf32>
    %689 = arith.addf %685, %688 : vector<8x128xf32>
    %c141 = arith.constant 141 : index
    %690 = memref.load %arg1[%c141] : memref<304xf32, #tpu.memory_space<smem>>
    %691 = vector.broadcast %690 : f32 to vector<8x128xf32>
    %692 = arith.mulf %691, %49 : vector<8x128xf32>
    %693 = arith.addf %689, %692 : vector<8x128xf32>
    %c142 = arith.constant 142 : index
    %694 = memref.load %arg1[%c142] : memref<304xf32, #tpu.memory_space<smem>>
    %695 = vector.broadcast %694 : f32 to vector<8x128xf32>
    %696 = arith.mulf %695, %46 : vector<8x128xf32>
    %697 = arith.addf %693, %696 : vector<8x128xf32>
    %c143 = arith.constant 143 : index
    %698 = memref.load %arg1[%c143] : memref<304xf32, #tpu.memory_space<smem>>
    %699 = vector.broadcast %698 : f32 to vector<8x128xf32>
    %700 = arith.mulf %699, %52 : vector<8x128xf32>
    %701 = arith.addf %697, %700 : vector<8x128xf32>
    %cst_83 = arith.constant 0.000000e+00 : f32
    %702 = vector.broadcast %cst_83 : f32 to vector<8x128xf32>
    %703 = arith.maximumf %701, %702 : vector<8x128xf32>
    %c127_i32_84 = arith.constant 127 : i32
    %704 = tpu.dynamic_rotate %703 by %c127_i32_84 dim 1 : vector<8x128xf32>, i32 -> vector<8x128xf32>
    %705 = arith.maximumf %703, %704 : vector<8x128xf32>
    %c7_85 = arith.constant 7 : index
    %c0_86 = arith.constant 0 : index
    %c0_87 = arith.constant 0 : index
    %706 = vector.load %arg3[%c7_85, %c0_86, %c0_87] : memref<16x128x64xf32, #tpu.memory_space<vmem>>, vector<1x128x64xf32>
    %707 = vector.shape_cast %706 : vector<1x128x64xf32> to vector<128x64xf32>
    %cst_88 = arith.constant dense<0.000000e+00> : vector<8x64xf32>
    %708 = tpu.matmul %705, %707, %cst_88 {dimension_numbers = #tpu.dot_dimension_numbers<[1], [0], [0], [1], [0, 0, 1, 1], [], []>} : vector<8x128xf32>, vector<128x64xf32>, vector<8x64xf32> -> vector<8x64xf32>
    %709 = arith.addf %627, %708 : vector<8x64xf32>
    %c296 = arith.constant 296 : index
    %710 = memref.load %arg1[%c296] : memref<304xf32, #tpu.memory_space<smem>>
    %711 = vector.broadcast %710 : f32 to vector<8x128xf32>
    %c144 = arith.constant 144 : index
    %712 = memref.load %arg1[%c144] : memref<304xf32, #tpu.memory_space<smem>>
    %713 = vector.broadcast %712 : f32 to vector<8x128xf32>
    %714 = arith.mulf %713, %9 : vector<8x128xf32>
    %715 = arith.addf %711, %714 : vector<8x128xf32>
    %c145 = arith.constant 145 : index
    %716 = memref.load %arg1[%c145] : memref<304xf32, #tpu.memory_space<smem>>
    %717 = vector.broadcast %716 : f32 to vector<8x128xf32>
    %718 = arith.mulf %717, %6 : vector<8x128xf32>
    %719 = arith.addf %715, %718 : vector<8x128xf32>
    %c146 = arith.constant 146 : index
    %720 = memref.load %arg1[%c146] : memref<304xf32, #tpu.memory_space<smem>>
    %721 = vector.broadcast %720 : f32 to vector<8x128xf32>
    %722 = arith.mulf %721, %12 : vector<8x128xf32>
    %723 = arith.addf %719, %722 : vector<8x128xf32>
    %c147 = arith.constant 147 : index
    %724 = memref.load %arg1[%c147] : memref<304xf32, #tpu.memory_space<smem>>
    %725 = vector.broadcast %724 : f32 to vector<8x128xf32>
    %726 = arith.mulf %725, %17 : vector<8x128xf32>
    %727 = arith.addf %723, %726 : vector<8x128xf32>
    %c148 = arith.constant 148 : index
    %728 = memref.load %arg1[%c148] : memref<304xf32, #tpu.memory_space<smem>>
    %729 = vector.broadcast %728 : f32 to vector<8x128xf32>
    %730 = arith.mulf %729, %14 : vector<8x128xf32>
    %731 = arith.addf %727, %730 : vector<8x128xf32>
    %c149 = arith.constant 149 : index
    %732 = memref.load %arg1[%c149] : memref<304xf32, #tpu.memory_space<smem>>
    %733 = vector.broadcast %732 : f32 to vector<8x128xf32>
    %734 = arith.mulf %733, %20 : vector<8x128xf32>
    %735 = arith.addf %731, %734 : vector<8x128xf32>
    %c150 = arith.constant 150 : index
    %736 = memref.load %arg1[%c150] : memref<304xf32, #tpu.memory_space<smem>>
    %737 = vector.broadcast %736 : f32 to vector<8x128xf32>
    %738 = arith.mulf %737, %25 : vector<8x128xf32>
    %739 = arith.addf %735, %738 : vector<8x128xf32>
    %c151 = arith.constant 151 : index
    %740 = memref.load %arg1[%c151] : memref<304xf32, #tpu.memory_space<smem>>
    %741 = vector.broadcast %740 : f32 to vector<8x128xf32>
    %742 = arith.mulf %741, %22 : vector<8x128xf32>
    %743 = arith.addf %739, %742 : vector<8x128xf32>
    %c152 = arith.constant 152 : index
    %744 = memref.load %arg1[%c152] : memref<304xf32, #tpu.memory_space<smem>>
    %745 = vector.broadcast %744 : f32 to vector<8x128xf32>
    %746 = arith.mulf %745, %28 : vector<8x128xf32>
    %747 = arith.addf %743, %746 : vector<8x128xf32>
    %c153 = arith.constant 153 : index
    %748 = memref.load %arg1[%c153] : memref<304xf32, #tpu.memory_space<smem>>
    %749 = vector.broadcast %748 : f32 to vector<8x128xf32>
    %750 = arith.mulf %749, %33 : vector<8x128xf32>
    %751 = arith.addf %747, %750 : vector<8x128xf32>
    %c154 = arith.constant 154 : index
    %752 = memref.load %arg1[%c154] : memref<304xf32, #tpu.memory_space<smem>>
    %753 = vector.broadcast %752 : f32 to vector<8x128xf32>
    %754 = arith.mulf %753, %30 : vector<8x128xf32>
    %755 = arith.addf %751, %754 : vector<8x128xf32>
    %c155 = arith.constant 155 : index
    %756 = memref.load %arg1[%c155] : memref<304xf32, #tpu.memory_space<smem>>
    %757 = vector.broadcast %756 : f32 to vector<8x128xf32>
    %758 = arith.mulf %757, %36 : vector<8x128xf32>
    %759 = arith.addf %755, %758 : vector<8x128xf32>
    %c156 = arith.constant 156 : index
    %760 = memref.load %arg1[%c156] : memref<304xf32, #tpu.memory_space<smem>>
    %761 = vector.broadcast %760 : f32 to vector<8x128xf32>
    %762 = arith.mulf %761, %41 : vector<8x128xf32>
    %763 = arith.addf %759, %762 : vector<8x128xf32>
    %c157 = arith.constant 157 : index
    %764 = memref.load %arg1[%c157] : memref<304xf32, #tpu.memory_space<smem>>
    %765 = vector.broadcast %764 : f32 to vector<8x128xf32>
    %766 = arith.mulf %765, %38 : vector<8x128xf32>
    %767 = arith.addf %763, %766 : vector<8x128xf32>
    %c158 = arith.constant 158 : index
    %768 = memref.load %arg1[%c158] : memref<304xf32, #tpu.memory_space<smem>>
    %769 = vector.broadcast %768 : f32 to vector<8x128xf32>
    %770 = arith.mulf %769, %44 : vector<8x128xf32>
    %771 = arith.addf %767, %770 : vector<8x128xf32>
    %c159 = arith.constant 159 : index
    %772 = memref.load %arg1[%c159] : memref<304xf32, #tpu.memory_space<smem>>
    %773 = vector.broadcast %772 : f32 to vector<8x128xf32>
    %774 = arith.mulf %773, %49 : vector<8x128xf32>
    %775 = arith.addf %771, %774 : vector<8x128xf32>
    %c160 = arith.constant 160 : index
    %776 = memref.load %arg1[%c160] : memref<304xf32, #tpu.memory_space<smem>>
    %777 = vector.broadcast %776 : f32 to vector<8x128xf32>
    %778 = arith.mulf %777, %46 : vector<8x128xf32>
    %779 = arith.addf %775, %778 : vector<8x128xf32>
    %c161 = arith.constant 161 : index
    %780 = memref.load %arg1[%c161] : memref<304xf32, #tpu.memory_space<smem>>
    %781 = vector.broadcast %780 : f32 to vector<8x128xf32>
    %782 = arith.mulf %781, %52 : vector<8x128xf32>
    %783 = arith.addf %779, %782 : vector<8x128xf32>
    %cst_89 = arith.constant 0.000000e+00 : f32
    %784 = vector.broadcast %cst_89 : f32 to vector<8x128xf32>
    %785 = arith.maximumf %783, %784 : vector<8x128xf32>
    %c127_i32_90 = arith.constant 127 : i32
    %786 = tpu.dynamic_rotate %785 by %c127_i32_90 dim 1 : vector<8x128xf32>, i32 -> vector<8x128xf32>
    %787 = arith.maximumf %785, %786 : vector<8x128xf32>
    %c8_91 = arith.constant 8 : index
    %c0_92 = arith.constant 0 : index
    %c0_93 = arith.constant 0 : index
    %788 = vector.load %arg3[%c8_91, %c0_92, %c0_93] : memref<16x128x64xf32, #tpu.memory_space<vmem>>, vector<1x128x64xf32>
    %789 = vector.shape_cast %788 : vector<1x128x64xf32> to vector<128x64xf32>
    %cst_94 = arith.constant dense<0.000000e+00> : vector<8x64xf32>
    %790 = tpu.matmul %787, %789, %cst_94 {dimension_numbers = #tpu.dot_dimension_numbers<[1], [0], [0], [1], [0, 0, 1, 1], [], []>} : vector<8x128xf32>, vector<128x64xf32>, vector<8x64xf32> -> vector<8x64xf32>
    %791 = arith.addf %709, %790 : vector<8x64xf32>
    %c297 = arith.constant 297 : index
    %792 = memref.load %arg1[%c297] : memref<304xf32, #tpu.memory_space<smem>>
    %793 = vector.broadcast %792 : f32 to vector<8x128xf32>
    %c162 = arith.constant 162 : index
    %794 = memref.load %arg1[%c162] : memref<304xf32, #tpu.memory_space<smem>>
    %795 = vector.broadcast %794 : f32 to vector<8x128xf32>
    %796 = arith.mulf %795, %9 : vector<8x128xf32>
    %797 = arith.addf %793, %796 : vector<8x128xf32>
    %c163 = arith.constant 163 : index
    %798 = memref.load %arg1[%c163] : memref<304xf32, #tpu.memory_space<smem>>
    %799 = vector.broadcast %798 : f32 to vector<8x128xf32>
    %800 = arith.mulf %799, %6 : vector<8x128xf32>
    %801 = arith.addf %797, %800 : vector<8x128xf32>
    %c164 = arith.constant 164 : index
    %802 = memref.load %arg1[%c164] : memref<304xf32, #tpu.memory_space<smem>>
    %803 = vector.broadcast %802 : f32 to vector<8x128xf32>
    %804 = arith.mulf %803, %12 : vector<8x128xf32>
    %805 = arith.addf %801, %804 : vector<8x128xf32>
    %c165 = arith.constant 165 : index
    %806 = memref.load %arg1[%c165] : memref<304xf32, #tpu.memory_space<smem>>
    %807 = vector.broadcast %806 : f32 to vector<8x128xf32>
    %808 = arith.mulf %807, %17 : vector<8x128xf32>
    %809 = arith.addf %805, %808 : vector<8x128xf32>
    %c166 = arith.constant 166 : index
    %810 = memref.load %arg1[%c166] : memref<304xf32, #tpu.memory_space<smem>>
    %811 = vector.broadcast %810 : f32 to vector<8x128xf32>
    %812 = arith.mulf %811, %14 : vector<8x128xf32>
    %813 = arith.addf %809, %812 : vector<8x128xf32>
    %c167 = arith.constant 167 : index
    %814 = memref.load %arg1[%c167] : memref<304xf32, #tpu.memory_space<smem>>
    %815 = vector.broadcast %814 : f32 to vector<8x128xf32>
    %816 = arith.mulf %815, %20 : vector<8x128xf32>
    %817 = arith.addf %813, %816 : vector<8x128xf32>
    %c168 = arith.constant 168 : index
    %818 = memref.load %arg1[%c168] : memref<304xf32, #tpu.memory_space<smem>>
    %819 = vector.broadcast %818 : f32 to vector<8x128xf32>
    %820 = arith.mulf %819, %25 : vector<8x128xf32>
    %821 = arith.addf %817, %820 : vector<8x128xf32>
    %c169 = arith.constant 169 : index
    %822 = memref.load %arg1[%c169] : memref<304xf32, #tpu.memory_space<smem>>
    %823 = vector.broadcast %822 : f32 to vector<8x128xf32>
    %824 = arith.mulf %823, %22 : vector<8x128xf32>
    %825 = arith.addf %821, %824 : vector<8x128xf32>
    %c170 = arith.constant 170 : index
    %826 = memref.load %arg1[%c170] : memref<304xf32, #tpu.memory_space<smem>>
    %827 = vector.broadcast %826 : f32 to vector<8x128xf32>
    %828 = arith.mulf %827, %28 : vector<8x128xf32>
    %829 = arith.addf %825, %828 : vector<8x128xf32>
    %c171 = arith.constant 171 : index
    %830 = memref.load %arg1[%c171] : memref<304xf32, #tpu.memory_space<smem>>
    %831 = vector.broadcast %830 : f32 to vector<8x128xf32>
    %832 = arith.mulf %831, %33 : vector<8x128xf32>
    %833 = arith.addf %829, %832 : vector<8x128xf32>
    %c172 = arith.constant 172 : index
    %834 = memref.load %arg1[%c172] : memref<304xf32, #tpu.memory_space<smem>>
    %835 = vector.broadcast %834 : f32 to vector<8x128xf32>
    %836 = arith.mulf %835, %30 : vector<8x128xf32>
    %837 = arith.addf %833, %836 : vector<8x128xf32>
    %c173 = arith.constant 173 : index
    %838 = memref.load %arg1[%c173] : memref<304xf32, #tpu.memory_space<smem>>
    %839 = vector.broadcast %838 : f32 to vector<8x128xf32>
    %840 = arith.mulf %839, %36 : vector<8x128xf32>
    %841 = arith.addf %837, %840 : vector<8x128xf32>
    %c174 = arith.constant 174 : index
    %842 = memref.load %arg1[%c174] : memref<304xf32, #tpu.memory_space<smem>>
    %843 = vector.broadcast %842 : f32 to vector<8x128xf32>
    %844 = arith.mulf %843, %41 : vector<8x128xf32>
    %845 = arith.addf %841, %844 : vector<8x128xf32>
    %c175 = arith.constant 175 : index
    %846 = memref.load %arg1[%c175] : memref<304xf32, #tpu.memory_space<smem>>
    %847 = vector.broadcast %846 : f32 to vector<8x128xf32>
    %848 = arith.mulf %847, %38 : vector<8x128xf32>
    %849 = arith.addf %845, %848 : vector<8x128xf32>
    %c176 = arith.constant 176 : index
    %850 = memref.load %arg1[%c176] : memref<304xf32, #tpu.memory_space<smem>>
    %851 = vector.broadcast %850 : f32 to vector<8x128xf32>
    %852 = arith.mulf %851, %44 : vector<8x128xf32>
    %853 = arith.addf %849, %852 : vector<8x128xf32>
    %c177 = arith.constant 177 : index
    %854 = memref.load %arg1[%c177] : memref<304xf32, #tpu.memory_space<smem>>
    %855 = vector.broadcast %854 : f32 to vector<8x128xf32>
    %856 = arith.mulf %855, %49 : vector<8x128xf32>
    %857 = arith.addf %853, %856 : vector<8x128xf32>
    %c178 = arith.constant 178 : index
    %858 = memref.load %arg1[%c178] : memref<304xf32, #tpu.memory_space<smem>>
    %859 = vector.broadcast %858 : f32 to vector<8x128xf32>
    %860 = arith.mulf %859, %46 : vector<8x128xf32>
    %861 = arith.addf %857, %860 : vector<8x128xf32>
    %c179 = arith.constant 179 : index
    %862 = memref.load %arg1[%c179] : memref<304xf32, #tpu.memory_space<smem>>
    %863 = vector.broadcast %862 : f32 to vector<8x128xf32>
    %864 = arith.mulf %863, %52 : vector<8x128xf32>
    %865 = arith.addf %861, %864 : vector<8x128xf32>
    %cst_95 = arith.constant 0.000000e+00 : f32
    %866 = vector.broadcast %cst_95 : f32 to vector<8x128xf32>
    %867 = arith.maximumf %865, %866 : vector<8x128xf32>
    %c127_i32_96 = arith.constant 127 : i32
    %868 = tpu.dynamic_rotate %867 by %c127_i32_96 dim 1 : vector<8x128xf32>, i32 -> vector<8x128xf32>
    %869 = arith.maximumf %867, %868 : vector<8x128xf32>
    %c9_97 = arith.constant 9 : index
    %c0_98 = arith.constant 0 : index
    %c0_99 = arith.constant 0 : index
    %870 = vector.load %arg3[%c9_97, %c0_98, %c0_99] : memref<16x128x64xf32, #tpu.memory_space<vmem>>, vector<1x128x64xf32>
    %871 = vector.shape_cast %870 : vector<1x128x64xf32> to vector<128x64xf32>
    %cst_100 = arith.constant dense<0.000000e+00> : vector<8x64xf32>
    %872 = tpu.matmul %869, %871, %cst_100 {dimension_numbers = #tpu.dot_dimension_numbers<[1], [0], [0], [1], [0, 0, 1, 1], [], []>} : vector<8x128xf32>, vector<128x64xf32>, vector<8x64xf32> -> vector<8x64xf32>
    %873 = arith.addf %791, %872 : vector<8x64xf32>
    %c298 = arith.constant 298 : index
    %874 = memref.load %arg1[%c298] : memref<304xf32, #tpu.memory_space<smem>>
    %875 = vector.broadcast %874 : f32 to vector<8x128xf32>
    %c180 = arith.constant 180 : index
    %876 = memref.load %arg1[%c180] : memref<304xf32, #tpu.memory_space<smem>>
    %877 = vector.broadcast %876 : f32 to vector<8x128xf32>
    %878 = arith.mulf %877, %9 : vector<8x128xf32>
    %879 = arith.addf %875, %878 : vector<8x128xf32>
    %c181 = arith.constant 181 : index
    %880 = memref.load %arg1[%c181] : memref<304xf32, #tpu.memory_space<smem>>
    %881 = vector.broadcast %880 : f32 to vector<8x128xf32>
    %882 = arith.mulf %881, %6 : vector<8x128xf32>
    %883 = arith.addf %879, %882 : vector<8x128xf32>
    %c182 = arith.constant 182 : index
    %884 = memref.load %arg1[%c182] : memref<304xf32, #tpu.memory_space<smem>>
    %885 = vector.broadcast %884 : f32 to vector<8x128xf32>
    %886 = arith.mulf %885, %12 : vector<8x128xf32>
    %887 = arith.addf %883, %886 : vector<8x128xf32>
    %c183 = arith.constant 183 : index
    %888 = memref.load %arg1[%c183] : memref<304xf32, #tpu.memory_space<smem>>
    %889 = vector.broadcast %888 : f32 to vector<8x128xf32>
    %890 = arith.mulf %889, %17 : vector<8x128xf32>
    %891 = arith.addf %887, %890 : vector<8x128xf32>
    %c184 = arith.constant 184 : index
    %892 = memref.load %arg1[%c184] : memref<304xf32, #tpu.memory_space<smem>>
    %893 = vector.broadcast %892 : f32 to vector<8x128xf32>
    %894 = arith.mulf %893, %14 : vector<8x128xf32>
    %895 = arith.addf %891, %894 : vector<8x128xf32>
    %c185 = arith.constant 185 : index
    %896 = memref.load %arg1[%c185] : memref<304xf32, #tpu.memory_space<smem>>
    %897 = vector.broadcast %896 : f32 to vector<8x128xf32>
    %898 = arith.mulf %897, %20 : vector<8x128xf32>
    %899 = arith.addf %895, %898 : vector<8x128xf32>
    %c186 = arith.constant 186 : index
    %900 = memref.load %arg1[%c186] : memref<304xf32, #tpu.memory_space<smem>>
    %901 = vector.broadcast %900 : f32 to vector<8x128xf32>
    %902 = arith.mulf %901, %25 : vector<8x128xf32>
    %903 = arith.addf %899, %902 : vector<8x128xf32>
    %c187 = arith.constant 187 : index
    %904 = memref.load %arg1[%c187] : memref<304xf32, #tpu.memory_space<smem>>
    %905 = vector.broadcast %904 : f32 to vector<8x128xf32>
    %906 = arith.mulf %905, %22 : vector<8x128xf32>
    %907 = arith.addf %903, %906 : vector<8x128xf32>
    %c188 = arith.constant 188 : index
    %908 = memref.load %arg1[%c188] : memref<304xf32, #tpu.memory_space<smem>>
    %909 = vector.broadcast %908 : f32 to vector<8x128xf32>
    %910 = arith.mulf %909, %28 : vector<8x128xf32>
    %911 = arith.addf %907, %910 : vector<8x128xf32>
    %c189 = arith.constant 189 : index
    %912 = memref.load %arg1[%c189] : memref<304xf32, #tpu.memory_space<smem>>
    %913 = vector.broadcast %912 : f32 to vector<8x128xf32>
    %914 = arith.mulf %913, %33 : vector<8x128xf32>
    %915 = arith.addf %911, %914 : vector<8x128xf32>
    %c190 = arith.constant 190 : index
    %916 = memref.load %arg1[%c190] : memref<304xf32, #tpu.memory_space<smem>>
    %917 = vector.broadcast %916 : f32 to vector<8x128xf32>
    %918 = arith.mulf %917, %30 : vector<8x128xf32>
    %919 = arith.addf %915, %918 : vector<8x128xf32>
    %c191 = arith.constant 191 : index
    %920 = memref.load %arg1[%c191] : memref<304xf32, #tpu.memory_space<smem>>
    %921 = vector.broadcast %920 : f32 to vector<8x128xf32>
    %922 = arith.mulf %921, %36 : vector<8x128xf32>
    %923 = arith.addf %919, %922 : vector<8x128xf32>
    %c192 = arith.constant 192 : index
    %924 = memref.load %arg1[%c192] : memref<304xf32, #tpu.memory_space<smem>>
    %925 = vector.broadcast %924 : f32 to vector<8x128xf32>
    %926 = arith.mulf %925, %41 : vector<8x128xf32>
    %927 = arith.addf %923, %926 : vector<8x128xf32>
    %c193 = arith.constant 193 : index
    %928 = memref.load %arg1[%c193] : memref<304xf32, #tpu.memory_space<smem>>
    %929 = vector.broadcast %928 : f32 to vector<8x128xf32>
    %930 = arith.mulf %929, %38 : vector<8x128xf32>
    %931 = arith.addf %927, %930 : vector<8x128xf32>
    %c194 = arith.constant 194 : index
    %932 = memref.load %arg1[%c194] : memref<304xf32, #tpu.memory_space<smem>>
    %933 = vector.broadcast %932 : f32 to vector<8x128xf32>
    %934 = arith.mulf %933, %44 : vector<8x128xf32>
    %935 = arith.addf %931, %934 : vector<8x128xf32>
    %c195 = arith.constant 195 : index
    %936 = memref.load %arg1[%c195] : memref<304xf32, #tpu.memory_space<smem>>
    %937 = vector.broadcast %936 : f32 to vector<8x128xf32>
    %938 = arith.mulf %937, %49 : vector<8x128xf32>
    %939 = arith.addf %935, %938 : vector<8x128xf32>
    %c196 = arith.constant 196 : index
    %940 = memref.load %arg1[%c196] : memref<304xf32, #tpu.memory_space<smem>>
    %941 = vector.broadcast %940 : f32 to vector<8x128xf32>
    %942 = arith.mulf %941, %46 : vector<8x128xf32>
    %943 = arith.addf %939, %942 : vector<8x128xf32>
    %c197 = arith.constant 197 : index
    %944 = memref.load %arg1[%c197] : memref<304xf32, #tpu.memory_space<smem>>
    %945 = vector.broadcast %944 : f32 to vector<8x128xf32>
    %946 = arith.mulf %945, %52 : vector<8x128xf32>
    %947 = arith.addf %943, %946 : vector<8x128xf32>
    %cst_101 = arith.constant 0.000000e+00 : f32
    %948 = vector.broadcast %cst_101 : f32 to vector<8x128xf32>
    %949 = arith.maximumf %947, %948 : vector<8x128xf32>
    %c127_i32_102 = arith.constant 127 : i32
    %950 = tpu.dynamic_rotate %949 by %c127_i32_102 dim 1 : vector<8x128xf32>, i32 -> vector<8x128xf32>
    %951 = arith.maximumf %949, %950 : vector<8x128xf32>
    %c10_103 = arith.constant 10 : index
    %c0_104 = arith.constant 0 : index
    %c0_105 = arith.constant 0 : index
    %952 = vector.load %arg3[%c10_103, %c0_104, %c0_105] : memref<16x128x64xf32, #tpu.memory_space<vmem>>, vector<1x128x64xf32>
    %953 = vector.shape_cast %952 : vector<1x128x64xf32> to vector<128x64xf32>
    %cst_106 = arith.constant dense<0.000000e+00> : vector<8x64xf32>
    %954 = tpu.matmul %951, %953, %cst_106 {dimension_numbers = #tpu.dot_dimension_numbers<[1], [0], [0], [1], [0, 0, 1, 1], [], []>} : vector<8x128xf32>, vector<128x64xf32>, vector<8x64xf32> -> vector<8x64xf32>
    %955 = arith.addf %873, %954 : vector<8x64xf32>
    %c299 = arith.constant 299 : index
    %956 = memref.load %arg1[%c299] : memref<304xf32, #tpu.memory_space<smem>>
    %957 = vector.broadcast %956 : f32 to vector<8x128xf32>
    %c198 = arith.constant 198 : index
    %958 = memref.load %arg1[%c198] : memref<304xf32, #tpu.memory_space<smem>>
    %959 = vector.broadcast %958 : f32 to vector<8x128xf32>
    %960 = arith.mulf %959, %9 : vector<8x128xf32>
    %961 = arith.addf %957, %960 : vector<8x128xf32>
    %c199 = arith.constant 199 : index
    %962 = memref.load %arg1[%c199] : memref<304xf32, #tpu.memory_space<smem>>
    %963 = vector.broadcast %962 : f32 to vector<8x128xf32>
    %964 = arith.mulf %963, %6 : vector<8x128xf32>
    %965 = arith.addf %961, %964 : vector<8x128xf32>
    %c200 = arith.constant 200 : index
    %966 = memref.load %arg1[%c200] : memref<304xf32, #tpu.memory_space<smem>>
    %967 = vector.broadcast %966 : f32 to vector<8x128xf32>
    %968 = arith.mulf %967, %12 : vector<8x128xf32>
    %969 = arith.addf %965, %968 : vector<8x128xf32>
    %c201 = arith.constant 201 : index
    %970 = memref.load %arg1[%c201] : memref<304xf32, #tpu.memory_space<smem>>
    %971 = vector.broadcast %970 : f32 to vector<8x128xf32>
    %972 = arith.mulf %971, %17 : vector<8x128xf32>
    %973 = arith.addf %969, %972 : vector<8x128xf32>
    %c202 = arith.constant 202 : index
    %974 = memref.load %arg1[%c202] : memref<304xf32, #tpu.memory_space<smem>>
    %975 = vector.broadcast %974 : f32 to vector<8x128xf32>
    %976 = arith.mulf %975, %14 : vector<8x128xf32>
    %977 = arith.addf %973, %976 : vector<8x128xf32>
    %c203 = arith.constant 203 : index
    %978 = memref.load %arg1[%c203] : memref<304xf32, #tpu.memory_space<smem>>
    %979 = vector.broadcast %978 : f32 to vector<8x128xf32>
    %980 = arith.mulf %979, %20 : vector<8x128xf32>
    %981 = arith.addf %977, %980 : vector<8x128xf32>
    %c204 = arith.constant 204 : index
    %982 = memref.load %arg1[%c204] : memref<304xf32, #tpu.memory_space<smem>>
    %983 = vector.broadcast %982 : f32 to vector<8x128xf32>
    %984 = arith.mulf %983, %25 : vector<8x128xf32>
    %985 = arith.addf %981, %984 : vector<8x128xf32>
    %c205 = arith.constant 205 : index
    %986 = memref.load %arg1[%c205] : memref<304xf32, #tpu.memory_space<smem>>
    %987 = vector.broadcast %986 : f32 to vector<8x128xf32>
    %988 = arith.mulf %987, %22 : vector<8x128xf32>
    %989 = arith.addf %985, %988 : vector<8x128xf32>
    %c206 = arith.constant 206 : index
    %990 = memref.load %arg1[%c206] : memref<304xf32, #tpu.memory_space<smem>>
    %991 = vector.broadcast %990 : f32 to vector<8x128xf32>
    %992 = arith.mulf %991, %28 : vector<8x128xf32>
    %993 = arith.addf %989, %992 : vector<8x128xf32>
    %c207 = arith.constant 207 : index
    %994 = memref.load %arg1[%c207] : memref<304xf32, #tpu.memory_space<smem>>
    %995 = vector.broadcast %994 : f32 to vector<8x128xf32>
    %996 = arith.mulf %995, %33 : vector<8x128xf32>
    %997 = arith.addf %993, %996 : vector<8x128xf32>
    %c208 = arith.constant 208 : index
    %998 = memref.load %arg1[%c208] : memref<304xf32, #tpu.memory_space<smem>>
    %999 = vector.broadcast %998 : f32 to vector<8x128xf32>
    %1000 = arith.mulf %999, %30 : vector<8x128xf32>
    %1001 = arith.addf %997, %1000 : vector<8x128xf32>
    %c209 = arith.constant 209 : index
    %1002 = memref.load %arg1[%c209] : memref<304xf32, #tpu.memory_space<smem>>
    %1003 = vector.broadcast %1002 : f32 to vector<8x128xf32>
    %1004 = arith.mulf %1003, %36 : vector<8x128xf32>
    %1005 = arith.addf %1001, %1004 : vector<8x128xf32>
    %c210 = arith.constant 210 : index
    %1006 = memref.load %arg1[%c210] : memref<304xf32, #tpu.memory_space<smem>>
    %1007 = vector.broadcast %1006 : f32 to vector<8x128xf32>
    %1008 = arith.mulf %1007, %41 : vector<8x128xf32>
    %1009 = arith.addf %1005, %1008 : vector<8x128xf32>
    %c211 = arith.constant 211 : index
    %1010 = memref.load %arg1[%c211] : memref<304xf32, #tpu.memory_space<smem>>
    %1011 = vector.broadcast %1010 : f32 to vector<8x128xf32>
    %1012 = arith.mulf %1011, %38 : vector<8x128xf32>
    %1013 = arith.addf %1009, %1012 : vector<8x128xf32>
    %c212 = arith.constant 212 : index
    %1014 = memref.load %arg1[%c212] : memref<304xf32, #tpu.memory_space<smem>>
    %1015 = vector.broadcast %1014 : f32 to vector<8x128xf32>
    %1016 = arith.mulf %1015, %44 : vector<8x128xf32>
    %1017 = arith.addf %1013, %1016 : vector<8x128xf32>
    %c213 = arith.constant 213 : index
    %1018 = memref.load %arg1[%c213] : memref<304xf32, #tpu.memory_space<smem>>
    %1019 = vector.broadcast %1018 : f32 to vector<8x128xf32>
    %1020 = arith.mulf %1019, %49 : vector<8x128xf32>
    %1021 = arith.addf %1017, %1020 : vector<8x128xf32>
    %c214 = arith.constant 214 : index
    %1022 = memref.load %arg1[%c214] : memref<304xf32, #tpu.memory_space<smem>>
    %1023 = vector.broadcast %1022 : f32 to vector<8x128xf32>
    %1024 = arith.mulf %1023, %46 : vector<8x128xf32>
    %1025 = arith.addf %1021, %1024 : vector<8x128xf32>
    %c215 = arith.constant 215 : index
    %1026 = memref.load %arg1[%c215] : memref<304xf32, #tpu.memory_space<smem>>
    %1027 = vector.broadcast %1026 : f32 to vector<8x128xf32>
    %1028 = arith.mulf %1027, %52 : vector<8x128xf32>
    %1029 = arith.addf %1025, %1028 : vector<8x128xf32>
    %cst_107 = arith.constant 0.000000e+00 : f32
    %1030 = vector.broadcast %cst_107 : f32 to vector<8x128xf32>
    %1031 = arith.maximumf %1029, %1030 : vector<8x128xf32>
    %c127_i32_108 = arith.constant 127 : i32
    %1032 = tpu.dynamic_rotate %1031 by %c127_i32_108 dim 1 : vector<8x128xf32>, i32 -> vector<8x128xf32>
    %1033 = arith.maximumf %1031, %1032 : vector<8x128xf32>
    %c11_109 = arith.constant 11 : index
    %c0_110 = arith.constant 0 : index
    %c0_111 = arith.constant 0 : index
    %1034 = vector.load %arg3[%c11_109, %c0_110, %c0_111] : memref<16x128x64xf32, #tpu.memory_space<vmem>>, vector<1x128x64xf32>
    %1035 = vector.shape_cast %1034 : vector<1x128x64xf32> to vector<128x64xf32>
    %cst_112 = arith.constant dense<0.000000e+00> : vector<8x64xf32>
    %1036 = tpu.matmul %1033, %1035, %cst_112 {dimension_numbers = #tpu.dot_dimension_numbers<[1], [0], [0], [1], [0, 0, 1, 1], [], []>} : vector<8x128xf32>, vector<128x64xf32>, vector<8x64xf32> -> vector<8x64xf32>
    %1037 = arith.addf %955, %1036 : vector<8x64xf32>
    %c300 = arith.constant 300 : index
    %1038 = memref.load %arg1[%c300] : memref<304xf32, #tpu.memory_space<smem>>
    %1039 = vector.broadcast %1038 : f32 to vector<8x128xf32>
    %c216 = arith.constant 216 : index
    %1040 = memref.load %arg1[%c216] : memref<304xf32, #tpu.memory_space<smem>>
    %1041 = vector.broadcast %1040 : f32 to vector<8x128xf32>
    %1042 = arith.mulf %1041, %9 : vector<8x128xf32>
    %1043 = arith.addf %1039, %1042 : vector<8x128xf32>
    %c217 = arith.constant 217 : index
    %1044 = memref.load %arg1[%c217] : memref<304xf32, #tpu.memory_space<smem>>
    %1045 = vector.broadcast %1044 : f32 to vector<8x128xf32>
    %1046 = arith.mulf %1045, %6 : vector<8x128xf32>
    %1047 = arith.addf %1043, %1046 : vector<8x128xf32>
    %c218 = arith.constant 218 : index
    %1048 = memref.load %arg1[%c218] : memref<304xf32, #tpu.memory_space<smem>>
    %1049 = vector.broadcast %1048 : f32 to vector<8x128xf32>
    %1050 = arith.mulf %1049, %12 : vector<8x128xf32>
    %1051 = arith.addf %1047, %1050 : vector<8x128xf32>
    %c219 = arith.constant 219 : index
    %1052 = memref.load %arg1[%c219] : memref<304xf32, #tpu.memory_space<smem>>
    %1053 = vector.broadcast %1052 : f32 to vector<8x128xf32>
    %1054 = arith.mulf %1053, %17 : vector<8x128xf32>
    %1055 = arith.addf %1051, %1054 : vector<8x128xf32>
    %c220 = arith.constant 220 : index
    %1056 = memref.load %arg1[%c220] : memref<304xf32, #tpu.memory_space<smem>>
    %1057 = vector.broadcast %1056 : f32 to vector<8x128xf32>
    %1058 = arith.mulf %1057, %14 : vector<8x128xf32>
    %1059 = arith.addf %1055, %1058 : vector<8x128xf32>
    %c221 = arith.constant 221 : index
    %1060 = memref.load %arg1[%c221] : memref<304xf32, #tpu.memory_space<smem>>
    %1061 = vector.broadcast %1060 : f32 to vector<8x128xf32>
    %1062 = arith.mulf %1061, %20 : vector<8x128xf32>
    %1063 = arith.addf %1059, %1062 : vector<8x128xf32>
    %c222 = arith.constant 222 : index
    %1064 = memref.load %arg1[%c222] : memref<304xf32, #tpu.memory_space<smem>>
    %1065 = vector.broadcast %1064 : f32 to vector<8x128xf32>
    %1066 = arith.mulf %1065, %25 : vector<8x128xf32>
    %1067 = arith.addf %1063, %1066 : vector<8x128xf32>
    %c223 = arith.constant 223 : index
    %1068 = memref.load %arg1[%c223] : memref<304xf32, #tpu.memory_space<smem>>
    %1069 = vector.broadcast %1068 : f32 to vector<8x128xf32>
    %1070 = arith.mulf %1069, %22 : vector<8x128xf32>
    %1071 = arith.addf %1067, %1070 : vector<8x128xf32>
    %c224 = arith.constant 224 : index
    %1072 = memref.load %arg1[%c224] : memref<304xf32, #tpu.memory_space<smem>>
    %1073 = vector.broadcast %1072 : f32 to vector<8x128xf32>
    %1074 = arith.mulf %1073, %28 : vector<8x128xf32>
    %1075 = arith.addf %1071, %1074 : vector<8x128xf32>
    %c225 = arith.constant 225 : index
    %1076 = memref.load %arg1[%c225] : memref<304xf32, #tpu.memory_space<smem>>
    %1077 = vector.broadcast %1076 : f32 to vector<8x128xf32>
    %1078 = arith.mulf %1077, %33 : vector<8x128xf32>
    %1079 = arith.addf %1075, %1078 : vector<8x128xf32>
    %c226 = arith.constant 226 : index
    %1080 = memref.load %arg1[%c226] : memref<304xf32, #tpu.memory_space<smem>>
    %1081 = vector.broadcast %1080 : f32 to vector<8x128xf32>
    %1082 = arith.mulf %1081, %30 : vector<8x128xf32>
    %1083 = arith.addf %1079, %1082 : vector<8x128xf32>
    %c227 = arith.constant 227 : index
    %1084 = memref.load %arg1[%c227] : memref<304xf32, #tpu.memory_space<smem>>
    %1085 = vector.broadcast %1084 : f32 to vector<8x128xf32>
    %1086 = arith.mulf %1085, %36 : vector<8x128xf32>
    %1087 = arith.addf %1083, %1086 : vector<8x128xf32>
    %c228 = arith.constant 228 : index
    %1088 = memref.load %arg1[%c228] : memref<304xf32, #tpu.memory_space<smem>>
    %1089 = vector.broadcast %1088 : f32 to vector<8x128xf32>
    %1090 = arith.mulf %1089, %41 : vector<8x128xf32>
    %1091 = arith.addf %1087, %1090 : vector<8x128xf32>
    %c229 = arith.constant 229 : index
    %1092 = memref.load %arg1[%c229] : memref<304xf32, #tpu.memory_space<smem>>
    %1093 = vector.broadcast %1092 : f32 to vector<8x128xf32>
    %1094 = arith.mulf %1093, %38 : vector<8x128xf32>
    %1095 = arith.addf %1091, %1094 : vector<8x128xf32>
    %c230 = arith.constant 230 : index
    %1096 = memref.load %arg1[%c230] : memref<304xf32, #tpu.memory_space<smem>>
    %1097 = vector.broadcast %1096 : f32 to vector<8x128xf32>
    %1098 = arith.mulf %1097, %44 : vector<8x128xf32>
    %1099 = arith.addf %1095, %1098 : vector<8x128xf32>
    %c231 = arith.constant 231 : index
    %1100 = memref.load %arg1[%c231] : memref<304xf32, #tpu.memory_space<smem>>
    %1101 = vector.broadcast %1100 : f32 to vector<8x128xf32>
    %1102 = arith.mulf %1101, %49 : vector<8x128xf32>
    %1103 = arith.addf %1099, %1102 : vector<8x128xf32>
    %c232 = arith.constant 232 : index
    %1104 = memref.load %arg1[%c232] : memref<304xf32, #tpu.memory_space<smem>>
    %1105 = vector.broadcast %1104 : f32 to vector<8x128xf32>
    %1106 = arith.mulf %1105, %46 : vector<8x128xf32>
    %1107 = arith.addf %1103, %1106 : vector<8x128xf32>
    %c233 = arith.constant 233 : index
    %1108 = memref.load %arg1[%c233] : memref<304xf32, #tpu.memory_space<smem>>
    %1109 = vector.broadcast %1108 : f32 to vector<8x128xf32>
    %1110 = arith.mulf %1109, %52 : vector<8x128xf32>
    %1111 = arith.addf %1107, %1110 : vector<8x128xf32>
    %cst_113 = arith.constant 0.000000e+00 : f32
    %1112 = vector.broadcast %cst_113 : f32 to vector<8x128xf32>
    %1113 = arith.maximumf %1111, %1112 : vector<8x128xf32>
    %c127_i32_114 = arith.constant 127 : i32
    %1114 = tpu.dynamic_rotate %1113 by %c127_i32_114 dim 1 : vector<8x128xf32>, i32 -> vector<8x128xf32>
    %1115 = arith.maximumf %1113, %1114 : vector<8x128xf32>
    %c12_115 = arith.constant 12 : index
    %c0_116 = arith.constant 0 : index
    %c0_117 = arith.constant 0 : index
    %1116 = vector.load %arg3[%c12_115, %c0_116, %c0_117] : memref<16x128x64xf32, #tpu.memory_space<vmem>>, vector<1x128x64xf32>
    %1117 = vector.shape_cast %1116 : vector<1x128x64xf32> to vector<128x64xf32>
    %cst_118 = arith.constant dense<0.000000e+00> : vector<8x64xf32>
    %1118 = tpu.matmul %1115, %1117, %cst_118 {dimension_numbers = #tpu.dot_dimension_numbers<[1], [0], [0], [1], [0, 0, 1, 1], [], []>} : vector<8x128xf32>, vector<128x64xf32>, vector<8x64xf32> -> vector<8x64xf32>
    %1119 = arith.addf %1037, %1118 : vector<8x64xf32>
    %c301 = arith.constant 301 : index
    %1120 = memref.load %arg1[%c301] : memref<304xf32, #tpu.memory_space<smem>>
    %1121 = vector.broadcast %1120 : f32 to vector<8x128xf32>
    %c234 = arith.constant 234 : index
    %1122 = memref.load %arg1[%c234] : memref<304xf32, #tpu.memory_space<smem>>
    %1123 = vector.broadcast %1122 : f32 to vector<8x128xf32>
    %1124 = arith.mulf %1123, %9 : vector<8x128xf32>
    %1125 = arith.addf %1121, %1124 : vector<8x128xf32>
    %c235 = arith.constant 235 : index
    %1126 = memref.load %arg1[%c235] : memref<304xf32, #tpu.memory_space<smem>>
    %1127 = vector.broadcast %1126 : f32 to vector<8x128xf32>
    %1128 = arith.mulf %1127, %6 : vector<8x128xf32>
    %1129 = arith.addf %1125, %1128 : vector<8x128xf32>
    %c236 = arith.constant 236 : index
    %1130 = memref.load %arg1[%c236] : memref<304xf32, #tpu.memory_space<smem>>
    %1131 = vector.broadcast %1130 : f32 to vector<8x128xf32>
    %1132 = arith.mulf %1131, %12 : vector<8x128xf32>
    %1133 = arith.addf %1129, %1132 : vector<8x128xf32>
    %c237 = arith.constant 237 : index
    %1134 = memref.load %arg1[%c237] : memref<304xf32, #tpu.memory_space<smem>>
    %1135 = vector.broadcast %1134 : f32 to vector<8x128xf32>
    %1136 = arith.mulf %1135, %17 : vector<8x128xf32>
    %1137 = arith.addf %1133, %1136 : vector<8x128xf32>
    %c238 = arith.constant 238 : index
    %1138 = memref.load %arg1[%c238] : memref<304xf32, #tpu.memory_space<smem>>
    %1139 = vector.broadcast %1138 : f32 to vector<8x128xf32>
    %1140 = arith.mulf %1139, %14 : vector<8x128xf32>
    %1141 = arith.addf %1137, %1140 : vector<8x128xf32>
    %c239 = arith.constant 239 : index
    %1142 = memref.load %arg1[%c239] : memref<304xf32, #tpu.memory_space<smem>>
    %1143 = vector.broadcast %1142 : f32 to vector<8x128xf32>
    %1144 = arith.mulf %1143, %20 : vector<8x128xf32>
    %1145 = arith.addf %1141, %1144 : vector<8x128xf32>
    %c240 = arith.constant 240 : index
    %1146 = memref.load %arg1[%c240] : memref<304xf32, #tpu.memory_space<smem>>
    %1147 = vector.broadcast %1146 : f32 to vector<8x128xf32>
    %1148 = arith.mulf %1147, %25 : vector<8x128xf32>
    %1149 = arith.addf %1145, %1148 : vector<8x128xf32>
    %c241 = arith.constant 241 : index
    %1150 = memref.load %arg1[%c241] : memref<304xf32, #tpu.memory_space<smem>>
    %1151 = vector.broadcast %1150 : f32 to vector<8x128xf32>
    %1152 = arith.mulf %1151, %22 : vector<8x128xf32>
    %1153 = arith.addf %1149, %1152 : vector<8x128xf32>
    %c242 = arith.constant 242 : index
    %1154 = memref.load %arg1[%c242] : memref<304xf32, #tpu.memory_space<smem>>
    %1155 = vector.broadcast %1154 : f32 to vector<8x128xf32>
    %1156 = arith.mulf %1155, %28 : vector<8x128xf32>
    %1157 = arith.addf %1153, %1156 : vector<8x128xf32>
    %c243 = arith.constant 243 : index
    %1158 = memref.load %arg1[%c243] : memref<304xf32, #tpu.memory_space<smem>>
    %1159 = vector.broadcast %1158 : f32 to vector<8x128xf32>
    %1160 = arith.mulf %1159, %33 : vector<8x128xf32>
    %1161 = arith.addf %1157, %1160 : vector<8x128xf32>
    %c244 = arith.constant 244 : index
    %1162 = memref.load %arg1[%c244] : memref<304xf32, #tpu.memory_space<smem>>
    %1163 = vector.broadcast %1162 : f32 to vector<8x128xf32>
    %1164 = arith.mulf %1163, %30 : vector<8x128xf32>
    %1165 = arith.addf %1161, %1164 : vector<8x128xf32>
    %c245 = arith.constant 245 : index
    %1166 = memref.load %arg1[%c245] : memref<304xf32, #tpu.memory_space<smem>>
    %1167 = vector.broadcast %1166 : f32 to vector<8x128xf32>
    %1168 = arith.mulf %1167, %36 : vector<8x128xf32>
    %1169 = arith.addf %1165, %1168 : vector<8x128xf32>
    %c246 = arith.constant 246 : index
    %1170 = memref.load %arg1[%c246] : memref<304xf32, #tpu.memory_space<smem>>
    %1171 = vector.broadcast %1170 : f32 to vector<8x128xf32>
    %1172 = arith.mulf %1171, %41 : vector<8x128xf32>
    %1173 = arith.addf %1169, %1172 : vector<8x128xf32>
    %c247 = arith.constant 247 : index
    %1174 = memref.load %arg1[%c247] : memref<304xf32, #tpu.memory_space<smem>>
    %1175 = vector.broadcast %1174 : f32 to vector<8x128xf32>
    %1176 = arith.mulf %1175, %38 : vector<8x128xf32>
    %1177 = arith.addf %1173, %1176 : vector<8x128xf32>
    %c248 = arith.constant 248 : index
    %1178 = memref.load %arg1[%c248] : memref<304xf32, #tpu.memory_space<smem>>
    %1179 = vector.broadcast %1178 : f32 to vector<8x128xf32>
    %1180 = arith.mulf %1179, %44 : vector<8x128xf32>
    %1181 = arith.addf %1177, %1180 : vector<8x128xf32>
    %c249 = arith.constant 249 : index
    %1182 = memref.load %arg1[%c249] : memref<304xf32, #tpu.memory_space<smem>>
    %1183 = vector.broadcast %1182 : f32 to vector<8x128xf32>
    %1184 = arith.mulf %1183, %49 : vector<8x128xf32>
    %1185 = arith.addf %1181, %1184 : vector<8x128xf32>
    %c250 = arith.constant 250 : index
    %1186 = memref.load %arg1[%c250] : memref<304xf32, #tpu.memory_space<smem>>
    %1187 = vector.broadcast %1186 : f32 to vector<8x128xf32>
    %1188 = arith.mulf %1187, %46 : vector<8x128xf32>
    %1189 = arith.addf %1185, %1188 : vector<8x128xf32>
    %c251 = arith.constant 251 : index
    %1190 = memref.load %arg1[%c251] : memref<304xf32, #tpu.memory_space<smem>>
    %1191 = vector.broadcast %1190 : f32 to vector<8x128xf32>
    %1192 = arith.mulf %1191, %52 : vector<8x128xf32>
    %1193 = arith.addf %1189, %1192 : vector<8x128xf32>
    %cst_119 = arith.constant 0.000000e+00 : f32
    %1194 = vector.broadcast %cst_119 : f32 to vector<8x128xf32>
    %1195 = arith.maximumf %1193, %1194 : vector<8x128xf32>
    %c127_i32_120 = arith.constant 127 : i32
    %1196 = tpu.dynamic_rotate %1195 by %c127_i32_120 dim 1 : vector<8x128xf32>, i32 -> vector<8x128xf32>
    %1197 = arith.maximumf %1195, %1196 : vector<8x128xf32>
    %c13_121 = arith.constant 13 : index
    %c0_122 = arith.constant 0 : index
    %c0_123 = arith.constant 0 : index
    %1198 = vector.load %arg3[%c13_121, %c0_122, %c0_123] : memref<16x128x64xf32, #tpu.memory_space<vmem>>, vector<1x128x64xf32>
    %1199 = vector.shape_cast %1198 : vector<1x128x64xf32> to vector<128x64xf32>
    %cst_124 = arith.constant dense<0.000000e+00> : vector<8x64xf32>
    %1200 = tpu.matmul %1197, %1199, %cst_124 {dimension_numbers = #tpu.dot_dimension_numbers<[1], [0], [0], [1], [0, 0, 1, 1], [], []>} : vector<8x128xf32>, vector<128x64xf32>, vector<8x64xf32> -> vector<8x64xf32>
    %1201 = arith.addf %1119, %1200 : vector<8x64xf32>
    %c302 = arith.constant 302 : index
    %1202 = memref.load %arg1[%c302] : memref<304xf32, #tpu.memory_space<smem>>
    %1203 = vector.broadcast %1202 : f32 to vector<8x128xf32>
    %c252 = arith.constant 252 : index
    %1204 = memref.load %arg1[%c252] : memref<304xf32, #tpu.memory_space<smem>>
    %1205 = vector.broadcast %1204 : f32 to vector<8x128xf32>
    %1206 = arith.mulf %1205, %9 : vector<8x128xf32>
    %1207 = arith.addf %1203, %1206 : vector<8x128xf32>
    %c253 = arith.constant 253 : index
    %1208 = memref.load %arg1[%c253] : memref<304xf32, #tpu.memory_space<smem>>
    %1209 = vector.broadcast %1208 : f32 to vector<8x128xf32>
    %1210 = arith.mulf %1209, %6 : vector<8x128xf32>
    %1211 = arith.addf %1207, %1210 : vector<8x128xf32>
    %c254 = arith.constant 254 : index
    %1212 = memref.load %arg1[%c254] : memref<304xf32, #tpu.memory_space<smem>>
    %1213 = vector.broadcast %1212 : f32 to vector<8x128xf32>
    %1214 = arith.mulf %1213, %12 : vector<8x128xf32>
    %1215 = arith.addf %1211, %1214 : vector<8x128xf32>
    %c255 = arith.constant 255 : index
    %1216 = memref.load %arg1[%c255] : memref<304xf32, #tpu.memory_space<smem>>
    %1217 = vector.broadcast %1216 : f32 to vector<8x128xf32>
    %1218 = arith.mulf %1217, %17 : vector<8x128xf32>
    %1219 = arith.addf %1215, %1218 : vector<8x128xf32>
    %c256 = arith.constant 256 : index
    %1220 = memref.load %arg1[%c256] : memref<304xf32, #tpu.memory_space<smem>>
    %1221 = vector.broadcast %1220 : f32 to vector<8x128xf32>
    %1222 = arith.mulf %1221, %14 : vector<8x128xf32>
    %1223 = arith.addf %1219, %1222 : vector<8x128xf32>
    %c257 = arith.constant 257 : index
    %1224 = memref.load %arg1[%c257] : memref<304xf32, #tpu.memory_space<smem>>
    %1225 = vector.broadcast %1224 : f32 to vector<8x128xf32>
    %1226 = arith.mulf %1225, %20 : vector<8x128xf32>
    %1227 = arith.addf %1223, %1226 : vector<8x128xf32>
    %c258 = arith.constant 258 : index
    %1228 = memref.load %arg1[%c258] : memref<304xf32, #tpu.memory_space<smem>>
    %1229 = vector.broadcast %1228 : f32 to vector<8x128xf32>
    %1230 = arith.mulf %1229, %25 : vector<8x128xf32>
    %1231 = arith.addf %1227, %1230 : vector<8x128xf32>
    %c259 = arith.constant 259 : index
    %1232 = memref.load %arg1[%c259] : memref<304xf32, #tpu.memory_space<smem>>
    %1233 = vector.broadcast %1232 : f32 to vector<8x128xf32>
    %1234 = arith.mulf %1233, %22 : vector<8x128xf32>
    %1235 = arith.addf %1231, %1234 : vector<8x128xf32>
    %c260 = arith.constant 260 : index
    %1236 = memref.load %arg1[%c260] : memref<304xf32, #tpu.memory_space<smem>>
    %1237 = vector.broadcast %1236 : f32 to vector<8x128xf32>
    %1238 = arith.mulf %1237, %28 : vector<8x128xf32>
    %1239 = arith.addf %1235, %1238 : vector<8x128xf32>
    %c261 = arith.constant 261 : index
    %1240 = memref.load %arg1[%c261] : memref<304xf32, #tpu.memory_space<smem>>
    %1241 = vector.broadcast %1240 : f32 to vector<8x128xf32>
    %1242 = arith.mulf %1241, %33 : vector<8x128xf32>
    %1243 = arith.addf %1239, %1242 : vector<8x128xf32>
    %c262 = arith.constant 262 : index
    %1244 = memref.load %arg1[%c262] : memref<304xf32, #tpu.memory_space<smem>>
    %1245 = vector.broadcast %1244 : f32 to vector<8x128xf32>
    %1246 = arith.mulf %1245, %30 : vector<8x128xf32>
    %1247 = arith.addf %1243, %1246 : vector<8x128xf32>
    %c263 = arith.constant 263 : index
    %1248 = memref.load %arg1[%c263] : memref<304xf32, #tpu.memory_space<smem>>
    %1249 = vector.broadcast %1248 : f32 to vector<8x128xf32>
    %1250 = arith.mulf %1249, %36 : vector<8x128xf32>
    %1251 = arith.addf %1247, %1250 : vector<8x128xf32>
    %c264 = arith.constant 264 : index
    %1252 = memref.load %arg1[%c264] : memref<304xf32, #tpu.memory_space<smem>>
    %1253 = vector.broadcast %1252 : f32 to vector<8x128xf32>
    %1254 = arith.mulf %1253, %41 : vector<8x128xf32>
    %1255 = arith.addf %1251, %1254 : vector<8x128xf32>
    %c265 = arith.constant 265 : index
    %1256 = memref.load %arg1[%c265] : memref<304xf32, #tpu.memory_space<smem>>
    %1257 = vector.broadcast %1256 : f32 to vector<8x128xf32>
    %1258 = arith.mulf %1257, %38 : vector<8x128xf32>
    %1259 = arith.addf %1255, %1258 : vector<8x128xf32>
    %c266 = arith.constant 266 : index
    %1260 = memref.load %arg1[%c266] : memref<304xf32, #tpu.memory_space<smem>>
    %1261 = vector.broadcast %1260 : f32 to vector<8x128xf32>
    %1262 = arith.mulf %1261, %44 : vector<8x128xf32>
    %1263 = arith.addf %1259, %1262 : vector<8x128xf32>
    %c267 = arith.constant 267 : index
    %1264 = memref.load %arg1[%c267] : memref<304xf32, #tpu.memory_space<smem>>
    %1265 = vector.broadcast %1264 : f32 to vector<8x128xf32>
    %1266 = arith.mulf %1265, %49 : vector<8x128xf32>
    %1267 = arith.addf %1263, %1266 : vector<8x128xf32>
    %c268 = arith.constant 268 : index
    %1268 = memref.load %arg1[%c268] : memref<304xf32, #tpu.memory_space<smem>>
    %1269 = vector.broadcast %1268 : f32 to vector<8x128xf32>
    %1270 = arith.mulf %1269, %46 : vector<8x128xf32>
    %1271 = arith.addf %1267, %1270 : vector<8x128xf32>
    %c269 = arith.constant 269 : index
    %1272 = memref.load %arg1[%c269] : memref<304xf32, #tpu.memory_space<smem>>
    %1273 = vector.broadcast %1272 : f32 to vector<8x128xf32>
    %1274 = arith.mulf %1273, %52 : vector<8x128xf32>
    %1275 = arith.addf %1271, %1274 : vector<8x128xf32>
    %cst_125 = arith.constant 0.000000e+00 : f32
    %1276 = vector.broadcast %cst_125 : f32 to vector<8x128xf32>
    %1277 = arith.maximumf %1275, %1276 : vector<8x128xf32>
    %c127_i32_126 = arith.constant 127 : i32
    %1278 = tpu.dynamic_rotate %1277 by %c127_i32_126 dim 1 : vector<8x128xf32>, i32 -> vector<8x128xf32>
    %1279 = arith.maximumf %1277, %1278 : vector<8x128xf32>
    %c14_127 = arith.constant 14 : index
    %c0_128 = arith.constant 0 : index
    %c0_129 = arith.constant 0 : index
    %1280 = vector.load %arg3[%c14_127, %c0_128, %c0_129] : memref<16x128x64xf32, #tpu.memory_space<vmem>>, vector<1x128x64xf32>
    %1281 = vector.shape_cast %1280 : vector<1x128x64xf32> to vector<128x64xf32>
    %cst_130 = arith.constant dense<0.000000e+00> : vector<8x64xf32>
    %1282 = tpu.matmul %1279, %1281, %cst_130 {dimension_numbers = #tpu.dot_dimension_numbers<[1], [0], [0], [1], [0, 0, 1, 1], [], []>} : vector<8x128xf32>, vector<128x64xf32>, vector<8x64xf32> -> vector<8x64xf32>
    %1283 = arith.addf %1201, %1282 : vector<8x64xf32>
    %c303 = arith.constant 303 : index
    %1284 = memref.load %arg1[%c303] : memref<304xf32, #tpu.memory_space<smem>>
    %1285 = vector.broadcast %1284 : f32 to vector<8x128xf32>
    %c270 = arith.constant 270 : index
    %1286 = memref.load %arg1[%c270] : memref<304xf32, #tpu.memory_space<smem>>
    %1287 = vector.broadcast %1286 : f32 to vector<8x128xf32>
    %1288 = arith.mulf %1287, %9 : vector<8x128xf32>
    %1289 = arith.addf %1285, %1288 : vector<8x128xf32>
    %c271 = arith.constant 271 : index
    %1290 = memref.load %arg1[%c271] : memref<304xf32, #tpu.memory_space<smem>>
    %1291 = vector.broadcast %1290 : f32 to vector<8x128xf32>
    %1292 = arith.mulf %1291, %6 : vector<8x128xf32>
    %1293 = arith.addf %1289, %1292 : vector<8x128xf32>
    %c272 = arith.constant 272 : index
    %1294 = memref.load %arg1[%c272] : memref<304xf32, #tpu.memory_space<smem>>
    %1295 = vector.broadcast %1294 : f32 to vector<8x128xf32>
    %1296 = arith.mulf %1295, %12 : vector<8x128xf32>
    %1297 = arith.addf %1293, %1296 : vector<8x128xf32>
    %c273 = arith.constant 273 : index
    %1298 = memref.load %arg1[%c273] : memref<304xf32, #tpu.memory_space<smem>>
    %1299 = vector.broadcast %1298 : f32 to vector<8x128xf32>
    %1300 = arith.mulf %1299, %17 : vector<8x128xf32>
    %1301 = arith.addf %1297, %1300 : vector<8x128xf32>
    %c274 = arith.constant 274 : index
    %1302 = memref.load %arg1[%c274] : memref<304xf32, #tpu.memory_space<smem>>
    %1303 = vector.broadcast %1302 : f32 to vector<8x128xf32>
    %1304 = arith.mulf %1303, %14 : vector<8x128xf32>
    %1305 = arith.addf %1301, %1304 : vector<8x128xf32>
    %c275 = arith.constant 275 : index
    %1306 = memref.load %arg1[%c275] : memref<304xf32, #tpu.memory_space<smem>>
    %1307 = vector.broadcast %1306 : f32 to vector<8x128xf32>
    %1308 = arith.mulf %1307, %20 : vector<8x128xf32>
    %1309 = arith.addf %1305, %1308 : vector<8x128xf32>
    %c276 = arith.constant 276 : index
    %1310 = memref.load %arg1[%c276] : memref<304xf32, #tpu.memory_space<smem>>
    %1311 = vector.broadcast %1310 : f32 to vector<8x128xf32>
    %1312 = arith.mulf %1311, %25 : vector<8x128xf32>
    %1313 = arith.addf %1309, %1312 : vector<8x128xf32>
    %c277 = arith.constant 277 : index
    %1314 = memref.load %arg1[%c277] : memref<304xf32, #tpu.memory_space<smem>>
    %1315 = vector.broadcast %1314 : f32 to vector<8x128xf32>
    %1316 = arith.mulf %1315, %22 : vector<8x128xf32>
    %1317 = arith.addf %1313, %1316 : vector<8x128xf32>
    %c278 = arith.constant 278 : index
    %1318 = memref.load %arg1[%c278] : memref<304xf32, #tpu.memory_space<smem>>
    %1319 = vector.broadcast %1318 : f32 to vector<8x128xf32>
    %1320 = arith.mulf %1319, %28 : vector<8x128xf32>
    %1321 = arith.addf %1317, %1320 : vector<8x128xf32>
    %c279 = arith.constant 279 : index
    %1322 = memref.load %arg1[%c279] : memref<304xf32, #tpu.memory_space<smem>>
    %1323 = vector.broadcast %1322 : f32 to vector<8x128xf32>
    %1324 = arith.mulf %1323, %33 : vector<8x128xf32>
    %1325 = arith.addf %1321, %1324 : vector<8x128xf32>
    %c280 = arith.constant 280 : index
    %1326 = memref.load %arg1[%c280] : memref<304xf32, #tpu.memory_space<smem>>
    %1327 = vector.broadcast %1326 : f32 to vector<8x128xf32>
    %1328 = arith.mulf %1327, %30 : vector<8x128xf32>
    %1329 = arith.addf %1325, %1328 : vector<8x128xf32>
    %c281 = arith.constant 281 : index
    %1330 = memref.load %arg1[%c281] : memref<304xf32, #tpu.memory_space<smem>>
    %1331 = vector.broadcast %1330 : f32 to vector<8x128xf32>
    %1332 = arith.mulf %1331, %36 : vector<8x128xf32>
    %1333 = arith.addf %1329, %1332 : vector<8x128xf32>
    %c282 = arith.constant 282 : index
    %1334 = memref.load %arg1[%c282] : memref<304xf32, #tpu.memory_space<smem>>
    %1335 = vector.broadcast %1334 : f32 to vector<8x128xf32>
    %1336 = arith.mulf %1335, %41 : vector<8x128xf32>
    %1337 = arith.addf %1333, %1336 : vector<8x128xf32>
    %c283 = arith.constant 283 : index
    %1338 = memref.load %arg1[%c283] : memref<304xf32, #tpu.memory_space<smem>>
    %1339 = vector.broadcast %1338 : f32 to vector<8x128xf32>
    %1340 = arith.mulf %1339, %38 : vector<8x128xf32>
    %1341 = arith.addf %1337, %1340 : vector<8x128xf32>
    %c284 = arith.constant 284 : index
    %1342 = memref.load %arg1[%c284] : memref<304xf32, #tpu.memory_space<smem>>
    %1343 = vector.broadcast %1342 : f32 to vector<8x128xf32>
    %1344 = arith.mulf %1343, %44 : vector<8x128xf32>
    %1345 = arith.addf %1341, %1344 : vector<8x128xf32>
    %c285 = arith.constant 285 : index
    %1346 = memref.load %arg1[%c285] : memref<304xf32, #tpu.memory_space<smem>>
    %1347 = vector.broadcast %1346 : f32 to vector<8x128xf32>
    %1348 = arith.mulf %1347, %49 : vector<8x128xf32>
    %1349 = arith.addf %1345, %1348 : vector<8x128xf32>
    %c286 = arith.constant 286 : index
    %1350 = memref.load %arg1[%c286] : memref<304xf32, #tpu.memory_space<smem>>
    %1351 = vector.broadcast %1350 : f32 to vector<8x128xf32>
    %1352 = arith.mulf %1351, %46 : vector<8x128xf32>
    %1353 = arith.addf %1349, %1352 : vector<8x128xf32>
    %c287 = arith.constant 287 : index
    %1354 = memref.load %arg1[%c287] : memref<304xf32, #tpu.memory_space<smem>>
    %1355 = vector.broadcast %1354 : f32 to vector<8x128xf32>
    %1356 = arith.mulf %1355, %52 : vector<8x128xf32>
    %1357 = arith.addf %1353, %1356 : vector<8x128xf32>
    %cst_131 = arith.constant 0.000000e+00 : f32
    %1358 = vector.broadcast %cst_131 : f32 to vector<8x128xf32>
    %1359 = arith.maximumf %1357, %1358 : vector<8x128xf32>
    %c127_i32_132 = arith.constant 127 : i32
    %1360 = tpu.dynamic_rotate %1359 by %c127_i32_132 dim 1 : vector<8x128xf32>, i32 -> vector<8x128xf32>
    %1361 = arith.maximumf %1359, %1360 : vector<8x128xf32>
    %c15_133 = arith.constant 15 : index
    %c0_134 = arith.constant 0 : index
    %c0_135 = arith.constant 0 : index
    %1362 = vector.load %arg3[%c15_133, %c0_134, %c0_135] : memref<16x128x64xf32, #tpu.memory_space<vmem>>, vector<1x128x64xf32>
    %1363 = vector.shape_cast %1362 : vector<1x128x64xf32> to vector<128x64xf32>
    %cst_136 = arith.constant dense<0.000000e+00> : vector<8x64xf32>
    %1364 = tpu.matmul %1361, %1363, %cst_136 {dimension_numbers = #tpu.dot_dimension_numbers<[1], [0], [0], [1], [0, 0, 1, 1], [], []>} : vector<8x128xf32>, vector<128x64xf32>, vector<8x64xf32> -> vector<8x64xf32>
    %1365 = arith.addf %1283, %1364 : vector<8x64xf32>
    %c0_137 = arith.constant 0 : index
    %c0_138 = arith.constant 0 : index
    %1366 = vector.load %arg4[%c0_137, %c0_138] : memref<1x64xf32, #tpu.memory_space<vmem>>, vector<1x64xf32>
    %1367 = vector.broadcast %1366 : vector<1x64xf32> to vector<8x64xf32>
    %1368 = arith.addf %1365, %1367 : vector<8x64xf32>
    %cst_139 = arith.constant 0.000000e+00 : f32
    %1369 = vector.broadcast %cst_139 : f32 to vector<8x64xf32>
    %1370 = arith.maximumf %1368, %1369 : vector<8x64xf32>
    %c0_140 = arith.constant 0 : index
    %c0_141 = arith.constant 0 : index
    %1371 = vector.load %arg5[%c0_140, %c0_141] : memref<64x128xf32, #tpu.memory_space<vmem>>, vector<64x128xf32>
    %cst_142 = arith.constant dense<0.000000e+00> : vector<8x128xf32>
    %1372 = tpu.matmul %1370, %1371, %cst_142 {dimension_numbers = #tpu.dot_dimension_numbers<[1], [0], [0], [1], [0, 0, 1, 1], [], []>} : vector<8x64xf32>, vector<64x128xf32>, vector<8x128xf32> -> vector<8x128xf32>
    %c0_143 = arith.constant 0 : index
    %c0_144 = arith.constant 0 : index
    %1373 = vector.load %arg6[%c0_143, %c0_144] : memref<1x128xf32, #tpu.memory_space<vmem>>, vector<1x128xf32>
    %1374 = vector.broadcast %1373 : vector<1x128xf32> to vector<8x128xf32>
    %1375 = arith.addf %1372, %1374 : vector<8x128xf32>
    %c0_145 = arith.constant 0 : index
    %c0_146 = arith.constant 0 : index
    %1376 = vector.load %arg7[%c0_145, %c0_146] : memref<8x128xf32, #tpu.memory_space<vmem>>, vector<8x128xf32>
    tpu.vector_store %arg7[%c0_145, %c0_146], %1375 {strides = array<i32>} : memref<8x128xf32, #tpu.memory_space<vmem>>, vector<8x128xf32>,
    return
  }
  func.func @transform_0(%arg0: i32) -> i32 {
    %c0_i32 = arith.constant 0 : i32
    %c0_i32_0 = arith.constant 0 : i32
    return %c0_i32 : i32
  }
  func.func @transform_1(%arg0: i32) -> (i32, i32, i32) {
    %c0_i32 = arith.constant 0 : i32
    %c0_i32_0 = arith.constant 0 : i32
    %c0_i32_1 = arith.constant 0 : i32
    return %c0_i32, %arg0, %c0_i32_0 : i32, i32, i32
  }
  func.func @transform_2(%arg0: i32) -> (i32, i32, i32) {
    %c0_i32 = arith.constant 0 : i32
    %c0_i32_0 = arith.constant 0 : i32
    %c0_i32_1 = arith.constant 0 : i32
    %c0_i32_2 = arith.constant 0 : i32
    return %c0_i32, %c0_i32_0, %c0_i32_1 : i32, i32, i32
  }
  func.func @transform_3(%arg0: i32) -> (i32, i32) {
    %c0_i32 = arith.constant 0 : i32
    %c0_i32_0 = arith.constant 0 : i32
    %c0_i32_1 = arith.constant 0 : i32
    return %c0_i32, %c0_i32_0 : i32, i32
  }
  func.func @transform_4(%arg0: i32) -> (i32, i32) {
    %c0_i32 = arith.constant 0 : i32
    %c0_i32_0 = arith.constant 0 : i32
    %c0_i32_1 = arith.constant 0 : i32
    return %c0_i32, %c0_i32_0 : i32, i32
  }
  func.func @transform_5(%arg0: i32) -> (i32, i32) {
    %c0_i32 = arith.constant 0 : i32
    %c0_i32_0 = arith.constant 0 : i32
    %c0_i32_1 = arith.constant 0 : i32
    return %c0_i32, %c0_i32_0 : i32, i32
  }
  func.func @transform_6(%arg0: i32) -> (i32, i32) {
    %c0_i32 = arith.constant 0 : i32
    %c0_i32_0 = arith.constant 0 : i32
    return %arg0, %c0_i32 : i32, i32
  }
}

</mosaic_0001>

<bundles_post_ra>
// kernel: simple_cnn_forward.1
= control target key start
LH: loop header
LB: loop body
LE: loop exit
PB: predicated region body
PF: predicated region fallthrough
CT: control target
= control target key end

     0   :  { %s7183_s0 = inlined_call_operand.vmem [shape: f32[304], index: 0, kind: input, shape index: {}]   ;;  %s7184_s1 = inlined_call_operand.vmem [shape: f32[6,8,128], index: 1, kind: input, shape index: {}]   ;;  %s7185_s2 = inlined_call_operand.vmem [shape: f32[16,128,64], index: 2, kind: input, shape index: {}]   ;;  %s7186_s3 = inlined_call_operand.vmem [shape: f32[1,64], index: 3, kind: input, shape index: {}]   ;;  %s7187_s4 = inlined_call_operand.vmem [shape: f32[64,128], index: 4, kind: input, shape index: {}]   ;;  %s7188_s5 = inlined_call_operand.vmem [shape: f32[1,128], index: 5, kind: input, shape index: {}]   ;;  %s7189_s6 = inlined_call_operand.vmem [shape: f32[8,128], index: 6, kind: output, shape index: {}]  }
   0x1   :  { %7265 = sst [smem:[#allocation72_spill]] %s7184_s1 }
   0x2   :  { %7266 = sst [smem:[#allocation73_spill]] %s7185_s2 }
   0x3   :  { %7267 = sst [smem:[#allocation74_spill]] %s7186_s3 }
   0x4   :  { %7268 = sst [smem:[#allocation75_spill]] %s7187_s4 }
   0x5   :  { %7269 = sst [smem:[#allocation76_spill]] %s7188_s5 }
   0x6   :  { %7270 = sst [smem:[#allocation77_spill]] %s7189_s6 }
   0x7   :  { %11 = vsyncpa [#allocation3], 0  ;;  %s18_s23 = sshll.u32 %s7183_s0, 4  ;;  %s19_s23 = int_to_ptr.vmem [resolvable:$true] %s18_s23 }
   0x8   :  { %s4272_s24 = scalar_lea.vmem %s19_s23, 48  ;;  %s4276_s25 = scalar_lea.vmem %s19_s23, 64 }
   0x9   :  { %p4273_p0 = scmp.ne.s32.totalorder %s19_s23, %s4272_s24  ;;  %p4277_p1 = scmp.lt.s32.totalorder %s19_s23, %s19_s23 }
   0xa   :  { %p4278_p2 = scmp.lt.s32.totalorder %s4276_s25, %s4272_s24 }
   0xc   :  { %p4279_p3 = por %p4278_p2, %p4277_p1 }
   0xe   :  { %p4280_p4 = pnand %p4279_p3, %p4273_p0 }
  0x10   :  { %4283 = shalt.err (!%p4280_p4)
}
  0x11   :  { %s4286_s26 = smov [#allocation2]  }
  0x12   :  { %21 = dma.vmem_to_smem %s19_s23, 48, %s4286_s26, [#allocation3]  }
  0x13   :  { %4284 = dma.done.wait [#allocation3], 48  }
  0x14   :  { %4285 = vsyncadd [#allocation3], 4294967248 }
  0x15   :  { %35 = sfence }
  0x16   :  { %v4332_v0 = vld [vmem:[%s7184_s1] sm:$0xff]  ;;  %v4337_v1 = vld [vmem:[%s7184_s1 + $0x8] sm:$0xff]  ;;  %s4287_s30 = smov 1   ;;  %s4343_s7 = sld [smem:[#allocation2 + $0x121]]  ;;  %v4356_v2 = vld [vmem:[%s7184_s1 + $0x10] sm:$0xff]  ;;  %v36_v6 = vlaneseq  ;;  %vm4290_vm2 = vmmov 0  }
  0x17   :  { %41 = vrot.lane.b32.xlu0 %v4332_v0, %s4287_s30  ;;  %49 = vrot.lane.b32.xlu1 %v4337_v1, %s4287_s30  ;;  %s4345_s8 = sld [smem:[#allocation2 + $0x12]]  ;;  %s7191_s9 = smov 127   ;;  %v4373_v3 = vld [vmem:[%s7184_s1 + $0x18] sm:$0xff]  ;;  %v4390_v4 = vld [vmem:[%s7184_s1 + $0x20] sm:$0xff]  ;;  %vm2764_vm3 = vcmask 523264  }
  0x18   :  { %s4351_s10 = sld [smem:[#allocation2 + $0x13]]  ;;  %v4407_v5 = vld [vmem:[%s7184_s1 + $0x28] sm:$0xff]  ;;  %v4547_v9 = vand.u32 127, %v36_v6 }
  0x19   :  { %s4358_s13 = sld [smem:[#allocation2 + $0x14]] }
  0x1a   :  { %s4360_s14 = sld [smem:[#allocation2 + $0x15]]  ;;  %vm38_vm0 = vcmp.eq.s32.totalorder %v4547_v9, 0  ;;  %vm39_vm1 = vcmp.eq.s32.totalorder %v4547_v9, 127 }
  0x1b   :  { %44 = vrot.lane.b32.xlu0 %v4332_v0, %s7191_s9  ;;  %52 = vrot.lane.b32.xlu1 %v4337_v1, %s7191_s9  ;;  %s4362_s15 = sld [smem:[#allocation2 + $0x16]] }
  0x1c   :  { %7271 = sst [smem:[#allocation5_spill]] %s4343_s7  ;;  %v182_v11 = vstv %s4343_s7 }
  0x1d   :  { %7272 = sst [smem:[#allocation6_spill]] %s4345_s8  ;;  %v184_v12 = vstv %s4345_s8 }
  0x1e   :  { %s4368_s16 = sld [smem:[#allocation2 + $0x17]]  ;;  %v188_v7 = vstv %s4351_s10 }
  0x1f   :  { %7273 = sst [smem:[#allocation7_spill]] %s4358_s13  ;;  %57 = vrot.lane.b32.xlu0 %v4356_v2, %s4287_s30  ;;  %60 = vrot.lane.b32.xlu1 %v4356_v2, %s7191_s9  ;;  %v4555_v13 = vmul.f32 %v188_v7, %v4332_v0  ;;  %v192_v15 = vstv %s4358_s13 }
  0x20   :  { %7274 = sst [smem:[#allocation8_spill]] %s4360_s14  ;;  %v196_v16 = vstv %s4360_s14 }
  0x21   :  { %s4375_s19 = sld [smem:[#allocation2 + $0x18]]  ;;  %v200_v8 = vstv %s4362_s15 }
  0x22   :  { %s4377_s20 = sld [smem:[#allocation2 + $0x19]]  ;;  %v4563_v17 = vmul.f32 %v4337_v1, %v200_v8 }
  0x23   :  { %s4379_s21 = sld [smem:[#allocation2 + $0x1a]]  ;;  %65 = vrot.lane.b32.xlu0 %v4373_v3, %s4287_s30  ;;  %68 = vrot.lane.b32.xlu1 %v4373_v3, %s7191_s9 }
  0x24   :  { %7275 = sst [smem:[#allocation9_spill]] %s4368_s16  ;;  %v204_v19 = vstv %s4368_s16 }
  0x25   :  { %s4385_s22 = sld [smem:[#allocation2 + $0x1b]] }
  0x26   :  { %s4392_s25 = sld [smem:[#allocation2 + $0x1c]] }
  0x27   :  { %7276 = sst [smem:[#allocation10_spill]] %s4375_s19  ;;  %73 = vrot.lane.b32.xlu0 %v4390_v4, %s4287_s30  ;;  %76 = vrot.lane.b32.xlu1 %v4390_v4, %s7191_s9 }
  0x28   :  { %s4394_s26 = sld [smem:[#allocation2 + $0x1d]]  ;;  %v212_v10 = vstv %s4377_s20 }
  0x29   :  { %7277 = sst [smem:[#allocation11_spill]] %s4379_s21  ;;  %v4571_v21 = vmul.f32 %v4356_v2, %v212_v10 }
  0x2a   :  { %s4396_s27 = sld [smem:[#allocation2 + $0x1e]] }
  0x2b   :  { %7278 = sst [smem:[#allocation12_spill]] %s4385_s22  ;;  %81 = vrot.lane.b32.xlu0 %v4407_v5, %s4287_s30  ;;  %84 = vrot.lane.b32.xlu1 %v4407_v5, %s7191_s9 }
  0x2c   :  { %s4402_s28 = sld [smem:[#allocation2 + $0x1f]]  ;;  %v224_v14 = vstv %s4392_s25 }
  0x2d   :  { %s4409_s11 = sld [smem:[#allocation2 + $0x20]]  ;;  %v4579_v25 = vmul.f32 %v4373_v3, %v224_v14 }
  0x2e   :  { %7279 = sst [smem:[#allocation13_spill]] %s4394_s26 }
  0x2f   :  { %s4411_s12 = sld [smem:[#allocation2 + $0x21]] }
  0x30   :  { %7280 = sst [smem:[#allocation14_spill]] %s4396_s27 }
  0x31   :  { %s4413_s17 = sld [smem:[#allocation2 + $0x22]] }
  0x32   :  { %s4419_s18 = sld [smem:[#allocation2 + $0x23]]  ;;  %v236_v18 = vstv %s4402_s28 }
  0x33   :  { %7281 = sst [smem:[#allocation15_spill]] %s4409_s11  ;;  %v4586_v28 = vmul.f32 %v4390_v4, %v236_v18 }
  0x34   :  { %s4421_s23 = sld [smem:[#allocation2 + $0x120]] }
  0x35   :  { %7282 = sst [smem:[#allocation16_spill]] %s4411_s12 }
  0x36   :  { %s4423_s24 = sld [smem:[#allocation2]] }
  0x37   :  { %s4425_s0 = sld [smem:[#allocation2 + $0x1]]  ;;  %v248_v22 = vstv %s4413_s17 }
  0x38   :  { %7283 = sst [smem:[#allocation17_spill]] %s4419_s18  ;;  %v4594_v32 = vmul.f32 %v4407_v5, %v248_v22 }
  0x39   :  { %s4427_s29 = sld [smem:[#allocation2 + $0x2]] }
  0x3a   :  { %7284 = sst [smem:[#allocation18_spill]] %s4421_s23 }
  0x3b   :  { %s4429_s6 = sld [smem:[#allocation2 + $0x3]] }
  0x3c   :  { %7285 = sst [smem:[#allocation19_spill]] %s4423_s24 }
  0x3d   :  { %s4431_s5 = sld [smem:[#allocation2 + $0x4]]  ;;  %v94_v30 = vstv %s4425_s0 }
  0x3e   :  { %s4433_s3 = sld [smem:[#allocation2 + $0x5]]  ;;  %v4607_v39 = vmul.f32 %v94_v30, %v4332_v0 }
  0x3f   :  { %7286 = sst [smem:[#allocation20_spill]] %s4427_s29 }
  0x40   :  { %s4435_s30 = sld [smem:[#allocation2 + $0x6]] }
  0x41   :  { %7287 = sst [smem:[#allocation21_spill]] %s4429_s6 }
  0x42   :  { %s4437_s4 = sld [smem:[#allocation2 + $0x7]] }
  0x43   :  { %7288 = sst [smem:[#allocation22_spill]] %s4431_s5 }
  0x44   :  { %7289 = sst [smem:[#allocation23_spill]] %s4433_s3 }
  0x45   :  { %s4439_s9 = sld [smem:[#allocation2 + $0x8]] }
  0x46   :  { %7290 = sst [smem:[#allocation24_spill]] %s4435_s30 }
  0x47   :  { %s4441_s2 = sld [smem:[#allocation2 + $0x9]] }
  0x48   :  { %7291 = sst [smem:[#allocation25_spill]] %s4437_s4 }
  0x49   :  { %s4443_s1 = sld [smem:[#allocation2 + $0xa]] }
  0x4a   :  { %s4445_s24 = sld [smem:[#allocation2 + $0xb]] }
  0x4b   :  { %7292 = sst [smem:[#allocation26_spill]] %s4439_s9 }
  0x4c   :  { %s4447_s23 = sld [smem:[#allocation2 + $0xc]] }
  0x4d   :  { %7293 = sst [smem:[#allocation27_spill]] %s4441_s2 }
  0x4e   :  { %s4449_s29 = sld [smem:[#allocation2 + $0xd]] }
  0x4f   :  { %7294 = sst [smem:[#allocation28_spill]] %s4443_s1 }
  0x50   :  { %7295 = sst [smem:[#allocation29_spill]] %s4445_s24 }
  0x51   :  { %s4451_s6 = sld [smem:[#allocation2 + $0xe]] }
  0x52   :  { %7296 = sst [smem:[#allocation30_spill]] %s4447_s23 }
  0x53   :  { %s4453_s5 = sld [smem:[#allocation2 + $0xf]] }
  0x54   :  { %7297 = sst [smem:[#allocation31_spill]] %s4449_s29 }
  0x55   :  { %s4455_s3 = sld [smem:[#allocation2 + $0x10]] }
  0x56   :  { %s4457_s30 = sld [smem:[#allocation2 + $0x11]] }
  0x57   :  { %7298 = sst [smem:[#allocation32_spill]] %s4451_s6 }
  0x58   :  { %s4459_s4 = sld [smem:[#allocation2 + $0x122]] }
  0x59   :  { %7299 = sst [smem:[#allocation33_spill]] %s4453_s5 }
  0x5a   :  { %s4461_s9 = sld [smem:[#allocation2 + $0x24]] }
  0x5b   :  { %7300 = sst [smem:[#allocation34_spill]] %s4455_s3 }
  0x5c   :  { %7301 = sst [smem:[#allocation35_spill]] %s4457_s30 }
  0x5d   :  { %s4463_s2 = sld [smem:[#allocation2 + $0x25]] }
  0x5e   :  { %7302 = sst [smem:[#allocation36_spill]] %s4459_s4 }
  0x5f   :  { %s4465_s1 = sld [smem:[#allocation2 + $0x26]] }
  0x60   :  { %7303 = sst [smem:[#allocation37_spill]] %s4461_s9 }
  0x61   :  { %s4467_s24 = sld [smem:[#allocation2 + $0x27]] }
  0x62   :  { %s4469_s23 = sld [smem:[#allocation2 + $0x28]] }
  0x63   :  { %7304 = sst [smem:[#allocation38_spill]] %s4463_s2 }
  0x64   :  { %s4471_s29 = sld [smem:[#allocation2 + $0x29]] }
  0x65   :  { %7305 = sst [smem:[#allocation39_spill]] %s4465_s1 }
  0x66   :  { %s4473_s6 = sld [smem:[#allocation2 + $0x2a]] }
  0x67   :  { %7306 = sst [smem:[#allocation40_spill]] %s4467_s24 }
  0x68   :  { %7307 = sst [smem:[#allocation41_spill]] %s4469_s23 }
  0x69   :  { %s4475_s5 = sld [smem:[#allocation2 + $0x2b]] }
  0x6a   :  { %7308 = sst [smem:[#allocation42_spill]] %s4471_s29 }
  0x6b   :  { %s4477_s3 = sld [smem:[#allocation2 + $0x2c]] }
  0x6c   :  { %7309 = sst [smem:[#allocation43_spill]] %s4473_s6 }
  0x6d   :  { %s4479_s30 = sld [smem:[#allocation2 + $0x2d]] }
  0x6e   :  { %s4481_s4 = sld [smem:[#allocation2 + $0x2e]] }
  0x6f   :  { %7310 = sst [smem:[#allocation44_spill]] %s4475_s5 }
  0x70   :  { %s4483_s9 = sld [smem:[#allocation2 + $0x2f]] }
  0x71   :  { %7311 = sst [smem:[#allocation45_spill]] %s4477_s3 }
  0x72   :  { %s4485_s2 = sld [smem:[#allocation2 + $0x30]] }
  0x73   :  { %7312 = sst [smem:[#allocation46_spill]] %s4479_s30 }
  0x74   :  { %7313 = sst [smem:[#allocation47_spill]] %s4481_s4 }
  0x75   :  { %s4487_s1 = sld [smem:[#allocation2 + $0x31]] }
  0x76   :  { %7314 = sst [smem:[#allocation48_spill]] %s4483_s9 }
  0x77   :  { %s4489_s24 = sld [smem:[#allocation2 + $0x32]] }
  0x78   :  { %7315 = sst [smem:[#allocation49_spill]] %s4485_s2 }
  0x79   :  { %s4491_s23 = sld [smem:[#allocation2 + $0x33]] }
  0x7a   :  { %s4493_s29 = sld [smem:[#allocation2 + $0x34]] }
  0x7b   :  { %7316 = sst [smem:[#allocation50_spill]] %s4487_s1 }
  0x7c   :  { %s4495_s6 = sld [smem:[#allocation2 + $0x35]] }
  0x7d   :  { %7317 = sst [smem:[#allocation51_spill]] %s4489_s24 }
  0x7e   :  { %s4497_s5 = sld [smem:[#allocation2 + $0x123]] }
  0x7f   :  { %7318 = sst [smem:[#allocation52_spill]] %s4491_s23 }
  0x80   :  { %s4499_s3 = sld [smem:[#allocation2 + $0x36]] }
  0x81   :  { %s4501_s30 = sld [smem:[#allocation2 + $0x37]] }
  0x82   :  { %7319 = sst [smem:[#allocation53_spill]] %s4495_s6 }
  0x83   :  { %s4503_s4 = sld [smem:[#allocation2 + $0x38]] }
  0x84   :  { %7320 = sst [smem:[#allocation54_spill]] %s4497_s5 }
  0x85   :  { %s4505_s9 = sld [smem:[#allocation2 + $0x39]] }
  0x86   :  { %7321 = sst [smem:[#allocation55_spill]] %s4499_s3 }
  0x87   :  { %7322 = sst [smem:[#allocation56_spill]] %s4501_s30 }
  0x88   :  { %s4507_s2 = sld [smem:[#allocation2 + $0x3a]] }
  0x89   :  { %7323 = sst [smem:[#allocation57_spill]] %s4503_s4 }
  0x8a   :  { %s4509_s1 = sld [smem:[#allocation2 + $0x3b]] }
  0x8b   :  { %7324 = sst [smem:[#allocation58_spill]] %s4505_s9 }
  0x8c   :  { %s4511_s24 = sld [smem:[#allocation2 + $0x3c]] }
  0x8d   :  { %s4513_s23 = sld [smem:[#allocation2 + $0x3d]] }
  0x8e   :  { %s4515_s6 = sld [smem:[#allocation2 + $0x3e]]  ;;  %v601_v33 = vstv %s4507_s2 }
  0x8f   :  { %s4517_s5 = sld [smem:[#allocation2 + $0x3f]]  ;;  %v4713_v31 = vmul.f32 %v4337_v1, %v601_v33 }
  0x90   :  { %7325 = sst [smem:[#allocation59_spill]] %s4509_s1 }
  0x91   :  { %s4519_s3 = sld [smem:[#allocation2 + $0x40]] }
  0x92   :  { %7326 = sst [smem:[#allocation60_spill]] %s4511_s24 }
  0x93   :  { %7327 = sst [smem:[#allocation61_spill]] %s4513_s23 }
  0x94   :  { %7328 = sst [smem:[#allocation62_spill]] %s4515_s6 }
  0x95   :  { %7329 = sst [smem:[#allocation63_spill]] %s4517_s5 }
  0x96   :  { %s4521_s30 = sld [smem:[#allocation2 + $0x41]] }
  0x97   :  { %s4523_s9 = sld [smem:[#allocation2 + $0x42]]  ;;  %v625_v52 = vstv %s4519_s3 }
  0x98   :  { %s4525_s4 = sld [smem:[#allocation2 + $0x43]]  ;;  %v4729_v33 = vmul.f32 %v4373_v3, %v625_v52  ;;  %v50_v52 = vpop.permute.xlu1 %49 }
  0x99   :  { %s4527_s1 = sld [smem:[#allocation2 + $0x44]] }
  0x9a   :  { %s4529_s24 = sld [smem:[#allocation2 + $0x45]] }
  0x9b   :  { %s4531_s23 = sld [smem:[#allocation2 + $0x46]] }
  0x9c   :  { %7330 = sst [smem:[#allocation64_spill]] %s4521_s30 }
  0x9d   :  { %7331 = sst [smem:[#allocation65_spill]] %s4523_s9 }
  0x9e   :  { %s4533_s6 = sld [smem:[#allocation2 + $0x47]] }
  0x9f   :  { %7332 = sst [smem:[#allocation66_spill]] %s4527_s1 }
  0xa0   :  { %7333 = sst [smem:[#allocation67_spill]] %s4529_s24 }
  0xa1   :  { %s4535_s5 = sld [smem:[#allocation2 + $0x124]]  ;;  %v649_v26 = vstv %s4531_s23 }
  0xa2   :  { %s4537_s30 = sld [smem:[#allocation2 + $0x48]]  ;;  %v4746_v29 = vmul.f32 %v4407_v5, %v649_v26  ;;  %v42_v26 = vpop.permute.xlu0 %41 }
  0xa3   :  { %s4539_s9 = sld [smem:[#allocation2 + $0x49]] }
  0xa4   :  { %7334 = sst [smem:[#allocation68_spill]] %s4533_s6 }
  0xa5   :  { %s4542_s1 = sld [smem:[#allocation2 + $0x4a]] }
  0xa6   :  { %s4545_s24 = sld [smem:[#allocation2 + $0x4b]] }
  0xa7   :  { %7335 = sst [smem:[#allocation69_spill]] %s4535_s5 }
  0xa8   :  { %s4550_s5 = sld [smem:[#allocation2 + $0x4c]] }
  0xa9   :  { %s4558_s10 = sld [smem:[#allocation2 + $0x4d]]  ;;  %v755_v49 = vstv %s4539_s9 }
  0xaa   :  { %s4566_s15 = sld [smem:[#allocation2 + $0x4e]] }
  0xab   :  { %s7338_s20 = sld [smem:[#allocation22_spill]] }
  0xac   :  { %s4574_s25 = sld [smem:[#allocation2 + $0x4f]] }
  0xad   :  { %s7339_s13 = sld [smem:[#allocation18_spill]] }
  0xae   :  { %s7340_s14 = sld [smem:[#allocation19_spill]]  ;;  %v767_v24 = vstv %s4550_s5 }
  0xaf   :  { %7336 = sst [smem:[#allocation70_spill]] %s4558_s10 }
  0xb0   :  { %7337 = sst [smem:[#allocation71_spill]] %s4566_s15 }
  0xb1   :  { %s7341_s7 = sld [smem:[#allocation25_spill]]  ;;  %v106_v34 = vstv %s7338_s20 }
  0xb2   :  { %s7342_s28 = sld [smem:[#allocation28_spill]]  ;;  %v4615_v43 = vmul.f32 %v4337_v1, %v106_v34  ;;  %v4755_v34 = vmul.f32 %v755_v49, %v4332_v0 }
  0xb3   :  { %s4582_s16 = sld [smem:[#allocation2 + $0x50]]  ;;  %v88_v35 = vstv %s7339_s13 }
  0xb4   :  { %s7344_s19 = sld [smem:[#allocation20_spill]]  ;;  %v90_v36 = vstv %s7340_s14 }
  0xb5   :  { %s7345_s17 = sld [smem:[#allocation21_spill]] }
  0xb6   :  { %s7346_s8 = sld [smem:[#allocation31_spill]] }
  0xb7   :  { %s4590_s21 = sld [smem:[#allocation2 + $0x51]]  ;;  %v118_v37 = vstv %s7341_s7 }
  0xb8   :  { %s7348_s22 = sld [smem:[#allocation23_spill]]  ;;  %v130_v38 = vstv %s7342_s28  ;;  %v4623_v47 = vmul.f32 %v4356_v2, %v118_v37  ;;  %v4763_v37 = vmul.f32 %v4337_v1, %v767_v24 }
  0xb9   :  { %7343 = sst [smem:[#allocation22_spill]] %s4582_s16  ;;  %v4628_v50 = vmul.f32 %v4373_v3, %v130_v38  ;;  %v483_v38 = vstv %s4493_s29 }
  0xba   :  { %s7350_s26 = sld [smem:[#allocation34_spill]]  ;;  %v98_v40 = vstv %s7344_s19 }
  0xbb   :  { %s4598_s27 = sld [smem:[#allocation2 + $0x52]]  ;;  %v102_v41 = vstv %s7345_s17 }
  0xbc   :  { %s4604_s0 = sld [smem:[#allocation2 + $0x53]]  ;;  %v142_v42 = vstv %s7346_s8 }
  0xbd   :  { %7347 = sst [smem:[#allocation25_spill]] %s4590_s21  ;;  %v4635_v53 = vmul.f32 %v4390_v4, %v142_v42 }
  0xbe   :  { %s7356_s18 = sld [smem:[#allocation38_spill]]  ;;  %v110_v44 = vstv %s7348_s22 }
  0xbf   :  { %s4612_s20 = sld [smem:[#allocation2 + $0x54]] }
  0xc0   :  { %s7360_s7 = sld [smem:[#allocation41_spill]]  ;;  %v154_v46 = vstv %s7350_s26 }
  0xc1   :  { %s4620_s28 = sld [smem:[#allocation2 + $0x55]]  ;;  %v4643_v57 = vmul.f32 %v4407_v5, %v154_v46  ;;  %v637_v46 = vstv %s4525_s4  ;;  %v791_v48 = vstv %s4598_s27 }
  0xc2   :  { %7353 = sst [smem:[#allocation28_spill]] %s4604_s0  ;;  %v4779_v24 = vmul.f32 %v4373_v3, %v791_v48 }
  0xc3   :  { %s7363_s19 = sld [smem:[#allocation36_spill]] }
  0xc4   :  { %s7364_s8 = sld [smem:[#allocation37_spill]]  ;;  %v423_v54 = vstv %s7356_s18 }
  0xc5   :  { %7357 = sst [smem:[#allocation31_spill]] %s4612_s20  ;;  %v4655_v63 = vmul.f32 %v423_v54, %v4332_v0 }
  0xc6   :  { %s7365_s17 = sld [smem:[#allocation44_spill]]  ;;  %v435_v58 = vstv %s7360_s7 }
  0xc7   :  { %7361 = sst [smem:[#allocation34_spill]] %s4620_s28  ;;  %v4663_v10 = vmul.f32 %v4337_v1, %v435_v58 }
  0xc8   :  { %s4630_s20 = sld [smem:[#allocation2 + $0x56]] }
  0xc9   :  { %s7367_s15 = sld [smem:[#allocation39_spill]]  ;;  %v417_v60 = vstv %s7363_s19 }
  0xca   :  { %s7368_s26 = sld [smem:[#allocation40_spill]]  ;;  %v419_v61 = vstv %s7364_s8 }
  0xcb   :  { %s7369_s22 = sld [smem:[#allocation47_spill]] }
  0xcc   :  { %s4638_s21 = sld [smem:[#allocation2 + $0x57]]  ;;  %v447_v62 = vstv %s7365_s17 }
  0xcd   :  { %s7373_s28 = sld [smem:[#allocation50_spill]]  ;;  %v4671_v30 = vmul.f32 %v4356_v2, %v447_v62 }
  0xce   :  { %7366 = sst [smem:[#allocation38_spill]] %s4630_s20 }
  0xcf   :  { %s4646_s12 = sld [smem:[#allocation2 + $0x58]]  ;;  %v427_v6 = vstv %s7367_s15 }
  0xd0   :  { %s4652_s18 = sld [smem:[#allocation2 + $0x59]]  ;;  %v431_v7 = vstv %s7368_s26 }
  0xd1   :  { %v459_v8 = vstv %s7369_s22  ;;  %s4660_s7 = sld [smem:[#allocation2 + $0x125]] }
  0xd2   :  { %7370 = sst [smem:[#allocation41_spill]] %s4638_s21  ;;  %v4679_v42 = vmul.f32 %v4373_v3, %v459_v8  ;;  %v4695_v8 = vmul.f32 %v4407_v5, %v483_v38 }
  0xd3   :  { %s7379_s21 = sld [smem:[#allocation56_spill]]  ;;  %v471_v22 = vstv %s7373_s28 }
  0xd4   :  { %s4668_s17 = sld [smem:[#allocation2 + $0x5a]]  ;;  %v4687_v62 = vmul.f32 %v4390_v4, %v471_v22 }
  0xd5   :  { %s7384_s26 = sld [smem:[#allocation54_spill]]  ;;  %v815_v18 = vstv %s4646_s12 }
  0xd6   :  { %7376 = sst [smem:[#allocation44_spill]] %s4652_s18  ;;  %v4794_v45 = vmul.f32 %v4407_v5, %v815_v18 }
  0xd7   :  { %7380 = sst [smem:[#allocation47_spill]] %s4660_s7 }
  0xd8   :  { %s7385_s22 = sld [smem:[#allocation61_spill]] }
  0xd9   :  { %s4676_s8 = sld [smem:[#allocation2 + $0x5b]]  ;;  %v589_v58 = vstv %s7379_s21 }
  0xda   :  { %s7386_s7 = sld [smem:[#allocation55_spill]]  ;;  %v4704_v56 = vmul.f32 %v589_v58, %v4332_v0  ;;  %v779_v58 = vstv %s4574_s25 }
  0xdb   :  { %s7387_s10 = sld [smem:[#allocation57_spill]]  ;;  %v583_v54 = vstv %s7384_s26  ;;  %v4771_v49 = vmul.f32 %v4356_v2, %v779_v58 }
  0xdc   :  { %s4684_s28 = sld [smem:[#allocation2 + $0x5c]] }
  0xdd   :  { %s7388_s11 = sld [smem:[#allocation58_spill]] }
  0xde   :  { %s7389_s29 = sld [smem:[#allocation59_spill]]  ;;  %v613_v55 = vstv %s7385_s22 }
  0xdf   :  { %s4692_s20 = sld [smem:[#allocation2 + $0x5d]]  ;;  %v4721_v27 = vmul.f32 %v4356_v2, %v613_v55  ;;  %v4737_v55 = vmul.f32 %v4390_v4, %v637_v46  ;;  %v921_v20 = vstv %s4676_s8 }
  0xe0   :  { %s4700_s13 = sld [smem:[#allocation2 + $0x5e]]  ;;  %v585_v22 = vstv %s7386_s7 }
  0xe1   :  { %v593_v59 = vstv %s7387_s10  ;;  %s4708_s19 = sld [smem:[#allocation2 + $0x5f]] }
  0xe2   :  { %s4717_s16 = sld [smem:[#allocation2 + $0x60]] }
  0xe3   :  { %v597_v38 = vstv %s7388_s11  ;;  %s4725_s3 = sld [smem:[#allocation2 + $0x61]] }
  0xe4   :  { %s4733_s4 = sld [smem:[#allocation2 + $0x62]] }
  0xe5   :  { %s7398_s23 = sld [smem:[#allocation34_spill]] }
  0xe6   :  { %s4741_s0 = sld [smem:[#allocation2 + $0x63]]  ;;  %v933_v14 = vstv %s4700_s13 }
  0xe7   :  { %s7399_s21 = sld [smem:[#allocation70_spill]] }
  0xe8   :  { %s7400_s9 = sld [smem:[#allocation71_spill]] }
  0xe9   :  { %s4750_s15 = sld [smem:[#allocation2 + $0x64]] }
  0xea   :  { %s7401_s2 = sld [smem:[#allocation22_spill]] }
  0xeb   :  { %s7403_s5 = sld [smem:[#allocation28_spill]]  ;;  %v803_v23 = vstv %s7398_s23 }
  0xec   :  { %s4758_s14 = sld [smem:[#allocation2 + $0x65]]  ;;  %v4786_v46 = vmul.f32 %v4390_v4, %v803_v23  ;;  %v4802_v4 = vsel %vm38_vm0, 0.0, %v42_v26  ;;  %v4806_v23 = vsel %vm38_vm0, 0.0, %v50_v52  ;;  %v4819_v26 = vmul.f32 %v921_v20, %v4332_v0  ;;  %v45_v0 = vpop.permute.xlu0 %44  ;;  %v53_v20 = vpop.permute.xlu1 %52 }
  0xed   :  { %s7405_s10 = sld [smem:[#allocation31_spill]]  ;;  %v185_v5 = vmul.f32 %v184_v12, %v4802_v4  ;;  %v91_v18 = vmul.f32 %v90_v36, %v4802_v4  ;;  %v420_v51 = vmul.f32 %v419_v61, %v4802_v4  ;;  %v586_v58 = vmul.f32 %v585_v22, %v4802_v4 }
  0xee   :  { %s4766_s25 = sld [smem:[#allocation2 + $0x66]]  ;;  %v4832_v12 = vmul.f32 %v4337_v1, %v933_v14  ;;  %v197_v52 = vmul.f32 %v196_v16, %v4806_v23  ;;  %v945_v22 = vstv %s4725_s3  ;;  %v4848_v1 = vsel %vm39_vm1, 0.0, %v45_v0 }
  0xef   :  { %s4774_s27 = sld [smem:[#allocation2 + $0x67]]  ;;  %v186_v36 = vadd.f32 %v185_v5, %v182_v11  ;;  %v92_v61 = vadd.f32 %v91_v18, %v88_v35  ;;  %v103_v14 = vmul.f32 %v102_v41, %v4806_v23  ;;  %v421_v48 = vadd.f32 %v420_v51, %v417_v60 }
  0xf0   :  { %s7410_s23 = sld [smem:[#allocation47_spill]]  ;;  %v587_v11 = vadd.f32 %v586_v58, %v583_v54  ;;  %v193_v35 = vmul.f32 %v192_v15, %v4848_v1  ;;  %v432_v18 = vmul.f32 %v431_v7, %v4806_v23  ;;  %v4871_v41 = vsel %vm39_vm1, 0.0, %v53_v20 }
  0xf1   :  { %s4810_s6 = sld [smem:[#allocation2 + $0x6b]]  ;;  %v190_v16 = vadd.f32 %v4555_v13, %v186_v36  ;;  %v96_v5 = vadd.f32 %v4607_v39, %v92_v61  ;;  %v99_v51 = vmul.f32 %v98_v40, %v4848_v1  ;;  %v425_v13 = vadd.f32 %v4655_v63, %v421_v48  ;;  %v58_v39 = vpop.permute.xlu0 %57  ;;  %v61_v63 = vpop.permute.xlu1 %60 }
  0xf2   :  { %7404 = sst [smem:[#allocation50_spill]] %s4758_s14  ;;  %v428_v15 = vmul.f32 %v427_v6, %v4848_v1  ;;  %v591_v7 = vadd.f32 %v4704_v56, %v587_v11  ;;  %v594_v54 = vmul.f32 %v593_v59, %v4848_v1  ;;  %v937_v58 = vstv %s4708_s19 }
  0xf3   :  { %s4782_s14 = sld [smem:[#allocation2 + $0x68]]  ;;  %v194_v60 = vadd.f32 %v193_v35, %v190_v16  ;;  %v4891_v40 = vsel %vm38_vm0, 0.0, %v58_v39  ;;  %v100_v6 = vadd.f32 %v99_v51, %v96_v5  ;;  %v941_v0 = vstv %s4717_s16 }
  0xf4   :  { %7407 = sst [smem:[#allocation56_spill]] %s4766_s25  ;;  %v429_v48 = vadd.f32 %v428_v15, %v425_v13  ;;  %v205_v20 = vmul.f32 %v204_v19, %v4871_v41  ;;  %v598_v59 = vmul.f32 %v597_v38, %v4806_v23  ;;  %v4903_v36 = vmul.f32 %v4356_v2, %v945_v22 }
  0xf5   :  { %7409 = sst [smem:[#allocation54_spill]] %s4774_s27  ;;  %v198_v56 = vadd.f32 %v197_v52, %v194_v60  ;;  %v104_v61 = vadd.f32 %v103_v14, %v100_v6  ;;  %v111_v11 = vmul.f32 %v110_v44, %v4871_v41  ;;  %v4917_v2 = vsel %vm39_vm1, 0.0, %v61_v63  ;;  %v66_v19 = vpop.permute.xlu0 %65  ;;  %v69_v5 = vpop.permute.xlu1 %68 }
  0xf6   :  { %s4790_s27 = sld [smem:[#allocation2 + $0x69]]  ;;  %v433_v16 = vadd.f32 %v432_v18, %v429_v48  ;;  %v595_v44 = vadd.f32 %v594_v54, %v591_v7  ;;  %v949_v7 = vstv %s4733_s4  ;;  %v957_v63 = vstv %s4750_s15 }
  0xf7   :  { %7420 = sst [smem:[#allocation34_spill]] %s4810_s6  ;;  %v202_v38 = vadd.f32 %v4563_v17, %v198_v56  ;;  %v108_v18 = vadd.f32 %v4615_v43, %v104_v61  ;;  %v4942_v43 = vsel %vm38_vm0, 0.0, %v66_v19  ;;  %v7450_v48 = vstv %s4537_s30 }
  0xf8   :  { %s4822_s18 = sld [smem:[#allocation2 + $0x126]]  ;;  %v437_v15 = vadd.f32 %v4663_v10, %v433_v16  ;;  %v4947_v56 = vmul.f32 %v7450_v48, %v4802_v4 }
  0xf9   :  { %7411 = sst [smem:[#allocation61_spill]] %s4782_s14  ;;  %v206_v17 = vadd.f32 %v205_v20, %v202_v38  ;;  %v112_v6 = vadd.f32 %v111_v11, %v108_v18  ;;  %v74_v20 = vpop.permute.xlu0 %73  ;;  %v599_v38 = vadd.f32 %v598_v59, %v595_v44  ;;  %v77_v11 = vpop.permute.xlu1 %76  ;;  %v4971_v59 = vsel %vm39_vm1, 0.0, %v69_v5 }
  0xfa   :  { %s4798_s14 = sld [smem:[#allocation2 + $0x6a]] }
  0xfb   :  { %s4834_s12 = sld [smem:[#allocation2 + $0x6c]] }
  0xfc   :  { %7414 = sst [smem:[#allocation55_spill]] %s4790_s27 }
  0xfd   :  { %s4857_s27 = sld [smem:[#allocation2 + $0x6e]] }
  0xfe   :  { %7423 = sst [smem:[#allocation70_spill]] %s4822_s18 }
  0xff   :  { %s4844_s18 = sld [smem:[#allocation2 + $0x6d]] }
 0x100   :  { %7416 = sst [smem:[#allocation59_spill]] %s4798_s14 }
 0x101   :  { %s4867_s11 = sld [smem:[#allocation2 + $0x6f]] }
 0x102   :  { %s4880_s3 = sld [smem:[#allocation2 + $0x70]] }
 0x103   :  { %s7433_s13 = sld [smem:[#allocation42_spill]] }
 0x104   :  { %s4887_s25 = sld [smem:[#allocation2 + $0x71]] }
 0x105   :  { %s7435_s22 = sld [smem:[#allocation10_spill]] }
 0x106   :  { %s4894_s7 = sld [smem:[#allocation2 + $0x72]] }
 0x107   :  { %s7436_s8 = sld [smem:[#allocation24_spill]] }
 0x108   :  { %7431 = sst [smem:[#allocation71_spill]] %s4880_s3 }
 0x109   :  { %s7438_s3 = sld [smem:[#allocation43_spill]]  ;;  %v7439_v52 = vstv %s7433_s13 }
 0x10a   :  { %7434 = sst [smem:[#allocation22_spill]] %s4887_s25  ;;  %v440_v35 = vmul.f32 %v7439_v52, %v4871_v41 }
 0x10b   :  { %s4905_s25 = sld [smem:[#allocation2 + $0x73]]  ;;  %v7441_v22 = vstv %s7435_s22 }
 0x10c   :  { %s4913_s14 = sld [smem:[#allocation2 + $0x74]]  ;;  %v209_v14 = vmul.f32 %v7441_v22, %v4891_v40  ;;  %v441_v10 = vadd.f32 %v440_v35, %v437_v15  ;;  %v7455_v22 = vstv %s4545_s24 }
 0x10d   :  { %s4923_s26 = sld [smem:[#allocation2 + $0x75]]  ;;  %v7443_v51 = vstv %s7436_s8  ;;  %v4957_v19 = vmul.f32 %v7455_v22, %v4806_v23 }
 0x10e   :  { %v115_v13 = vmul.f32 %v7443_v51, %v4891_v40  ;;  %s7444_s6 = sld [smem:[#allocation11_spill]]  ;;  %v210_v61 = vadd.f32 %v209_v14, %v206_v17 }
 0x10f   :  { %v7445_v39 = vstv %s7438_s3  ;;  %s4933_s13 = sld [smem:[#allocation2 + $0x76]] }
 0x110   :  { %v444_v60 = vmul.f32 %v7445_v39, %v4891_v40  ;;  %s7447_s22 = sld [smem:[#allocation26_spill]]  ;;  %v116_v35 = vadd.f32 %v115_v13, %v112_v6  ;;  %v214_v44 = vadd.f32 %v4571_v21, %v210_v61 }
 0x111   :  { %7437 = sst [smem:[#allocation28_spill]] %s4905_s25 }
 0x112   :  { %7440 = sst [smem:[#allocation31_spill]] %s4913_s14  ;;  %v445_v15 = vadd.f32 %v444_v60, %v441_v10  ;;  %v4984_v10 = vsel %vm38_vm0, 0.0, %v74_v20  ;;  %v120_v48 = vadd.f32 %v4623_v47, %v116_v35  ;;  %v603_v20 = vadd.f32 %v4713_v31, %v599_v38 }
 0x113   :  { %7442 = sst [smem:[#allocation47_spill]] %s4923_s26  ;;  %v7472_v47 = vstv %s7389_s29 }
 0x114   :  { %s4938_s26 = sld [smem:[#allocation2 + $0x77]]  ;;  %v7454_v16 = vstv %s7444_s6  ;;  %v449_v5 = vadd.f32 %v4671_v30, %v445_v15  ;;  %v606_v35 = vmul.f32 %v7472_v47, %v4871_v41  ;;  %v82_v30 = vpop.permute.xlu0 %81 }
 0x115   :  { %7446 = sst [smem:[#allocation6_spill]] %s4933_s13  ;;  %v217_v52 = vmul.f32 %v7454_v16, %v4917_v2  ;;  %v4995_v16 = vsel %vm39_vm1, 0.0, %v77_v11 }
 0x116   :  { %s7449_s8 = sld [smem:[#allocation45_spill]]  ;;  %v7458_v18 = vstv %s7447_s22 }
 0x117   :  { %s7451_s3 = sld [smem:[#allocation12_spill]]  ;;  %v123_v51 = vmul.f32 %v7458_v18, %v4917_v2  ;;  %v218_v22 = vadd.f32 %v217_v52, %v214_v44 }
 0x118   :  { %s4949_s13 = sld [smem:[#allocation2 + $0x78]] }
 0x119   :  { %s7453_s14 = sld [smem:[#allocation27_spill]] }
 0x11a   :  { %7448 = sst [smem:[#allocation19_spill]] %s4938_s26 }
 0x11b   :  { %s7456_s26 = sld [smem:[#allocation46_spill]] }
 0x11c   :  { %s4959_s25 = sld [smem:[#allocation2 + $0x79]]  ;;  %v7459_v39 = vstv %s7449_s8 }
 0x11d   :  { %v452_v14 = vmul.f32 %v7459_v39, %v4917_v2  ;;  %s4967_s30 = sld [smem:[#allocation2 + $0x7a]]  ;;  %v7462_v17 = vstv %s7451_s3  ;;  %v124_v39 = vadd.f32 %v123_v51, %v120_v48  ;;  %v85_v51 = vpop.permute.xlu1 %84 }
 0x11e   :  { %7452 = sst [smem:[#allocation37_spill]] %s4949_s13  ;;  %v221_v13 = vmul.f32 %v7462_v17, %v4942_v43 }
 0x11f   :  { %s7461_s24 = sld [smem:[#allocation13_spill]]  ;;  %v7463_v6 = vstv %s7453_s14  ;;  %v453_v11 = vadd.f32 %v452_v14, %v449_v5 }
 0x120   :  { %s7464_s6 = sld [smem:[#allocation29_spill]]  ;;  %v127_v60 = vmul.f32 %v7463_v6, %v4942_v43  ;;  %v222_v52 = vadd.f32 %v221_v13, %v218_v22 }
 0x121   :  { %s4980_s22 = sld [smem:[#allocation2 + $0x7b]]  ;;  %v7467_v21 = vstv %s7456_s26 }
 0x122   :  { %7457 = sst [smem:[#allocation5_spill]] %s4959_s25  ;;  %v456_v61 = vmul.f32 %v7467_v21, %v4942_v43  ;;  %v128_v5 = vadd.f32 %v127_v60, %v124_v39 }
 0x123   :  { %7460 = sst [smem:[#allocation8_spill]] %s4967_s30 }
 0x124   :  { %s7466_s8 = sld [smem:[#allocation14_spill]]  ;;  %v132_v60 = vadd.f32 %v4628_v50, %v128_v5 }
 0x125   :  { %s7468_s30 = sld [smem:[#allocation48_spill]]  ;;  %v7475_v18 = vstv %s7461_s24 }
 0x126   :  { %s7469_s3 = sld [smem:[#allocation60_spill]]  ;;  %v229_v15 = vmul.f32 %v7475_v18, %v4971_v59  ;;  %v7476_v17 = vstv %s7464_s6  ;;  %v457_v18 = vadd.f32 %v456_v61, %v453_v11 }
 0x127   :  { %7465 = sst [smem:[#allocation18_spill]] %s4980_s22  ;;  %v135_v6 = vmul.f32 %v7476_v17, %v4971_v59  ;;  %v5032_v17 = vsel %vm38_vm0, 0.0, %v82_v30 }
 0x128   :  { %s4991_s25 = sld [smem:[#allocation2 + $0x7c]]  ;;  %v461_v61 = vadd.f32 %v4679_v42, %v457_v18 }
 0x129   :  { %s7471_s14 = sld [smem:[#allocation15_spill]]  ;;  %v136_v18 = vadd.f32 %v135_v6, %v132_v60 }
 0x12a   :  { %s7473_s22 = sld [smem:[#allocation30_spill]]  ;;  %v7478_v31 = vstv %s7466_s8 }
 0x12b   :  { %s5001_s13 = sld [smem:[#allocation2 + $0x7d]]  ;;  %v233_v38 = vmul.f32 %v7478_v31, %v4984_v10  ;;  %v7479_v44 = vstv %s7468_s30  ;;  %v226_v31 = vadd.f32 %v4579_v25, %v222_v52  ;;  %v5052_v25 = vsel %vm39_vm1, 0.0, %v85_v51 }
 0x12c   :  { %s7477_s26 = sld [smem:[#allocation32_spill]]  ;;  %v464_v21 = vmul.f32 %v7479_v44, %v4971_v59  ;;  %v7480_v47 = vstv %s7469_s3 }
 0x12d   :  { %s7481_s29 = sld [smem:[#allocation49_spill]]  ;;  %v610_v54 = vmul.f32 %v7480_v47, %v4891_v40 }
 0x12e   :  { %7470 = sst [smem:[#allocation21_spill]] %s4991_s25 }
 0x12f   :  { %s5009_s25 = sld [smem:[#allocation2 + $0x127]]  ;;  %v7483_v48 = vstv %s7471_s14 }
 0x130   :  { %s7482_s24 = sld [smem:[#allocation51_spill]]  ;;  %v241_v14 = vmul.f32 %v7483_v48, %v4995_v16  ;;  %v7484_v13 = vstv %s7473_s22  ;;  %v607_v48 = vadd.f32 %v606_v35, %v603_v20  ;;  %v230_v20 = vadd.f32 %v229_v15, %v226_v31 }
 0x131   :  { %7474 = sst [smem:[#allocation36_spill]] %s5001_s13  ;;  %v139_v22 = vmul.f32 %v7484_v13, %v4984_v10 }
 0x132   :  { %s5020_s13 = sld [smem:[#allocation2 + $0x7e]]  ;;  %v7488_v44 = vstv %s7477_s26  ;;  %v611_v35 = vadd.f32 %v610_v54, %v607_v48  ;;  %v234_v51 = vadd.f32 %v233_v38, %v230_v20  ;;  %v7505_v48 = vstv %s4542_s1 }
 0x133   :  { %s7485_s6 = sld [smem:[#allocation62_spill]]  ;;  %v147_v47 = vmul.f32 %v7488_v44, %v4995_v16  ;;  %v7491_v39 = vstv %s7481_s29  ;;  %v465_v44 = vadd.f32 %v464_v21, %v461_v61  ;;  %v140_v60 = vadd.f32 %v139_v22, %v136_v18 }
 0x134   :  { %s5028_s8 = sld [smem:[#allocation2 + $0x7f]]  ;;  %v468_v11 = vmul.f32 %v7491_v39, %v4984_v10  ;;  %v615_v54 = vadd.f32 %v4721_v27, %v611_v35  ;;  %v238_v27 = vadd.f32 %v4586_v28, %v234_v51 }
 0x135   :  { %s7487_s30 = sld [smem:[#allocation16_spill]]  ;;  %v144_v22 = vadd.f32 %v4635_v53, %v140_v60 }
 0x136   :  { %s7489_s3 = sld [smem:[#allocation69_spill]]  ;;  %v7493_v30 = vstv %s7482_s24 }
 0x137   :  { %s5038_s14 = sld [smem:[#allocation2 + $0x80]]  ;;  %v476_v13 = vmul.f32 %v7493_v30, %v4995_v16  ;;  %v760_v30 = vmul.f32 %v7505_v48, %v4848_v1  ;;  %v148_v53 = vadd.f32 %v147_v47, %v144_v22  ;;  %v7515_v48 = vstv %s7399_s21 }
 0x138   :  { %s7492_s22 = sld [smem:[#allocation63_spill]]  ;;  %v7522_v22 = vstv %s4684_s28 }
 0x139   :  { %s7495_s26 = sld [smem:[#allocation17_spill]]  ;;  %v7496_v50 = vstv %s7485_s6 }
 0x13a   :  { %7486 = sst [smem:[#allocation7_spill]] %s5028_s8  ;;  %v618_v42 = vmul.f32 %v7496_v50, %v4917_v2 }
 0x13b   :  { %s5048_s8 = sld [smem:[#allocation2 + $0x81]]  ;;  %v7498_v52 = vstv %s7487_s30 }
 0x13c   :  { %v245_v5 = vmul.f32 %v7498_v52, %v5032_v17  ;;  %s7499_s29 = sld [smem:[#allocation33_spill]]  ;;  %v7501_v39 = vstv %s7489_s3  ;;  %v619_v52 = vadd.f32 %v618_v42, %v615_v54 }
 0x13d   :  { %7490 = sst [smem:[#allocation40_spill]] %s5038_s14  ;;  %v753_v9 = vadd.f32 %v4947_v56, %v7501_v39  ;;  %v469_v56 = vadd.f32 %v468_v11, %v465_v44  ;;  %v242_v44 = vadd.f32 %v241_v14, %v238_v27  ;;  %v7519_v27 = vstv %s7400_s9 }
 0x13e   :  { %s5057_s14 = sld [smem:[#allocation2 + $0x82]]  ;;  %v7503_v15 = vstv %s7492_s22 }
 0x13f   :  { %s7500_s24 = sld [smem:[#allocation35_spill]]  ;;  %v622_v31 = vmul.f32 %v7503_v15, %v4942_v43  ;;  %v7506_v6 = vstv %s7495_s26  ;;  %v757_v38 = vadd.f32 %v4755_v34, %v753_v9  ;;  %v473_v11 = vadd.f32 %v4687_v62, %v469_v56 }
 0x140   :  { %s7504_s6 = sld [smem:[#allocation52_spill]]  ;;  %v253_v21 = vmul.f32 %v7506_v6, %v5052_v25  ;;  %v246_v14 = vadd.f32 %v245_v5, %v242_v44  ;;  %v7518_v56 = vstv %s4668_s17 }
 0x141   :  { %7494 = sst [smem:[#allocation20_spill]] %s5048_s8  ;;  %v761_v28 = vadd.f32 %v760_v30, %v757_v38  ;;  %v623_v51 = vadd.f32 %v622_v31, %v619_v52  ;;  %v477_v62 = vadd.f32 %v476_v13, %v473_v11  ;;  %v772_v30 = vmul.f32 %v7515_v48, %v4871_v41 }
 0x142   :  { %s5065_s8 = sld [smem:[#allocation2 + $0x83]]  ;;  %v7509_v61 = vstv %s7499_s29  ;;  %v918_v47 = vmul.f32 %v7518_v56, %v4802_v4  ;;  %v926_v11 = vmul.f32 %v7522_v22, %v4848_v1 }
 0x143   :  { %s5074_s30 = sld [smem:[#allocation2 + $0x84]]  ;;  %v151_v20 = vmul.f32 %v7509_v61, %v5032_v17  ;;  %v765_v15 = vadd.f32 %v4957_v19, %v761_v28  ;;  %v627_v31 = vadd.f32 %v4729_v33, %v623_v51  ;;  %v776_v61 = vmul.f32 %v7519_v27, %v4891_v40 }
 0x144   :  { %7497 = sst [smem:[#allocation39_spill]] %s5057_s14  ;;  %v250_v33 = vadd.f32 %v4594_v32, %v246_v14  ;;  %v7527_v51 = vstv %s4692_s20 }
 0x145   :  { %s7507_s3 = sld [smem:[#allocation53_spill]]  ;;  %v7510_v35 = vstv %s7500_s24  ;;  %v152_v13 = vadd.f32 %v151_v20, %v148_v53  ;;  %v769_v38 = vadd.f32 %v4763_v37, %v765_v15 }
 0x146   :  { %s5080_s14 = sld [smem:[#allocation2 + $0x85]]  ;;  %v159_v50 = vmul.f32 %v7510_v35, %v5052_v25  ;;  %v7511_v34 = vstv %s7504_s6  ;;  %v7521_v35 = vstv %s7410_s23  ;;  %v5142_v32 = vadd.f32 %v253_v21, %v250_v33 }
 0x147   :  { %s5089_s1 = sld [smem:[#allocation2 + $0x86]]  ;;  %v480_v18 = vmul.f32 %v7511_v34, %v5032_v17  ;;  %v919_v52 = vadd.f32 %v918_v47, %v7521_v35  ;;  %v156_v37 = vadd.f32 %v4643_v57, %v152_v13  ;;  %v773_v28 = vadd.f32 %v772_v30, %v769_v38 }
 0x148   :  { %7502 = sst [smem:[#allocation57_spill]] %s5065_s8 }
 0x149   :  { %s7508_s8 = sld [smem:[#allocation64_spill]]  ;;  %v481_v19 = vadd.f32 %v480_v18, %v477_v62  ;;  %v5150_v57 = vadd.f32 %v159_v50, %v156_v37  ;;  %v777_v53 = vadd.f32 %v776_v61, %v773_v28  ;;  %v7530_v62 = vstv %s7401_s2 }
 0x14a   :  { %s7512_s22 = sld [smem:[#allocation65_spill]]  ;;  %v784_v21 = vmul.f32 %v7530_v62, %v4917_v2  ;;  %v942_v61 = vmul.f32 %v941_v0, %v4891_v40 }
 0x14b   :  { %s5096_s26 = sld [smem:[#allocation2 + $0x87]]  ;;  %v7513_v39 = vstv %s7507_s3  ;;  %v485_v20 = vadd.f32 %v4695_v8, %v481_v19  ;;  %v161_v30 = vmax.f32 %v5150_v57, 0.0  ;;  %v781_v14 = vadd.f32 %v4771_v49, %v777_v53 }
 0x14c   :  { %v488_v9 = vmul.f32 %v7513_v39, %v5052_v25  ;;  %s5104_s29 = sld [smem:[#allocation2 + $0x88]]  ;;  %v923_v39 = vadd.f32 %v4819_v26, %v919_v52  ;;  %v255_v26 = vmax.f32 %v5142_v32, 0.0  ;;  %v938_v49 = vmul.f32 %v937_v58, %v4871_v41 }
 0x14d   :  { %s5110_s24 = sld [smem:[#allocation2 + $0x89]]  ;;  %v785_v47 = vadd.f32 %v784_v21, %v781_v14  ;;  %v7542_v52 = vstv %s7405_s10  ;;  %v1095_v21 = vstv %s4867_s11 }
 0x14e   :  { %s5119_s6 = sld [smem:[#allocation2 + $0x8a]]  ;;  %v5161_v15 = vadd.f32 %v488_v9, %v485_v20  ;;  %v927_v50 = vadd.f32 %v926_v11, %v923_v39  ;;  %v800_v22 = vmul.f32 %v7542_v52, %v4984_v10  ;;  %v1091_v39 = vstv %s4857_s27 }
 0x14f   :  { %v7514_v42 = vstv %s7508_s8  ;;  %s7517_s8 = sld [smem:[#allocation66_spill]]  ;;  %v1092_v62 = vmul.f32 %v1091_v39, %v4848_v1  ;;  %v1107_v52 = vstv %s4894_s7 }
 0x150   :  { %v630_v54 = vmul.f32 %v7514_v42, %v4971_v59  ;;  %v7516_v6 = vstv %s7512_s22  ;;  %s5125_s21 = sld [smem:[#allocation2 + $0x8b]]  ;;  %v930_v42 = vmul.f32 %v7527_v51, %v4806_v23  ;;  %v490_v58 = vmax.f32 %v5161_v15, 0.0 }
 0x151   :  { %v634_v60 = vmul.f32 %v7516_v6, %v4984_v10  ;;  %s7520_s3 = sld [smem:[#allocation67_spill]] }
 0x152   :  { %v631_v5 = vadd.f32 %v630_v54, %v627_v31  ;;  %s5133_s17 = sld [smem:[#allocation2 + $0x8c]]  ;;  %v931_v9 = vadd.f32 %v930_v42, %v927_v50  ;;  %v7552_v50 = vstv %s4741_s0 }
 0x153   :  { %s5140_s9 = sld [smem:[#allocation2 + $0x8d]]  ;;  %v954_v14 = vmul.f32 %v7552_v50, %v4942_v43 }
 0x154   :  { %v635_v44 = vadd.f32 %v634_v60, %v631_v5  ;;  %s7526_s23 = sld [smem:[#allocation25_spill]]  ;;  %v5174_v60 = vmul.f32 %v4373_v3, %v957_v63  ;;  %v935_v27 = vadd.f32 %v4832_v12, %v931_v9  ;;  %v7541_v5 = vstv %s7403_s5 }
 0x155   :  { %v7524_v34 = vstv %s7517_s8  ;;  %s5148_s28 = sld [smem:[#allocation2 + $0x8e]]  ;;  %v796_v35 = vmul.f32 %v7541_v5, %v4971_v59 }
 0x156   :  { %v642_v18 = vmul.f32 %v7524_v34, %v4995_v16  ;;  %s7531_s22 = sld [smem:[#allocation50_spill]]  ;;  %v639_v48 = vadd.f32 %v4737_v55, %v635_v44  ;;  %v939_v0 = vadd.f32 %v938_v49, %v935_v27  ;;  %v1083_v34 = vstv %s4834_s12 }
 0x157   :  { %v7529_v8 = vstv %s7520_s3  ;;  %s5158_s8 = sld [smem:[#allocation2 + $0x8f]]  ;;  %v1084_v28 = vmul.f32 %v1083_v34, %v4802_v4  ;;  %v1087_v44 = vstv %s4844_s18 }
 0x158   :  { %7523 = sst [smem:[#allocation9_spill]] %s5133_s17  ;;  %v646_v54 = vmul.f32 %v7529_v8, %v5032_v17  ;;  %v643_v55 = vadd.f32 %v642_v18, %v639_v48  ;;  %v943_v42 = vadd.f32 %v942_v61, %v939_v0 }
 0x159   :  { %7525 = sst [smem:[#allocation58_spill]] %s5140_s9 }
 0x15a   :  { %s7533_s20 = sld [smem:[#allocation68_spill]]  ;;  %v7536_v31 = vstv %s7526_s23  ;;  %v647_v38 = vadd.f32 %v646_v54, %v643_v55  ;;  %v947_v48 = vadd.f32 %v4903_v36, %v943_v42 }
 0x15b   :  { %7528 = sst [smem:[#allocation23_spill]] %s5148_s28  ;;  %v788_v6 = vmul.f32 %v7536_v31, %v4942_v43 }
 0x15c   :  { %s7534_s28 = sld [smem:[#allocation56_spill]]  ;;  %v961_v56 = vstv %s7531_s22  ;;  %v651_v12 = vadd.f32 %v4746_v29, %v647_v38  ;;  %v950_v29 = vmul.f32 %v949_v7, %v4917_v2 }
 0x15d   :  { %7532 = sst [smem:[#allocation42_spill]] %s5158_s8  ;;  %s7537_s8 = smov 127   ;;  %v789_v33 = vadd.f32 %v788_v6, %v785_v47  ;;  %v962_v38 = vmul.f32 %v961_v56, %v4971_v59 }
 0x15e   :  { %s5164_s9 = sld [smem:[#allocation2 + $0x128]]  ;;  %256 = vrot.lane.b32.xlu0 %v255_v26, %s7537_s8  ;;  %162 = vrot.lane.b32.xlu1 %v161_v30, %s7537_s8  ;;  %v951_v47 = vadd.f32 %v950_v29, %v947_v48 }
 0x15f   :  { %s7535_s3 = sld [smem:[#allocation54_spill]]  ;;  %v793_v18 = vadd.f32 %v4779_v24, %v789_v33 }
 0x160   :  { %s5176_s2 = sld [smem:[#allocation2 + $0x90]]  ;;  %v7539_v3 = vstv %s7533_s20 }
 0x161   :  { %s7538_s23 = sld [smem:[#allocation38_spill]]  ;;  %v654_v63 = vmul.f32 %v7539_v3, %v5052_v25  ;;  %v797_v54 = vadd.f32 %v796_v35, %v793_v18  ;;  %v1096_v3 = vmul.f32 %v1095_v21, %v4806_v23 }
 0x162   :  { %s5185_s15 = sld [smem:[#allocation2 + $0x91]]  ;;  %v965_v13 = vstv %s7534_s28  ;;  %491 = vrot.lane.b32.xlu0 %v490_v58, %s7537_s8 }
 0x163   :  { %s7540_s17 = sld [smem:[#allocation70_spill]]  ;;  %v5229_v51 = vadd.f32 %v654_v63, %v651_v12  ;;  %v801_v6 = vadd.f32 %v800_v22, %v797_v54  ;;  %v955_v22 = vadd.f32 %v954_v14, %v951_v47  ;;  %v966_v56 = vmul.f32 %v965_v13, %v4984_v10 }
 0x164   :  { %s5195_s19 = sld [smem:[#allocation2 + $0x92]]  ;;  %v1247_v47 = vstv %s5009_s25 }
 0x165   :  { %v969_v19 = vstv %s7535_s3  ;;  %s5202_s22 = sld [smem:[#allocation2 + $0x93]]  ;;  %v656_v7 = vmax.f32 %v5229_v51, 0.0  ;;  %v805_v61 = vadd.f32 %v4786_v46, %v801_v6  ;;  %v959_v18 = vadd.f32 %v5174_v60, %v955_v22 }
 0x166   :  { %s5213_s28 = sld [smem:[#allocation2 + $0x94]] }
 0x167   :  { %v7543_v11 = vstv %s7538_s23  ;;  %s5221_s16 = sld [smem:[#allocation2 + $0x95]]  ;;  %657 = vrot.lane.b32.xlu1 %v656_v7, %s7537_s8  ;;  %v963_v60 = vadd.f32 %v962_v38, %v959_v18 }
 0x168   :  { %v808_v37 = vmul.f32 %v7543_v11, %v4995_v16  ;;  %s7545_s10 = sld [smem:[#allocation71_spill]] }
 0x169   :  { %v1081_v20 = vstv %s7540_s17  ;;  %s5227_s5 = sld [smem:[#allocation2 + $0x96]]  ;;  %v967_v6 = vadd.f32 %v966_v56, %v963_v60 }
 0x16a   :  { %s7547_s17 = sld [smem:[#allocation41_spill]]  ;;  %v1085_v53 = vadd.f32 %v1084_v28, %v1081_v20  ;;  %v809_v46 = vadd.f32 %v808_v37, %v805_v61 }
 0x16b   :  { %s7548_s23 = sld [smem:[#allocation72_spill]] }
 0x16c   :  { %s5240_s18 = sld [smem:[#allocation2 + $0x97]] }
 0x16d   :  { %7544 = sst [smem:[#allocation10_spill]] %s5221_s16 }
 0x16e   :  { %s7549_s27 = sld [smem:[#allocation44_spill]]  ;;  %v1099_v31 = vstv %s7545_s10 }
 0x16f   :  { %7546 = sst [smem:[#allocation24_spill]] %s5227_s5 }
 0x170   :  { %s7550_s5 = sld [smem:[#allocation22_spill]]  ;;  %v7554_v55 = vstv %s7547_s17 }
 0x171   :  { %v5237_v8 = vld [vmem:[%s7548_s23] sm:$0xff]  ;;  %s5244_s16 = sld [smem:[#allocation2 + $0x98]]  ;;  %v812_v9 = vmul.f32 %v7554_v55, %v5032_v17  ;;  %v5274_v5 = vld [vmem:[%s7548_s23 + $0x8] sm:$0xff]  ;;  %v5321_v14 = vld [vmem:[%s7548_s23 + $0x10] sm:$0xff] }
 0x172   :  { %v1088_v24 = vmul.f32 %v5237_v8, %v1087_v44  ;;  %s5252_s4 = sld [smem:[#allocation2 + $0x99]]  ;;  %v1100_v35 = vmul.f32 %v5274_v5, %v1099_v31  ;;  %v5293_v28 = vld [vmem:[%s7548_s23 + $0x20] sm:$0xff]  ;;  %v1108_v44 = vmul.f32 %v1107_v52, %v4891_v40 }
 0x173   :  { %s7555_s11 = sld [smem:[#allocation61_spill]]  ;;  %v970_v13 = vmul.f32 %v5293_v28, %v969_v19  ;;  %v813_v39 = vadd.f32 %v812_v9, %v809_v46  ;;  %v5311_v19 = vld [vmem:[%s7548_s23 + $0x28] sm:$0xff] }
 0x174   :  { %v1089_v49 = vadd.f32 %v1088_v24, %v1085_v53  ;;  %s5258_s12 = sld [smem:[#allocation2 + $0x9a]]  ;;  %v7558_v36 = vstv %s7549_s27 }
 0x175   :  { %s7557_s20 = sld [smem:[#allocation55_spill]]  ;;  %v820_v63 = vmul.f32 %v7558_v36, %v5052_v25  ;;  %v817_v21 = vadd.f32 %v4794_v45, %v813_v39  ;;  %v971_v38 = vadd.f32 %v970_v13, %v967_v6 }
 0x176   :  { %s7559_s0 = sld [smem:[#allocation59_spill]]  ;;  %v1103_v27 = vstv %s7550_s5  ;;  %v1093_v33 = vadd.f32 %v1092_v62, %v1089_v49 }
 0x177   :  { %7551 = sst [smem:[#allocation43_spill]] %s5244_s16  ;;  %v1104_v34 = vmul.f32 %v1103_v27, %v4871_v41  ;;  %v5331_v49 = vadd.f32 %v820_v63, %v817_v21  ;;  %v1249_v27 = vstv %s5020_s13 }
 0x178   :  { %7553 = sst [smem:[#allocation11_spill]] %s5252_s4  ;;  %v1097_v20 = vadd.f32 %v1096_v3, %v1093_v33  ;;  %v1250_v63 = vmul.f32 %v1249_v27, %v4802_v4 }
 0x179   :  { %s5268_s10 = sld [smem:[#allocation2 + $0x9b]]  ;;  %v973_v11 = vstv %s7555_s11 }
 0x17a   :  { %7556 = sst [smem:[#allocation26_spill]] %s5258_s12  ;;  %v1101_v42 = vadd.f32 %v1100_v35, %v1097_v20  ;;  %v974_v54 = vmul.f32 %v973_v11, %v4995_v16  ;;  %v822_v35 = vmax.f32 %v5331_v49, 0.0  ;;  %v5350_v11 = vld [vmem:[%s7548_s23 + $0x18] sm:$0xff]  ;;  %v1251_v18 = vadd.f32 %v1250_v63, %v1247_v47 }
 0x17b   :  { %s7561_s27 = sld [smem:[#allocation28_spill]]  ;;  %v977_v12 = vstv %s7557_s20 }
 0x17c   :  { %s5278_s4 = sld [smem:[#allocation2 + $0x9c]]  ;;  %v981_v0 = vstv %s7559_s0  ;;  %v978_v53 = vmul.f32 %v977_v12, %v5032_v17  ;;  %v1105_v50 = vadd.f32 %v1104_v34, %v1101_v42  ;;  %v975_v56 = vadd.f32 %v974_v54, %v971_v38  ;;  %823 = vrot.lane.b32.xlu0 %v822_v35, %s7537_s8 }
 0x17d   :  { %s7563_s5 = sld [smem:[#allocation31_spill]]  ;;  %v982_v62 = vmul.f32 %v5311_v19, %v981_v0 }
 0x17e   :  { %s5283_s16 = sld [smem:[#allocation2 + $0x9d]]  ;;  %v1109_v3 = vadd.f32 %v1108_v44, %v1105_v50  ;;  %v979_v44 = vadd.f32 %v978_v53, %v975_v56 }
 0x17f   :  { %7560 = sst [smem:[#allocation45_spill]] %s5268_s10 }
 0x180   :  { %s7564_s10 = sld [smem:[#allocation47_spill]]  ;;  %v983_v53 = vadd.f32 %v982_v62, %v979_v44  ;;  %v1273_v62 = vstv %s5074_s30 }
 0x181   :  { %s5287_s12 = sld [smem:[#allocation2 + $0x9e]]  ;;  %v1111_v37 = vstv %s7561_s27 }
 0x182   :  { %7562 = sst [smem:[#allocation12_spill]] %s5278_s4  ;;  %v1112_v31 = vmul.f32 %v5321_v14, %v1111_v37 }
 0x183   :  { %s7567_s11 = sld [smem:[#allocation34_spill]]  ;;  %v1115_v29 = vstv %s7563_s5 }
 0x184   :  { %7565 = sst [smem:[#allocation27_spill]] %s5283_s16  ;;  %v1116_v55 = vmul.f32 %v1115_v29, %v4917_v2  ;;  %v1113_v52 = vadd.f32 %v1112_v31, %v1109_v3 }
 0x185   :  { %s5300_s20 = sld [smem:[#allocation2 + $0x9f]] }
 0x186   :  { %v1119_v24 = vstv %s7564_s10  ;;  %s5304_s0 = sld [smem:[#allocation2 + $0xa0]]  ;;  %v1117_v20 = vadd.f32 %v1116_v55, %v1113_v52  ;;  %v1281_v52 = vstv %s5089_s1 }
 0x187   :  { %7566 = sst [smem:[#allocation46_spill]] %s5287_s12  ;;  %v1120_v9 = vmul.f32 %v1119_v24, %v4942_v43  ;;  %v1282_v44 = vmul.f32 %v1281_v52, %v4917_v2 }
 0x188   :  { %s7570_s12 = sld [smem:[#allocation6_spill]] }
 0x189   :  { %s7571_s27 = sld [smem:[#allocation19_spill]]  ;;  %v985_v48 = vstv %s7567_s11  ;;  %v1121_v29 = vadd.f32 %v1120_v9, %v1117_v20 }
 0x18a   :  { %s5314_s17 = sld [smem:[#allocation2 + $0xa1]]  ;;  %v986_v37 = vmul.f32 %v985_v48, %v5052_v25 }
 0x18b   :  { %7568 = sst [smem:[#allocation13_spill]] %s5300_s20 }
 0x18c   :  { %7569 = sst [smem:[#allocation29_spill]] %s5304_s0 }
 0x18d   :  { %s7573_s0 = sld [smem:[#allocation7_spill]] }
 0x18e   :  { %s7574_s3 = sld [smem:[#allocation40_spill]]  ;;  %v1123_v45 = vstv %s7570_s12 }
 0x18f   :  { %s5324_s7 = sld [smem:[#allocation2 + $0x129]]  ;;  %v1127_v36 = vstv %s7571_s27  ;;  %v1124_v12 = vmul.f32 %v5350_v11, %v1123_v45  ;;  %v5382_v45 = vadd.f32 %v986_v37, %v983_v53  ;;  %v1285_v37 = vstv %s5096_s26 }
 0x190   :  { %7572 = sst [smem:[#allocation14_spill]] %s5314_s17  ;;  %v1128_v39 = vmul.f32 %v1127_v36, %v4971_v59 }
 0x191   :  { %s5329_s11 = sld [smem:[#allocation2 + $0xa2]]  ;;  %v1125_v31 = vadd.f32 %v1124_v12, %v1121_v29  ;;  %v1274_v12 = vmul.f32 %v1273_v62, %v4891_v40  ;;  %v1415_v29 = vstv %s5176_s2 }
 0x192   :  { %s7575_s10 = sld [smem:[#allocation37_spill]]  ;;  %v1416_v53 = vmul.f32 %v1415_v29, %v4802_v4 }
 0x193   :  { %s7576_s5 = sld [smem:[#allocation20_spill]]  ;;  %v1253_v61 = vstv %s7573_s0  ;;  %v1129_v47 = vadd.f32 %v1128_v39, %v1125_v31  ;;  %v1289_v39 = vstv %s5104_s29  ;;  %v1423_v31 = vstv %s5195_s19 }
 0x194   :  { %s5335_s17 = sld [smem:[#allocation2 + $0xa3]]  ;;  %v1257_v33 = vstv %s7574_s3  ;;  %v1254_v22 = vmul.f32 %v5237_v8, %v1253_v61  ;;  %v1277_v61 = vstv %s5080_s14  ;;  %v1290_v62 = vmul.f32 %v5350_v11, %v1289_v39 }
 0x195   :  { %s7577_s20 = sld [smem:[#allocation5_spill]]  ;;  %v1258_v13 = vmul.f32 %v1257_v33, %v4848_v1  ;;  %v988_v33 = vmax.f32 %v5382_v45, 0.0 }
 0x196   :  { %s5340_s16 = sld [smem:[#allocation2 + $0xa4]]  ;;  %v1255_v60 = vadd.f32 %v1254_v22, %v1251_v18 }
 0x197   :  { %s5345_s12 = sld [smem:[#allocation2 + $0xa5]]  ;;  %989 = vrot.lane.b32.xlu1 %v988_v33, %s7537_s8 }
 0x198   :  { %s7578_s25 = sld [smem:[#allocation39_spill]]  ;;  %v1131_v46 = vstv %s7575_s10  ;;  %v1259_v55 = vadd.f32 %v1258_v13, %v1255_v60 }
 0x199   :  { %v1261_v0 = vstv %s7576_s5  ;;  %s5355_s13 = sld [smem:[#allocation2 + $0xa6]]  ;;  %v1132_v24 = vmul.f32 %v1131_v46, %v4984_v10 }
 0x19a   :  { %s7579_s0 = sld [smem:[#allocation8_spill]]  ;;  %v1262_v54 = vmul.f32 %v1261_v0, %v4806_v23 }
 0x19b   :  { %v1135_v34 = vstv %s7577_s20  ;;  %s7580_s3 = sld [smem:[#allocation57_spill]]  ;;  %v1133_v63 = vadd.f32 %v1132_v24, %v1129_v47  ;;  %v1419_v24 = vstv %s5185_s15  ;;  %v1297_v47 = vstv %s5119_s6 }
 0x19c   :  { %s5362_s4 = sld [smem:[#allocation2 + $0xa7]]  ;;  %v1136_v21 = vmul.f32 %v5293_v28, %v1135_v34  ;;  %v1263_v38 = vadd.f32 %v1262_v54, %v1259_v55  ;;  %v1278_v34 = vmul.f32 %v5321_v14, %v1277_v61 }
 0x19d   :  { %s7581_s27 = sld [smem:[#allocation18_spill]] }
 0x19e   :  { %v1265_v42 = vstv %s7578_s25  ;;  %s5367_s10 = sld [smem:[#allocation2 + $0xa8]]  ;;  %v1137_v18 = vadd.f32 %v1136_v21, %v1133_v63  ;;  %v1420_v21 = vmul.f32 %v5237_v8, %v1419_v24 }
 0x19f   :  { %s7583_s5 = sld [smem:[#allocation21_spill]]  ;;  %v1266_v9 = vmul.f32 %v5274_v5, %v1265_v42  ;;  %v1413_v42 = vstv %s5164_s9 }
 0x1a0   :  { %s7584_s20 = sld [smem:[#allocation36_spill]]  ;;  %v1139_v48 = vstv %s7579_s0 }
 0x1a1   :  { %s5371_s23 = sld [smem:[#allocation2 + $0xa9]]  ;;  %v1269_v50 = vstv %s7580_s3  ;;  %v1140_v22 = vmul.f32 %v1139_v48, %v4995_v16  ;;  %v1267_v56 = vadd.f32 %v1266_v9, %v1263_v38  ;;  %v1286_v48 = vmul.f32 %v1285_v37, %v4942_v43 }
 0x1a2   :  { %s5376_s25 = sld [smem:[#allocation2 + $0xaa]]  ;;  %v1270_v27 = vmul.f32 %v1269_v50, %v4871_v41  ;;  %v1293_v50 = vstv %s5110_s24  ;;  %v1431_v38 = vstv %s5213_s28 }
 0x1a3   :  { %v1143_v6 = vstv %s7581_s27  ;;  %s5391_s0 = sld [smem:[#allocation2 + $0xad]]  ;;  %v1141_v60 = vadd.f32 %v1140_v22, %v1137_v18  ;;  %v1294_v22 = vmul.f32 %v1293_v50, %v4971_v59 }
 0x1a4   :  { %7582 = sst [smem:[#allocation48_spill]] %s5367_s10  ;;  %v1144_v46 = vmul.f32 %v1143_v6, %v5032_v17  ;;  %v1271_v13 = vadd.f32 %v1270_v27, %v1267_v56  ;;  %v1427_v6 = vstv %s5202_s22  ;;  %v1301_v56 = vstv %s5125_s21 }
 0x1a5   :  { %s5380_s10 = sld [smem:[#allocation2 + $0xab]]  ;;  %v1147_v3 = vstv %s7583_s5  ;;  %v1428_v63 = vmul.f32 %v1427_v6, %v4806_v23 }
 0x1a6   :  { %v1151_v36 = vstv %s7584_s20  ;;  %s5395_s3 = sld [smem:[#allocation2 + $0xae]]  ;;  %v1148_v0 = vmul.f32 %v5311_v19, %v1147_v3  ;;  %v1275_v54 = vadd.f32 %v1274_v12, %v1271_v13  ;;  %v1145_v55 = vadd.f32 %v1144_v46, %v1141_v60 }
 0x1a7   :  { %7585 = sst [smem:[#allocation60_spill]] %s5371_s23  ;;  %v1152_v20 = vmul.f32 %v1151_v36, %v5052_v25  ;;  %v1417_v3 = vadd.f32 %v1416_v53, %v1413_v42  ;;  %v1424_v36 = vmul.f32 %v1423_v31, %v4848_v1  ;;  %v1432_v13 = vmul.f32 %v5274_v5, %v1431_v38 }
 0x1a8   :  { %s5387_s23 = sld [smem:[#allocation2 + $0xac]]  ;;  %v1279_v9 = vadd.f32 %v1278_v34, %v1275_v54  ;;  %v1149_v27 = vadd.f32 %v1148_v0, %v1145_v55  ;;  %v1302_v54 = vmul.f32 %v5293_v28, %v1301_v56  ;;  %v1589_v56 = vstv %s5340_s16 }
 0x1a9   :  { %s5399_s30 = sld [smem:[#allocation2 + $0xaf]]  ;;  %v1421_v52 = vadd.f32 %v1420_v21, %v1417_v3  ;;  %v1443_v21 = vstv %s5240_s18 }
 0x1aa   :  { %s5408_s14 = sld [smem:[#allocation2 + $0xb0]]  ;;  %v1283_v61 = vadd.f32 %v1282_v44, %v1279_v9  ;;  %v5447_v34 = vadd.f32 %v1152_v20, %v1149_v27  ;;  %v1298_v44 = vmul.f32 %v1297_v47, %v4984_v10  ;;  %v1444_v27 = vmul.f32 %v5321_v14, %v1443_v21 }
 0x1ab   :  { %s5412_s1 = sld [smem:[#allocation2 + $0xb1]]  ;;  %v1425_v0 = vadd.f32 %v1424_v36, %v1421_v52  ;;  %v1579_v52 = vstv %s5324_s7 }
 0x1ac   :  { %s5418_s27 = sld [smem:[#allocation2 + $0xb2]]  ;;  %v1287_v18 = vadd.f32 %v1286_v48, %v1283_v61  ;;  %v1154_v29 = vmax.f32 %v5447_v34, 0.0 }
 0x1ad   :  { %s5422_s5 = sld [smem:[#allocation2 + $0xb3]]  ;;  %v1429_v24 = vadd.f32 %v1428_v63, %v1425_v0  ;;  %v1581_v63 = vstv %s5329_s11 }
 0x1ae   :  { %s5428_s26 = sld [smem:[#allocation2 + $0x12a]]  ;;  %v1291_v20 = vadd.f32 %v1290_v62, %v1287_v18  ;;  %1155 = vrot.lane.b32.xlu0 %v1154_v29, %s7537_s8  ;;  %v1582_v18 = vmul.f32 %v1581_v63, %v4802_v4 }
 0x1af   :  { %s7589_s29 = sld [smem:[#allocation9_spill]]  ;;  %v1433_v6 = vadd.f32 %v1432_v13, %v1429_v24 }
 0x1b0   :  { %s7590_s9 = sld [smem:[#allocation10_spill]]  ;;  %v1295_v50 = vadd.f32 %v1294_v22, %v1291_v20  ;;  %v1585_v22 = vstv %s5335_s17  ;;  %v1583_v24 = vadd.f32 %v1582_v18, %v1579_v52 }
 0x1b1   :  { %7586 = sst [smem:[#allocation15_spill]] %s5412_s1  ;;  %v1586_v0 = vmul.f32 %v5237_v8, %v1585_v22 }
 0x1b2   :  { %7587 = sst [smem:[#allocation30_spill]] %s5418_s27  ;;  %v1299_v47 = vadd.f32 %v1298_v44, %v1295_v50  ;;  %v1601_v50 = vstv %s5362_s4 }
 0x1b3   :  { %7588 = sst [smem:[#allocation32_spill]] %s5422_s5 }
 0x1b4   :  { %s5431_s2 = sld [smem:[#allocation2 + $0xb4]] }
 0x1b5   :  { %s5436_s15 = sld [smem:[#allocation2 + $0xb5]]  ;;  %v1305_v12 = vstv %s7589_s29 }
 0x1b6   :  { %s7591_s24 = sld [smem:[#allocation58_spill]]  ;;  %v1435_v46 = vstv %s7590_s9  ;;  %v1306_v53 = vmul.f32 %v1305_v12, %v4995_v16  ;;  %v1303_v12 = vadd.f32 %v1302_v54, %v1299_v47 }
 0x1b7   :  { %s7592_s19 = sld [smem:[#allocation23_spill]]  ;;  %v1436_v60 = vmul.f32 %v1435_v46, %v4871_v41 }
 0x1b8   :  { %s7593_s22 = sld [smem:[#allocation24_spill]] }
 0x1b9   :  { %s5439_s20 = sld [smem:[#allocation2 + $0xb6]]  ;;  %v1437_v38 = vadd.f32 %v1436_v60, %v1433_v6  ;;  %v1590_v60 = vmul.f32 %v1589_v56, %v4848_v1  ;;  %v1602_v56 = vmul.f32 %v1601_v50, %v4871_v41  ;;  %v1617_v50 = vstv %s5380_s10 }
 0x1ba   :  { %s5445_s5 = sld [smem:[#allocation2 + $0xb7]] }
 0x1bb   :  { %s7594_s6 = sld [smem:[#allocation43_spill]] }
 0x1bc   :  { %s5450_s28 = sld [smem:[#allocation2 + $0xb8]]  ;;  %v1309_v37 = vstv %s7591_s24 }
 0x1bd   :  { %s7595_s27 = sld [smem:[#allocation42_spill]]  ;;  %v1313_v39 = vstv %s7592_s19  ;;  %v1310_v9 = vmul.f32 %v1309_v37, %v5032_v17 }
 0x1be   :  { %v1439_v42 = vstv %s7593_s22  ;;  %s5456_s21 = sld [smem:[#allocation2 + $0xb9]]  ;;  %v1314_v3 = vmul.f32 %v5311_v19, %v1313_v39  ;;  %v1593_v39 = vstv %s5345_s12 }
 0x1bf   :  { %s7596_s29 = sld [smem:[#allocation11_spill]]  ;;  %v1440_v55 = vmul.f32 %v1439_v42, %v4891_v40  ;;  %v1307_v42 = vadd.f32 %v1306_v53, %v1303_v12  ;;  %v1587_v53 = vadd.f32 %v1586_v0, %v1583_v24 }
 0x1c0   :  { %s7597_s9 = sld [smem:[#allocation26_spill]] }
 0x1c1   :  { %s5460_s1 = sld [smem:[#allocation2 + $0xba]]  ;;  %v1447_v48 = vstv %s7594_s6  ;;  %v1441_v46 = vadd.f32 %v1440_v55, %v1437_v38  ;;  %v1594_v55 = vmul.f32 %v1593_v39, %v4806_v23  ;;  %v1591_v63 = vadd.f32 %v1590_v60, %v1587_v53 }
 0x1c2   :  { %s5466_s24 = sld [smem:[#allocation2 + $0xbb]]  ;;  %v1448_v61 = vmul.f32 %v1447_v48, %v4917_v2  ;;  %v1597_v48 = vstv %s5355_s13 }
 0x1c3   :  { %v1317_v31 = vstv %s7595_s27  ;;  %s5473_s19 = sld [smem:[#allocation2 + $0xbc]]  ;;  %v1445_v20 = vadd.f32 %v1444_v27, %v1441_v46 }
 0x1c4   :  { %s5479_s18 = sld [smem:[#allocation2 + $0xbd]]  ;;  %v1318_v13 = vmul.f32 %v1317_v31, %v5052_v25  ;;  %v1311_v31 = vadd.f32 %v1310_v9, %v1307_v42  ;;  %v1598_v9 = vmul.f32 %v5274_v5, %v1597_v48  ;;  %v1613_v42 = vstv %s5376_s25 }
 0x1c5   :  { %v1451_v36 = vstv %s7596_s29  ;;  %s7598_s22 = sld [smem:[#allocation45_spill]]  ;;  %v1449_v6 = vadd.f32 %v1448_v61, %v1445_v20  ;;  %v1614_v53 = vmul.f32 %v1613_v42, %v4917_v2 }
 0x1c6   :  { %v1455_v62 = vstv %s7597_s9  ;;  %s5483_s27 = sld [smem:[#allocation2 + $0xbe]]  ;;  %v1452_v44 = vmul.f32 %v1451_v36, %v4942_v43  ;;  %v1315_v27 = vadd.f32 %v1314_v3, %v1311_v31  ;;  %v1595_v3 = vadd.f32 %v1594_v55, %v1591_v63 }
 0x1c7   :  { %s5489_s6 = sld [smem:[#allocation2 + $0xbf]]  ;;  %v1456_v54 = vmul.f32 %v5350_v11, %v1455_v62  ;;  %v1621_v55 = vstv %s5387_s23 }
 0x1c8   :  { %s7600_s29 = sld [smem:[#allocation12_spill]]  ;;  %v1453_v52 = vadd.f32 %v1452_v44, %v1449_v6  ;;  %v5528_v46 = vadd.f32 %v1318_v13, %v1315_v27  ;;  %v1599_v24 = vadd.f32 %v1598_v9, %v1595_v3  ;;  %v1622_v42 = vmul.f32 %v5350_v11, %v1621_v55 }
 0x1c9   :  { %s5493_s9 = sld [smem:[#allocation2 + $0xc0]] }
 0x1ca   :  { %s5499_s16 = sld [smem:[#allocation2 + $0xc1]]  ;;  %v1457_v18 = vadd.f32 %v1456_v54, %v1453_v52  ;;  %v1320_v13 = vmax.f32 %v5528_v46, 0.0  ;;  %v1603_v6 = vadd.f32 %v1602_v56, %v1599_v24  ;;  %v1625_v56 = vstv %s5391_s0 }
 0x1cb   :  { %v1459_v37 = vstv %s7598_s22  ;;  %s7603_s17 = sld [smem:[#allocation27_spill]]  ;;  %v1763_v24 = vstv %s5450_s28 }
 0x1cc   :  { %s7604_s7 = sld [smem:[#allocation46_spill]]  ;;  %v1460_v36 = vmul.f32 %v1459_v37, %v4971_v59  ;;  %1321 = vrot.lane.b32.xlu1 %v1320_v13, %s7537_s8 }
 0x1cd   :  { %7599 = sst [smem:[#allocation49_spill]] %s5489_s6 }
 0x1ce   :  { %s7605_s11 = sld [smem:[#allocation13_spill]]  ;;  %v1463_v21 = vstv %s7600_s29  ;;  %v1461_v20 = vadd.f32 %v1460_v36, %v1457_v18  ;;  %v1745_v36 = vstv %s5428_s26 }
 0x1cf   :  { %7601 = sst [smem:[#allocation51_spill]] %s5493_s9  ;;  %v1464_v61 = vmul.f32 %v1463_v21, %v4984_v10 }
 0x1d0   :  { %7602 = sst [smem:[#allocation62_spill]] %s5499_s16 }
 0x1d1   :  { %s5502_s6 = sld [smem:[#allocation2 + $0xc2]]  ;;  %v1467_v47 = vstv %s7603_s17  ;;  %v1465_v31 = vadd.f32 %v1464_v61, %v1461_v20  ;;  %v1629_v20 = vstv %s5395_s3 }
 0x1d2   :  { %s5508_s9 = sld [smem:[#allocation2 + $0xc3]]  ;;  %v1471_v38 = vstv %s7604_s7  ;;  %v1468_v44 = vmul.f32 %v5293_v28, %v1467_v47  ;;  %v1747_v47 = vstv %s5431_s2 }
 0x1d3   :  { %s7607_s12 = sld [smem:[#allocation29_spill]]  ;;  %v1472_v37 = vmul.f32 %v1471_v38, %v4995_v16  ;;  %v1751_v38 = vstv %s5436_s15  ;;  %v1748_v63 = vmul.f32 %v1747_v47, %v4802_v4 }
 0x1d4   :  { %s7608_s22 = sld [smem:[#allocation48_spill]]  ;;  %v1475_v62 = vstv %s7605_s11  ;;  %v1469_v27 = vadd.f32 %v1468_v44, %v1465_v31  ;;  %v1752_v9 = vmul.f32 %v5237_v8, %v1751_v38  ;;  %v1626_v31 = vmul.f32 %v1625_v56, %v4971_v59 }
 0x1d5   :  { %s5511_s16 = sld [smem:[#allocation2 + $0xc4]]  ;;  %v1476_v39 = vmul.f32 %v1475_v62, %v5032_v17  ;;  %v1755_v62 = vstv %s5439_s20 }
 0x1d6   :  { %s5517_s29 = sld [smem:[#allocation2 + $0xc5]]  ;;  %v1473_v18 = vadd.f32 %v1472_v37, %v1469_v27  ;;  %v1756_v44 = vmul.f32 %v1755_v62, %v4848_v1 }
 0x1d7   :  { %7606 = sst [smem:[#allocation16_spill]] %s5502_s6 }
 0x1d8   :  { %s7609_s6 = sld [smem:[#allocation60_spill]] }
 0x1d9   :  { %s5520_s13 = sld [smem:[#allocation2 + $0x12b]]  ;;  %v1479_v22 = vstv %s7607_s12 }
 0x1da   :  { %v1605_v12 = vstv %s7608_s22  ;;  %s5526_s4 = sld [smem:[#allocation2 + $0xc6]]  ;;  %v1480_v54 = vmul.f32 %v5311_v19, %v1479_v22  ;;  %v1618_v22 = vmul.f32 %v1617_v50, %v4942_v43 }
 0x1db   :  { %s7610_s17 = sld [smem:[#allocation14_spill]]  ;;  %v1606_v60 = vmul.f32 %v1605_v12, %v4891_v40  ;;  %v1759_v12 = vstv %s5445_s5 }
 0x1dc   :  { %s5531_s7 = sld [smem:[#allocation2 + $0xc7]] }
 0x1dd   :  { %s5537_s11 = sld [smem:[#allocation2 + $0xc8]]  ;;  %v1607_v52 = vadd.f32 %v1606_v60, %v1603_v6  ;;  %v1767_v60 = vstv %s5456_s21  ;;  %v1633_v6 = vstv %s5399_s30 }
 0x1de   :  { %v1609_v0 = vstv %s7609_s6  ;;  %s5541_s6 = sld [smem:[#allocation2 + $0xc9]] }
 0x1df   :  { %v1610_v48 = vmul.f32 %v5321_v14, %v1609_v0  ;;  %s5547_s25 = sld [smem:[#allocation2 + $0xca]]  ;;  %v1749_v0 = vadd.f32 %v1748_v63, %v1745_v36  ;;  %v1637_v36 = vstv %s5408_s14  ;;  %v1771_v63 = vstv %s5460_s1 }
 0x1e0   :  { %s5554_s12 = sld [smem:[#allocation2 + $0xcb]] }
 0x1e1   :  { %v1483_v21 = vstv %s7610_s17  ;;  %s5560_s10 = sld [smem:[#allocation2 + $0xcc]]  ;;  %v1611_v3 = vadd.f32 %v1610_v48, %v1607_v52  ;;  %v1753_v37 = vadd.f32 %v1752_v9, %v1749_v0  ;;  %v1760_v48 = vmul.f32 %v1759_v12, %v4806_v23 }
 0x1e2   :  { %s5564_s22 = sld [smem:[#allocation2 + $0xcd]]  ;;  %v1484_v61 = vmul.f32 %v1483_v21, %v5052_v25  ;;  %v1477_v21 = vadd.f32 %v1476_v39, %v1473_v18  ;;  %v1764_v39 = vmul.f32 %v5274_v5, %v1763_v24  ;;  %v1768_v52 = vmul.f32 %v1767_v60, %v4871_v41 }
 0x1e3   :  { %s5570_s23 = sld [smem:[#allocation2 + $0xce]]  ;;  %v1615_v50 = vadd.f32 %v1614_v53, %v1611_v3  ;;  %v1757_v62 = vadd.f32 %v1756_v44, %v1753_v37  ;;  %v1630_v53 = vmul.f32 %v1629_v20, %v4984_v10  ;;  %v1634_v12 = vmul.f32 %v5293_v28, %v1633_v6 }
 0x1e4   :  { %s7611_s26 = sld [smem:[#allocation15_spill]]  ;;  %v1481_v47 = vadd.f32 %v1480_v54, %v1477_v21  ;;  %v1638_v18 = vmul.f32 %v1637_v36, %v4995_v16  ;;  %v1779_v0 = vstv %s5473_s19  ;;  %v1772_v20 = vmul.f32 %v1771_v63, %v4891_v40 }
 0x1e5   :  { %s5573_s2 = sld [smem:[#allocation2 + $0xcf]]  ;;  %v1619_v38 = vadd.f32 %v1618_v22, %v1615_v50  ;;  %v1761_v54 = vadd.f32 %v1760_v48, %v1757_v62  ;;  %v1775_v22 = vstv %s5466_s24  ;;  %v1783_v50 = vstv %s5479_s18 }
 0x1e6   :  { %s5579_s15 = sld [smem:[#allocation2 + $0xd0]]  ;;  %v5599_v9 = vadd.f32 %v1484_v61, %v1481_v47  ;;  %v1776_v21 = vmul.f32 %v5321_v14, %v1775_v22  ;;  %v1787_v6 = vstv %s5483_s27  ;;  %v1911_v36 = vstv %s5520_s13 }
 0x1e7   :  { %s7612_s0 = sld [smem:[#allocation30_spill]]  ;;  %v1623_v56 = vadd.f32 %v1622_v42, %v1619_v38  ;;  %v1765_v42 = vadd.f32 %v1764_v39, %v1761_v54  ;;  %v1917_v47 = vstv %s5531_s7  ;;  %v1921_v38 = vstv %s5537_s11 }
 0x1e8   :  { %s5582_s5 = sld [smem:[#allocation2 + $0xd1]]  ;;  %v1486_v61 = vmax.f32 %v5599_v9, 0.0  ;;  %v1784_v63 = vmul.f32 %v1783_v50, %v4942_v43  ;;  %v1925_v54 = vstv %s5541_s6 }
 0x1e9   :  { %s5588_s3 = sld [smem:[#allocation2 + $0xd2]]  ;;  %v1627_v44 = vadd.f32 %v1626_v31, %v1623_v56  ;;  %v1769_v48 = vadd.f32 %v1768_v52, %v1765_v42  ;;  %v1780_v31 = vmul.f32 %v1779_v0, %v4917_v2  ;;  %v1788_v42 = vmul.f32 %v5350_v11, %v1787_v6 }
 0x1ea   :  { %v1641_v55 = vstv %s7611_s26  ;;  %s5591_s20 = sld [smem:[#allocation2 + $0xd3]]  ;;  %1487 = vrot.lane.b32.xlu0 %v1486_v61, %s7537_s8  ;;  %v1807_v6 = vstv %s5508_s9 }
 0x1eb   :  { %s5597_s30 = sld [smem:[#allocation2 + $0xd4]]  ;;  %v1642_v3 = vmul.f32 %v1641_v55, %v5032_v17  ;;  %v1631_v37 = vadd.f32 %v1630_v53, %v1627_v44  ;;  %v1913_v55 = vstv %s5526_s4  ;;  %v1773_v39 = vadd.f32 %v1772_v20, %v1769_v48 }
 0x1ec   :  { %s7613_s14 = sld [smem:[#allocation32_spill]]  ;;  %v1914_v53 = vmul.f32 %v1913_v55, %v4802_v4  ;;  %v1922_v44 = vmul.f32 %v1921_v38, %v4848_v1 }
 0x1ed   :  { %v1645_v27 = vstv %s7612_s0  ;;  %s5602_s28 = sld [smem:[#allocation2 + $0xd5]]  ;;  %v1635_v62 = vadd.f32 %v1634_v12, %v1631_v37  ;;  %v1777_v12 = vadd.f32 %v1776_v21, %v1773_v39  ;;  %v1933_v37 = vstv %s5554_s12 }
 0x1ee   :  { %s5608_s1 = sld [smem:[#allocation2 + $0xd6]]  ;;  %v1646_v24 = vmul.f32 %v5311_v19, %v1645_v27  ;;  %v1918_v27 = vmul.f32 %v5237_v8, %v1917_v47  ;;  %v1915_v0 = vadd.f32 %v1914_v53, %v1911_v36  ;;  %v1926_v21 = vmul.f32 %v1925_v54, %v4806_v23 }
 0x1ef   :  { %s5612_s21 = sld [smem:[#allocation2 + $0xd7]]  ;;  %v1639_v22 = vadd.f32 %v1638_v18, %v1635_v62  ;;  %v1781_v48 = vadd.f32 %v1780_v31, %v1777_v12  ;;  %v1811_v53 = vstv %s5511_s16 }
 0x1f0   :  { %s5618_s24 = sld [smem:[#allocation2 + $0x12c]]  ;;  %v1919_v18 = vadd.f32 %v1918_v27, %v1915_v0  ;;  %v1934_v27 = vmul.f32 %v1933_v37, %v4871_v41 }
 0x1f1   :  { %s7614_s19 = sld [smem:[#allocation49_spill]]  ;;  %v1643_v50 = vadd.f32 %v1642_v3, %v1639_v22  ;;  %v1785_v62 = vadd.f32 %v1784_v63, %v1781_v48  ;;  %v1941_v63 = vstv %s5564_s22  ;;  %v1815_v48 = vstv %s5517_s29 }
 0x1f2   :  { %v1649_v60 = vstv %s7613_s14  ;;  %s5625_s17 = sld [smem:[#allocation2 + $0xd8]]  ;;  %v1923_v39 = vadd.f32 %v1922_v44, %v1919_v18  ;;  %v1808_v44 = vmul.f32 %v1807_v6, %v5032_v17  ;;  %v1942_v18 = vmul.f32 %v5321_v14, %v1941_v63 }
 0x1f3   :  { %s5631_s18 = sld [smem:[#allocation2 + $0xd9]]  ;;  %v1650_v52 = vmul.f32 %v1649_v60, %v5052_v25  ;;  %v1929_v60 = vstv %s5547_s25  ;;  %v1647_v38 = vadd.f32 %v1646_v24, %v1643_v50  ;;  %v1789_v22 = vadd.f32 %v1788_v42, %v1785_v62 }
 0x1f4   :  { %s7615_s26 = sld [smem:[#allocation51_spill]]  ;;  %v1930_v3 = vmul.f32 %v5274_v5, %v1929_v60  ;;  %v1927_v24 = vadd.f32 %v1926_v21, %v1923_v39  ;;  %v1812_v50 = vmul.f32 %v5311_v19, %v1811_v53  ;;  %v1949_v21 = vstv %s5573_s2 }
 0x1f5   :  { %s5635_s0 = sld [smem:[#allocation2 + $0xda]]  ;;  %v5670_v54 = vadd.f32 %v1650_v52, %v1647_v38  ;;  %v1953_v6 = vstv %s5579_s15  ;;  %v1957_v63 = vstv %s5582_s5 }
 0x1f6   :  { %s5641_s27 = sld [smem:[#allocation2 + $0xdb]]  ;;  %v1931_v42 = vadd.f32 %v1930_v3, %v1927_v24  ;;  %v2077_v38 = vstv %s5618_s24  ;;  %v1950_v24 = vmul.f32 %v1949_v21, %v4942_v43 }
 0x1f7   :  { %v1791_v56 = vstv %s7614_s19  ;;  %s7616_s13 = sld [smem:[#allocation62_spill]]  ;;  %v7261_v52 = vmax.f32 %v5670_v54, 0.0 }
 0x1f8   :  { %s7617_s4 = sld [smem:[#allocation16_spill]]  ;;  %v1792_v36 = vmul.f32 %v1791_v56, %v4971_v59  ;;  %v1937_v56 = vstv %s5560_s10  ;;  %v2079_v62 = vstv %s5625_s17 }
 0x1f9   :  { %s5644_s7 = sld [smem:[#allocation2 + $0xdc]]  ;;  %v1938_v37 = vmul.f32 %v1937_v56, %v4891_v40  ;;  %1653 = vrot.lane.b32.xlu1 %v7261_v52, %s7537_s8  ;;  %v2083_v39 = vstv %s5631_s18 }
 0x1fa   :  { %v1795_v20 = vstv %s7615_s26  ;;  %s5650_s11 = sld [smem:[#allocation2 + $0xdd]]  ;;  %v1793_v60 = vadd.f32 %v1792_v36, %v1789_v22  ;;  %v1816_v22 = vmul.f32 %v1815_v48, %v5052_v25 }
 0x1fb   :  { %s5653_s6 = sld [smem:[#allocation2 + $0xde]]  ;;  %v1796_v31 = vmul.f32 %v1795_v20, %v4984_v10  ;;  %v1945_v20 = vstv %s5570_s23  ;;  %v2087_v3 = vstv %s5635_s0 }
 0x1fc   :  { %s5659_s14 = sld [smem:[#allocation2 + $0xdf]] }
 0x1fd   :  { %v1799_v55 = vstv %s7616_s13  ;;  %s5662_s25 = sld [smem:[#allocation2 + $0xe0]]  ;;  %v1797_v36 = vadd.f32 %v1796_v31, %v1793_v60  ;;  %v2080_v31 = vmul.f32 %v2079_v62, %v4802_v4 }
 0x1fe   :  { %v1803_v47 = vstv %s7617_s4  ;;  %s5668_s12 = sld [smem:[#allocation2 + $0xe1]]  ;;  %v1800_v12 = vmul.f32 %v5293_v28, %v1799_v55  ;;  %v1935_v55 = vadd.f32 %v1934_v27, %v1931_v42  ;;  %v2084_v27 = vmul.f32 %v5237_v8, %v2083_v39 }
 0x1ff   :  { %s5673_s9 = sld [smem:[#allocation2 + $0xe2]]  ;;  %v1804_v0 = vmul.f32 %v1803_v47, %v4995_v16  ;;  %v1946_v47 = vmul.f32 %v1945_v20, %v4917_v2  ;;  %v2091_v20 = vstv %s5641_s27  ;;  %v2081_v42 = vadd.f32 %v2080_v31, %v2077_v38 }
 0x200   :  { %s5679_s16 = sld [smem:[#allocation2 + $0xe3]]  ;;  %v1801_v53 = vadd.f32 %v1800_v12, %v1797_v36  ;;  %v1939_v56 = vadd.f32 %v1938_v37, %v1935_v55  ;;  %v2088_v37 = vmul.f32 %v2087_v3, %v4848_v1  ;;  %v1954_v36 = vmul.f32 %v5350_v11, %v1953_v6 }
 0x201   :  { %s5683_s10 = sld [smem:[#allocation2 + $0xe4]]  ;;  %v1961_v55 = vstv %s5588_s3  ;;  %v2095_v48 = vstv %s5644_s7  ;;  %v2099_v62 = vstv %s5650_s11  ;;  %v1958_v38 = vmul.f32 %v1957_v63, %v4971_v59 }
 0x202   :  { %s5689_s22 = sld [smem:[#allocation2 + $0xe5]]  ;;  %v1805_v60 = vadd.f32 %v1804_v0, %v1801_v53  ;;  %v1943_v12 = vadd.f32 %v1942_v18, %v1939_v56  ;;  %v2085_v0 = vadd.f32 %v2084_v27, %v2081_v42  ;;  %v2092_v18 = vmul.f32 %v2091_v20, %v4806_v23 }
 0x203   :  { %s5696_s23 = sld [smem:[#allocation2 + $0xe6]]  ;;  %v1965_v3 = vstv %s5591_s20  ;;  %v1969_v53 = vstv %s5597_s30  ;;  %v1973_v6 = vstv %s5602_s28  ;;  %v1977_v27 = vstv %s5608_s1 }
 0x204   :  { %s5702_s29 = sld [smem:[#allocation2 + $0xe7]]  ;;  %v1809_v21 = vadd.f32 %v1808_v44, %v1805_v60  ;;  %v1947_v39 = vadd.f32 %v1946_v47, %v1943_v12  ;;  %v2089_v52 = vadd.f32 %v2088_v37, %v2085_v0  ;;  %v2096_v44 = vmul.f32 %v5274_v5, %v2095_v48 }
 0x205   :  { %s5706_s2 = sld [smem:[#allocation2 + $0xe8]]  ;;  %v1962_v47 = vmul.f32 %v1961_v55, %v4984_v10  ;;  %v2100_v20 = vmul.f32 %v2099_v62, %v4871_v41  ;;  %v2103_v63 = vstv %s5653_s6  ;;  %v1966_v42 = vmul.f32 %v5293_v28, %v1965_v3 }
 0x206   :  { %s5712_s15 = sld [smem:[#allocation2 + $0xe9]]  ;;  %v1813_v56 = vadd.f32 %v1812_v50, %v1809_v21  ;;  %v1951_v31 = vadd.f32 %v1950_v24, %v1947_v39  ;;  %v2093_v50 = vadd.f32 %v2092_v18, %v2089_v52  ;;  %v2107_v24 = vstv %s5659_s14 }
 0x207   :  { %s5715_s24 = sld [smem:[#allocation2 + $0x12d]]  ;;  %v1970_v37 = vmul.f32 %v1969_v53, %v4995_v16  ;;  %v1974_v55 = vmul.f32 %v1973_v6, %v5032_v17  ;;  %v2111_v48 = vstv %s5662_s25  ;;  %v1978_v21 = vmul.f32 %v5311_v19, %v1977_v27 }
 0x208   :  { %s5721_s19 = sld [smem:[#allocation2 + $0xea]]  ;;  %v5741_v60 = vadd.f32 %v1816_v22, %v1813_v56  ;;  %v1955_v12 = vadd.f32 %v1954_v36, %v1951_v31  ;;  %v2097_v52 = vadd.f32 %v2096_v44, %v2093_v50  ;;  %v2104_v36 = vmul.f32 %v2103_v63, %v4891_v40 }
 0x209   :  { %s5724_s5 = sld [smem:[#allocation2 + $0xeb]]  ;;  %v1981_v39 = vstv %s5612_s21  ;;  %v2108_v0 = vmul.f32 %v5321_v14, %v2107_v24  ;;  %v2115_v18 = vstv %s5668_s12  ;;  %v2112_v53 = vmul.f32 %v2111_v48, %v4917_v2 }
 0x20a   :  { %s5730_s3 = sld [smem:[#allocation2 + $0xec]]  ;;  %v7264_v22 = vmax.f32 %v5741_v60, 0.0  ;;  %v1959_v62 = vadd.f32 %v1958_v38, %v1955_v12  ;;  %v2101_v3 = vadd.f32 %v2100_v20, %v2097_v52  ;;  %v2119_v6 = vstv %s5673_s9 }
 0x20b   :  { %s5733_s17 = sld [smem:[#allocation2 + $0xed]]  ;;  %v1982_v50 = vmul.f32 %v1981_v39, %v5052_v25  ;;  %v2116_v24 = vmul.f32 %v2115_v18, %v4942_v43  ;;  %v2123_v48 = vstv %s5679_s16 }
 0x20c   :  { %s5739_s20 = sld [smem:[#allocation2 + $0xee]]  ;;  %1819 = vrot.lane.b32.xlu0 %v7264_v22, %s7537_s8  ;;  %v1963_v38 = vadd.f32 %v1962_v47, %v1959_v62  ;;  %v2105_v12 = vadd.f32 %v2104_v36, %v2101_v3  ;;  %v2127_v3 = vstv %s5683_s10 }
 0x20d   :  { %s5744_s30 = sld [smem:[#allocation2 + $0xef]]  ;;  %v2243_v56 = vstv %s5715_s24 }
 0x20e   :  { %s5750_s28 = sld [smem:[#allocation2 + $0xf0]]  ;;  %v2245_v31 = vstv %s5721_s19  ;;  %v1967_v63 = vadd.f32 %v1966_v42, %v1963_v38  ;;  %v2109_v42 = vadd.f32 %v2108_v0, %v2105_v12 }
 0x20f   :  { %s5754_s1 = sld [smem:[#allocation2 + $0xf1]]  ;;  %v2249_v44 = vstv %s5724_s5  ;;  %v2246_v47 = vmul.f32 %v2245_v31, %v4802_v4 }
 0x210   :  { %s5760_s18 = sld [smem:[#allocation2 + $0xf2]]  ;;  %v2253_v27 = vstv %s5730_s3  ;;  %v2250_v20 = vmul.f32 %v5237_v8, %v2249_v44  ;;  %v1971_v52 = vadd.f32 %v1970_v37, %v1967_v63  ;;  %v2120_v8 = vmul.f32 %v5350_v11, %v2119_v6 }
 0x211   :  { %s5767_s26 = sld [smem:[#allocation2 + $0xf3]]  ;;  %v2257_v62 = vstv %s5733_s17  ;;  %v2247_v36 = vadd.f32 %v2246_v47, %v2243_v56  ;;  %v2254_v38 = vmul.f32 %v2253_v27, %v4848_v1  ;;  %v2113_v44 = vadd.f32 %v2112_v53, %v2109_v42 }
 0x212   :  { %s5773_s21 = sld [smem:[#allocation2 + $0xf4]]  ;;  %v2261_v39 = vstv %s5739_s20  ;;  %v1975_v18 = vadd.f32 %v1974_v55, %v1971_v52  ;;  %v2258_v0 = vmul.f32 %v2257_v62, %v4806_v23  ;;  %v2124_v56 = vmul.f32 %v2123_v48, %v4971_v59 }
 0x213   :  { %s5777_s0 = sld [smem:[#allocation2 + $0xf5]]  ;;  %v2265_v31 = vstv %s5744_s30  ;;  %v2251_v37 = vadd.f32 %v2250_v20, %v2247_v36  ;;  %v2131_v27 = vstv %s5689_s22  ;;  %v2135_v63 = vstv %s5696_s23 }
 0x214   :  { %s5783_s27 = sld [smem:[#allocation2 + $0xf6]]  ;;  %v2139_v11 = vstv %s5702_s29  ;;  %v1979_v6 = vadd.f32 %v1978_v21, %v1975_v18  ;;  %v2117_v12 = vadd.f32 %v2116_v24, %v2113_v44  ;;  %v2262_v55 = vmul.f32 %v5274_v5, %v2261_v39 }
 0x215   :  { %s5786_s13 = sld [smem:[#allocation2 + $0xf7]]  ;;  %v2255_v47 = vadd.f32 %v2254_v38, %v2251_v37  ;;  %v2128_v53 = vmul.f32 %v2127_v3, %v4984_v10  ;;  %v2143_v20 = vstv %s5706_s2  ;;  %v2266_v62 = vmul.f32 %v2265_v31, %v4871_v41 }
 0x216   :  { %s5792_s4 = sld [smem:[#allocation2 + $0xf8]]  ;;  %v2269_v48 = vstv %s5750_s28  ;;  %v5812_v52 = vadd.f32 %v1982_v50, %v1979_v6  ;;  %v2121_v42 = vadd.f32 %v2120_v8, %v2117_v12  ;;  %v2273_v24 = vstv %s5754_s1 }
 0x217   :  { %s5795_s7 = sld [smem:[#allocation2 + $0xf9]]  ;;  %v2259_v21 = vadd.f32 %v2258_v0, %v2255_v47  ;;  %v2132_v5 = vmul.f32 %v5293_v28, %v2131_v27  ;;  %v2136_v36 = vmul.f32 %v2135_v63, %v4995_v16  ;;  %v2140_v38 = vmul.f32 %v2139_v11, %v5032_v17 }
 0x218   :  { %s5801_s11 = sld [smem:[#allocation2 + $0x12e]]  ;;  %v2277_v3 = vstv %s5760_s18  ;;  %v7263_v50 = vmax.f32 %v5812_v52, 0.0  ;;  %v2125_v39 = vadd.f32 %v2124_v56, %v2121_v42  ;;  %v2270_v31 = vmul.f32 %v2269_v48, %v4891_v40 }
 0x219   :  { %s5804_s6 = sld [smem:[#allocation2 + $0xfc]]  ;;  %v2263_v8 = vadd.f32 %v2262_v55, %v2259_v21  ;;  %v2144_v28 = vmul.f32 %v5311_v19, %v2143_v20  ;;  %v2147_v18 = vstv %s5712_s15  ;;  %v2274_v44 = vmul.f32 %v5321_v14, %v2273_v24 }
 0x21a   :  { %s5810_s14 = sld [smem:[#allocation2 + $0xfd]]  ;;  %v2281_v37 = vstv %s5767_s26  ;;  %1985 = vrot.lane.b32.xlu1 %v7263_v50, %s7537_s8  ;;  %v2129_v0 = vadd.f32 %v2128_v53, %v2125_v39  ;;  %v2278_v27 = vmul.f32 %v2277_v3, %v4917_v2  ;;  %v2285_v63 = vstv %s5773_s21 }
 0x21b   :  { %s5815_s25 = sld [smem:[#allocation2 + $0xfe]]  ;;  %v2267_v56 = vadd.f32 %v2266_v62, %v2263_v8  ;;  %v4289_v48 = vmov 0.0   ;;  %v2282_v42 = vmul.f32 %v2281_v37, %v4942_v43  ;;  %v2289_v21 = vstv %s5777_s0 }
 0x21c   :  { %s5821_s12 = sld [smem:[#allocation2 + $0xff]]  ;;  %v2133_v47 = vadd.f32 %v2132_v5, %v2129_v0  ;;  %3676 = vmatprep.subr.mxu0 %v4289_v48  ;;  %3711 = vmatprep.subr.mxu1 %v4289_v48 }
 0x21d   :  { %s5825_s9 = sld [smem:[#allocation2 + $0x100]]  ;;  %v2271_v55 = vadd.f32 %v2270_v31, %v2267_v56  ;;  %v2148_v56 = vmul.f32 %v2147_v18, %v5052_v25  ;;  %3708 = vmatprep.mubr.msk.f32.mxu0 %vm4290_vm2, %v4289_v48  ;;  %3743 = vmatprep.mubr.msk.f32.mxu1 %vm4290_vm2, %v4289_v48 }
 0x21e   :  { %s5831_s16 = sld [smem:[#allocation2 + $0x101]]  ;;  %v2409_v14 = vstv %s5801_s11  ;;  %v2137_v39 = vadd.f32 %v2136_v36, %v2133_v47 }
 0x21f   :  { %s5838_s10 = sld [smem:[#allocation2 + $0xfa]]  ;;  %v2411_v11 = vstv %s5804_s6  ;;  %v2275_v8 = vadd.f32 %v2274_v44, %v2271_v55  ;;  %v2293_v44 = vstv %s5783_s27  ;;  %v2290_v55 = vmul.f32 %v2289_v21, %v4971_v59 }
 0x220   :  { %s7618_s29 = sld [smem:[#allocation73_spill]]  ;;  %v2415_v6 = vstv %s5810_s14  ;;  %v2412_v53 = vmul.f32 %v2411_v11, %v4802_v4  ;;  %v2141_v11 = vadd.f32 %v2140_v38, %v2137_v39  ;;  %v2297_v38 = vstv %s5786_s13 }
 0x221   :  { %s5846_s2 = sld [smem:[#allocation2 + $0x102]]  ;;  %v2419_v24 = vstv %s5815_s25  ;;  %v2294_v39 = vmul.f32 %v2293_v44, %v4984_v10 }
 0x222   :  { %s5851_s19 = sld [smem:[#allocation2 + $0xfb]]  ;;  %v2423_v5 = vstv %s5821_s12  ;;  %v2413_v31 = vadd.f32 %v2412_v53, %v2409_v14  ;;  %v2420_v0 = vmul.f32 %v2419_v24, %v4848_v1  ;;  %v2145_v53 = vadd.f32 %v2144_v28, %v2141_v11 }
 0x223   :  { %s7619_s17 = sld [smem:[#allocation72_spill]]  ;;  %v2427_v14 = vstv %s5825_s9  ;;  %v2301_v28 = vstv %s5792_s4 }
 0x224   :  { %s5865_s20 = sld [smem:[#allocation2 + $0x103]] }
 0x225   :  { %s5872_s1 = sld [smem:[#allocation2 + $0x104]] }
 0x226   :  { %v2901_v19 = vld [vmem:[%s7618_s29 + $0xf8] sm:$0xff]  ;;  %v2900_v3 = vld [vmem:[%s7618_s29 + $0xf0] sm:$0xff]  ;;  %s5886_s11 = sld [smem:[#allocation2 + $0x105]]  ;;  %v178_v47 = vld [vmem:[%s7618_s29 + $0x68] sm:$0xff] }
 0x227   :  { %v180_v12 = vld [vmem:[%s7618_s29 + $0x78] sm:$0xff]  ;;  %3677 = vmatpush3.msra.mxu0 %v2901_v19  ;;  %v179_v37 = vld [vmem:[%s7618_s29 + $0x70] sm:$0xff]  ;;  %s5891_s6 = sld [smem:[#allocation2 + $0x106]]  ;;  %v2898_v21 = vld [vmem:[%s7618_s29 + $0xe0] sm:$0xff] }
 0x228   :  { %3712 = vmatpush3.msra.mxu1 %v180_v12  ;;  %3678 = vmatprep.subr.mxu0 %v4289_v48  ;;  %v2424_v12 = vmul.f32 %v2423_v5, %v4806_v23  ;;  %s5902_s9 = sld [smem:[#allocation2 + $0x107]]  ;;  %v2897_v44 = vld [vmem:[%s7618_s29 + $0xd8] sm:$0xff]  ;;  %v3040_v51 = vld [vmem:[%s7618_s29 + $0x2f0] sm:$0xff] }
 0x229   :  { %v5857_v20 = vld [vmem:[%s7619_s17] sm:$0xff]  ;;  %v5881_v19 = vld [vmem:[%s7619_s17 + $0x18] sm:$0xff]  ;;  %3713 = vmatprep.subr.mxu1 %v4289_v48  ;;  %3679 = vmatpush3.msra.mxu0 %v2900_v3  ;;  %v5908_v5 = vld [vmem:[%s7619_s17 + $0x8] sm:$0xff]  ;;  %s5911_s15 = sld [smem:[#allocation2 + $0x108]] }
 0x22a   :  { %v2416_v62 = vmul.f32 %v5857_v20, %v2415_v6  ;;  %v2286_v36 = vmul.f32 %v5881_v19, %v2285_v63  ;;  %v2279_v6 = vadd.f32 %v2278_v27, %v2275_v8  ;;  %v2899_v63 = vld [vmem:[%s7618_s29 + $0xe8] sm:$0xff]  ;;  %v2431_v27 = vstv %s5831_s16  ;;  %3714 = vmatpush3.msra.mxu1 %v179_v37  ;;  %3680 = vmatprep.subr.mxu0 %v4289_v48  ;;  %s5920_s24 = sld [smem:[#allocation2 + $0x109]]  ;;  %v177_v8 = vld [vmem:[%s7618_s29 + $0x60] sm:$0xff]  ;;  %v2936_v32 = vld [vmem:[%s7618_s29 + $0x178] sm:$0xff] }
 0x22b   :  { %v2428_v3 = vmul.f32 %v5908_v5, %v2427_v14  ;;  %3715 = vmatprep.subr.mxu1 %v4289_v48  ;;  %3681 = vmatpush3.msra.mxu0 %v2899_v63  ;;  %v2432_v14 = vmul.f32 %v2431_v27, %v4871_v41  ;;  %s5928_s30 = sld [smem:[#allocation2 + $0x10a]]  ;;  %v5937_v11 = vld [vmem:[%s7619_s17 + $0x20] sm:$0xff]  ;;  %v2302_v27 = vmul.f32 %v2301_v28, %v4995_v16  ;;  %v2971_v57 = vld [vmem:[%s7618_s29 + $0x1f8] sm:$0xff]  ;;  %v3110_v45 = vld [vmem:[%s7618_s29 + $0x3f0] sm:$0xff] }
 0x22c   :  { %v2417_v18 = vadd.f32 %v2416_v62, %v2413_v31  ;;  %v2283_v62 = vadd.f32 %v2282_v42, %v2279_v6  ;;  %v2435_v42 = vstv %s5846_s2  ;;  %3716 = vmatpush3.msra.mxu1 %v178_v47  ;;  %v5925_v31 = vadd.f32 %v2148_v56, %v2145_v53  ;;  %3682 = vmatprep.subr.mxu0 %v4289_v48  ;;  %s5942_s26 = sld [smem:[#allocation2 + $0x10b]]  ;;  %v3041_v15 = vld [vmem:[%s7618_s29 + $0x2f8] sm:$0xff]  ;;  %v3180_v46 = vld [vmem:[%s7618_s29 + $0x4f0] sm:$0xff] }
 0x22d   :  { %v2298_v56 = vmul.f32 %v5937_v11, %v2297_v38  ;;  %v2439_v6 = vstv %s5865_s20  ;;  %3717 = vmatprep.subr.mxu1 %v4289_v48  ;;  %3683 = vmatpush3.msra.mxu0 %v2898_v21  ;;  %v2436_v47 = vmul.f32 %v2435_v42, %v4891_v40  ;;  %s5947_s21 = sld [smem:[#allocation2 + $0x12f]]  ;;  %v176_v38 = vld [vmem:[%s7618_s29 + $0x58] sm:$0xff]  ;;  %v2309_v53 = vstv %s5838_s10  ;;  %v5966_v21 = vld [vmem:[%s7619_s17 + $0x10] sm:$0xff] }
 0x22e   :  { %v2421_v24 = vadd.f32 %v2420_v0, %v2417_v18  ;;  %v2287_v0 = vadd.f32 %v2286_v36, %v2283_v62  ;;  %v2305_v36 = vstv %s5795_s7  ;;  %v7262_v18 = vmax.f32 %v5925_v31, 0.0  ;;  %3718 = vmatpush3.msra.mxu1 %v177_v8  ;;  %3684 = vmatprep.subr.mxu0 %v4289_v48  ;;  %s5956_s20 = sld [smem:[#allocation2 + $0x10e]]  ;;  %v2896_v42 = vld [vmem:[%s7618_s29 + $0xd0] sm:$0xff]  ;;  %v3111_v49 = vld [vmem:[%s7618_s29 + $0x3f8] sm:$0xff] }
 0x22f   :  { %v2443_v62 = vstv %s5872_s1  ;;  %3719 = vmatprep.subr.mxu1 %v4289_v48  ;;  %3685 = vmatpush3.msra.mxu0 %v2897_v44  ;;  %v2440_v28 = vmul.f32 %v5966_v21, %v2439_v6  ;;  %s5969_s10 = sld [smem:[#allocation2 + $0x10f]]  ;;  %v2306_v8 = vmul.f32 %v2305_v36, %v5032_v17  ;;  %v2451_v6 = vstv %s5891_s6  ;;  %v2895_v36 = vld [vmem:[%s7618_s29 + $0xc8] sm:$0xff]  ;;  %v3181_v34 = vld [vmem:[%s7618_s29 + $0x4f8] sm:$0xff] }
 0x230   :  { %v2425_v37 = vadd.f32 %v2424_v12, %v2421_v24  ;;  %v2291_v12 = vadd.f32 %v2290_v55, %v2287_v0  ;;  %2151 = vrot.lane.b32.xlu0 %v7262_v18, %s7537_s8  ;;  %v2313_v24 = vstv %s5851_s19  ;;  %v2447_v0 = vstv %s5886_s11  ;;  %s5979_s19 = sld [smem:[#allocation2 + $0x110]]  ;;  %3720 = vmatpush3.msra.mxu1 %v176_v38  ;;  %v3251_v9 = vld [vmem:[%s7618_s29 + $0x5f8] sm:$0xff] }
 0x231   :  { %3686 = vmatprep.subr.mxu0 %v4289_v48  ;;  %v2444_v44 = vmul.f32 %v2443_v62, %v4917_v2  ;;  %s5984_s23 = sld [smem:[#allocation2 + $0x111]]  ;;  %3721 = vmatprep.subr.mxu1 %v4289_v48  ;;  %v2463_v50 = vstv %s5920_s24 }
 0x232   :  { %v2429_v63 = vadd.f32 %v2428_v3, %v2425_v37  ;;  %v2295_v55 = vadd.f32 %v2294_v39, %v2291_v12  ;;  %v175_v39 = vld [vmem:[%s7618_s29 + $0x50] sm:$0xff]  ;;  %v5993_v12 = vld [vmem:[%s7619_s17 + $0x28] sm:$0xff]  ;;  %s5997_s6 = sld [smem:[#allocation2 + $0x112]]  ;;  %3687 = vmatpush3.msra.mxu0 %v2896_v42  ;;  %v2459_v42 = vstv %s5911_s15 }
 0x233   :  { %3722 = vmatpush3.msra.mxu1 %v175_v39  ;;  %s6004_s17 = sld [smem:[#allocation2 + $0x113]]  ;;  %3688 = vmatprep.subr.mxu0 %v4289_v48  ;;  %v2575_v39 = vstv %s5947_s21 }
 0x234   :  { %v2433_v3 = vadd.f32 %v2432_v14, %v2429_v63  ;;  %v2299_v37 = vadd.f32 %v2298_v56, %v2295_v55  ;;  %v2310_v56 = vmul.f32 %v5993_v12, %v2309_v53  ;;  %v2314_v63 = vmul.f32 %v2313_v24, %v5052_v25  ;;  %v2894_v53 = vld [vmem:[%s7618_s29 + $0xc0] sm:$0xff]  ;;  %s6014_s18 = sld [smem:[#allocation2 + $0x114]]  ;;  %3723 = vmatprep.subr.mxu1 %v4289_v48 }
 0x235   :  { %v2448_v55 = vmul.f32 %v2447_v0, %v4942_v43  ;;  %v2452_v24 = vmul.f32 %v5881_v19, %v2451_v6  ;;  %3689 = vmatpush3.msra.mxu0 %v2895_v36  ;;  %s6020_s7 = sld [smem:[#allocation2 + $0x10c]]  ;;  %v2581_v6 = vstv %s5969_s10 }
 0x236   :  { %v2437_v14 = vadd.f32 %v2436_v47, %v2433_v3  ;;  %v174_v47 = vld [vmem:[%s7618_s29 + $0x48] sm:$0xff]  ;;  %v2303_v38 = vadd.f32 %v2302_v27, %v2299_v37  ;;  %v2455_v3 = vstv %s5902_s9  ;;  %v2577_v27 = vstv %s5956_s20  ;;  %3690 = vmatprep.subr.mxu0 %v4289_v48  ;;  %s6029_s15 = sld [smem:[#allocation2 + $0x115]] }
 0x237   :  { %3724 = vmatpush3.msra.mxu1 %v174_v47  ;;  %v2456_v18 = vmul.f32 %v2455_v3, %v4971_v59  ;;  %v2582_v36 = vmul.f32 %v5857_v20, %v2581_v6  ;;  %v2585_v22 = vstv %s5979_s19  ;;  %3691 = vmatpush3.msra.mxu0 %v2894_v53  ;;  %s6035_s14 = sld [smem:[#allocation2 + $0x10d]]  ;;  %v172_v20 = vld [vmem:[%s7618_s29 + $0x38] sm:$0xff]  ;;  %v2589_v3 = vstv %s5984_s23 }
 0x238   :  { %v2441_v62 = vadd.f32 %v2440_v28, %v2437_v14  ;;  %v173_v28 = vld [vmem:[%s7618_s29 + $0x40] sm:$0xff]  ;;  %v2307_v0 = vadd.f32 %v2306_v8, %v2303_v38  ;;  %v2578_v14 = vmul.f32 %v2577_v27, %v4802_v4  ;;  %3725 = vmatprep.subr.mxu1 %v4289_v48  ;;  %v2893_v4 = vld [vmem:[%s7618_s29 + $0xb8] sm:$0xff]  ;;  %v2586_v38 = vmul.f32 %v2585_v22, %v4848_v1  ;;  %s6044_s10 = sld [smem:[#allocation2 + $0x116]]  ;;  %v2892_v1 = vld [vmem:[%s7618_s29 + $0xb0] sm:$0xff] }
 0x239   :  { %3726 = vmatpush3.msra.mxu1 %v173_v28  ;;  %v2593_v53 = vstv %s5997_s6  ;;  %3692 = vmatprep.subr.mxu0 %v4289_v48  ;;  %v2464_v27 = vmul.f32 %v5937_v11, %v2463_v50  ;;  %v2467_v28 = vstv %s5928_s30  ;;  %s6060_s19 = sld [smem:[#allocation2 + $0x117]]  ;;  %v2891_v50 = vld [vmem:[%s7618_s29 + $0xa8] sm:$0xff] }
 0x23a   :  { %v2445_v37 = vadd.f32 %v2444_v44, %v2441_v62  ;;  %v2311_v8 = vadd.f32 %v2310_v56, %v2307_v0  ;;  %v2579_v47 = vadd.f32 %v2578_v14, %v2575_v39  ;;  %v2460_v62 = vmul.f32 %v2459_v42, %v4984_v10  ;;  %3727 = vmatprep.subr.mxu1 %v4289_v48  ;;  %v171_v42 = vld [vmem:[%s7618_s29 + $0x30] sm:$0xff]  ;;  %s6071_s30 = sld [smem:[#allocation2 + $0x118]] }
 0x23b   :  { %v2590_v39 = vmul.f32 %v2589_v3, %v4806_v23  ;;  %3693 = vmatpush3.msra.mxu0 %v2893_v4  ;;  %v2597_v0 = vstv %s6004_s17  ;;  %3728 = vmatpush3.msra.mxu1 %v172_v20  ;;  %v2471_v14 = vstv %s5942_s26  ;;  %v2601_v6 = vstv %s6014_s18  ;;  %s6084_s26 = sld [smem:[#allocation2 + $0x119]] }
 0x23c   :  { %v2449_v44 = vadd.f32 %v2448_v55, %v2445_v37  ;;  %v6051_v22 = vadd.f32 %v2314_v63, %v2311_v8  ;;  %v2583_v55 = vadd.f32 %v2582_v36, %v2579_v47  ;;  %3694 = vmatprep.subr.mxu0 %v4289_v48  ;;  %v2594_v37 = vmul.f32 %v5908_v5, %v2593_v53  ;;  %s6097_s17 = sld [smem:[#allocation2 + $0x11a]] }
 0x23d   :  { %3729 = vmatprep.subr.mxu1 %v4289_v48  ;;  %3695 = vmatpush3.msra.mxu0 %v2892_v1  ;;  %v2468_v36 = vmul.f32 %v2467_v28, %v4995_v16  ;;  %v2598_v8 = vmul.f32 %v2597_v0, %v4871_v41  ;;  %v2605_v47 = vstv %s6029_s15  ;;  %v2602_v53 = vmul.f32 %v2601_v6, %v4891_v40  ;;  %v169_v41 = vld [vmem:[%s7618_s29 + $0x20] sm:$0xff]  ;;  %v168_v28 = vld [vmem:[%s7618_s29 + $0x18] sm:$0xff]  ;;  %s6110_s0 = sld [smem:[#allocation2 + $0x11b]]  ;;  %v167_v6 = vld [vmem:[%s7618_s29 + $0x10] sm:$0xff] }
 0x23e   :  { %v2453_v56 = vadd.f32 %v2452_v24, %v2449_v44  ;;  %v2316_v63 = vmax.f32 %v6051_v22, 0.0  ;;  %v2587_v23 = vadd.f32 %v2586_v38, %v2583_v55  ;;  %3730 = vmatpush3.msra.mxu1 %v171_v42  ;;  %3696 = vmatprep.subr.mxu0 %v4289_v48  ;;  %v2475_v44 = vstv %s6020_s7  ;;  %v2890_v38 = vld [vmem:[%s7618_s29 + $0xa0] sm:$0xff]  ;;  %s6120_s21 = sld [smem:[#allocation2 + $0x11c]]  ;;  %v3355_v22 = vld [vmem:[%s7618_s29 + $0x770] sm:$0xff] }
 0x23f   :  { %3731 = vmatprep.subr.mxu1 %v4289_v48  ;;  %3697 = vmatpush3.msra.mxu0 %v2891_v50  ;;  %v2479_v1 = vstv %s6035_s14  ;;  %v2606_v40 = vmul.f32 %v5966_v21, %v2605_v47  ;;  %v2613_v0 = vstv %s6060_s19  ;;  %v2888_v50 = vld [vmem:[%s7618_s29 + $0x90] sm:$0xff]  ;;  %s6145_s19 = sld [smem:[#allocation2 + $0x11e]] }
 0x240   :  { %v2457_v24 = vadd.f32 %v2456_v18, %v2453_v56  ;;  %v170_v18 = vld [vmem:[%s7618_s29 + $0x28] sm:$0xff]  ;;  %2317 = vrot.lane.b32.xlu1 %v2316_v63, %s7537_s8  ;;  %v2591_v4 = vadd.f32 %v2590_v39, %v2587_v23  ;;  %v2609_v56 = vstv %s6044_s10  ;;  %3698 = vmatprep.subr.mxu0 %v4289_v48  ;;  %v2476_v39 = vmul.f32 %v5993_v12, %v2475_v44  ;;  %s6131_s10 = sld [smem:[#allocation2 + $0x11d]] }
 0x241   :  { %3732 = vmatpush3.msra.mxu1 %v170_v18  ;;  %3699 = vmatpush3.msra.mxu0 %v2890_v38  ;;  %v2480_v23 = vmul.f32 %v2479_v1, %v5052_v25  ;;  %v257_v38 = vpop.permute.xlu0 %256  ;;  %s7624_s16 = sld [smem:[#allocation75_spill]] }
 0x242   :  { %v2461_v5 = vadd.f32 %v2460_v62, %v2457_v24  ;;  %v2472_v62 = vmul.f32 %v2471_v14, %v5032_v17  ;;  %v2595_v3 = vadd.f32 %v2594_v37, %v2591_v4  ;;  %3733 = vmatprep.subr.mxu1 %v4289_v48  ;;  %3700 = vmatprep.subr.mxu0 %v4289_v48  ;;  %v2617_v14 = vstv %s6071_s30  ;;  %s6155_s30 = sld [smem:[#allocation2 + $0x11f]] }
 0x243   :  { %3734 = vmatpush3.msra.mxu1 %v169_v41  ;;  %v2610_v37 = vmul.f32 %v2609_v56, %v4917_v2  ;;  %v2887_v2 = vld [vmem:[%s7618_s29 + $0x88] sm:$0xff]  ;;  %v2621_v4 = vstv %s6084_s26  ;;  %v2618_v47 = vmul.f32 %v5881_v19, %v2617_v14  ;;  %v165_v19 = vld [vmem:[%s7618_s29] sm:$0xff]  ;;  %v2629_v56 = vstv %s6110_s0  ;;  %s7625_s20 = sld [smem:[#allocation74_spill]] }
 0x244   :  { %v2465_v20 = vadd.f32 %v2464_v27, %v2461_v5  ;;  %v2599_v42 = vadd.f32 %v2598_v8, %v2595_v3  ;;  %v2889_v27 = vld [vmem:[%s7618_s29 + $0x98] sm:$0xff]  ;;  %3735 = vmatprep.subr.mxu1 %v4289_v48  ;;  %v166_v8 = vld [vmem:[%s7618_s29 + $0x8] sm:$0xff]  ;;  %v2625_v3 = vstv %s6097_s17  ;;  %v2622_v1 = vmul.f32 %v2621_v4, %v4971_v59  ;;  %v2933_v14 = vld [vmem:[%s7618_s29 + $0x160] sm:$0xff]  ;;  %s7626_s25 = sld [smem:[#allocation76_spill]] }
 0x245   :  { %3701 = vmatpush3.msra.mxu0 %v2889_v27  ;;  %3736 = vmatpush3.msra.mxu1 %v168_v28  ;;  %v2935_v27 = vld [vmem:[%s7618_s29 + $0x170] sm:$0xff]  ;;  %s7627_s27 = sld [smem:[#allocation77_spill]] }
 0x246   :  { %v2469_v55 = vadd.f32 %v2468_v36, %v2465_v20  ;;  %v2603_v21 = vadd.f32 %v2602_v53, %v2599_v42  ;;  %v2614_v36 = vmul.f32 %v2613_v0, %v4942_v43  ;;  %3702 = vmatprep.subr.mxu0 %v4289_v48  ;;  %3737 = vmatprep.subr.mxu1 %v4289_v48  ;;  %v163_v20 = vpop.permute.xlu1 %162  ;;  %v2970_v28 = vld [vmem:[%s7618_s29 + $0x1f0] sm:$0xff] }
 0x247   :  { %3703 = vmatpush3.msra.mxu0 %v2888_v50  ;;  %3738 = vmatpush3.msra.mxu1 %v167_v6  ;;  %v2626_v42 = vmul.f32 %v2625_v3, %v4984_v10  ;;  %v2630_v10 = vmul.f32 %v5937_v11, %v2629_v56  ;;  %v2641_v11 = vstv %s6145_s19  ;;  %v2968_v6 = vld [vmem:[%s7618_s29 + $0x1e0] sm:$0xff]  ;;  %v2962_v56 = vld [vmem:[%s7618_s29 + $0x1b0] sm:$0xff] }
 0x248   :  { %v2473_v24 = vadd.f32 %v2472_v62, %v2469_v55  ;;  %v2607_v5 = vadd.f32 %v2606_v40, %v2603_v21  ;;  %3704 = vmatprep.subr.mxu0 %v4289_v48  ;;  %v2886_v62 = vld [vmem:[%s7618_s29 + $0x80] sm:$0xff]  ;;  %3739 = vmatprep.subr.mxu1 %v4289_v48  ;;  %v258_v55 = vmax.f32 %v255_v26, %v257_v38  ;;  %v2633_v40 = vstv %s6120_s21  ;;  %v2969_v21 = vld [vmem:[%s7618_s29 + $0x1e8] sm:$0xff] }
 0x249   :  { %3705 = vmatpush3.msra.mxu0 %v2887_v2  ;;  %3740 = vmatpush3.msra.mxu1 %v166_v8  ;;  %v2966_v8 = vld [vmem:[%s7618_s29 + $0x1d0] sm:$0xff]  ;;  %v2964_v3 = vld [vmem:[%s7618_s29 + $0x1c0] sm:$0xff] }
 0x24a   :  { %v2477_v18 = vadd.f32 %v2476_v39, %v2473_v24  ;;  %v2611_v43 = vadd.f32 %v2610_v37, %v2607_v5  ;;  %3706 = vmatprep.subr.mxu0 %v4289_v48  ;;  %3741 = vmatprep.subr.mxu1 %v4289_v48  ;;  %v164_v39 = vmax.f32 %v161_v30, %v163_v20  ;;  %v2637_v30 = vstv %s6131_s10  ;;  %v2929_v20 = vld [vmem:[%s7618_s29 + $0x140] sm:$0xff] }
 0x24b   :  { %3707 = vmatpush3.msra.mxu0 %v2886_v62  ;;  %3742 = vmatpush3.msra.mxu1 %v165_v19  ;;  %v2634_v24 = vmul.f32 %v2633_v40, %v4995_v16  ;;  %v2638_v50 = vmul.f32 %v2637_v30, %v5032_v17  ;;  %v2645_v16 = vstv %s6155_s30  ;;  %v2642_v5 = vmul.f32 %v5993_v12, %v2641_v11  ;;  %v2932_v17 = vld [vmem:[%s7618_s29 + $0x158] sm:$0xff]  ;;  %v2931_v12 = vld [vmem:[%s7618_s29 + $0x150] sm:$0xff]  ;;  %v2957_v30 = vld [vmem:[%s7618_s29 + $0x188] sm:$0xff] }
 0x24c   :  { %v6137_v44 = vadd.f32 %v2480_v23, %v2477_v18  ;;  %v2615_v41 = vadd.f32 %v2614_v36, %v2611_v43  ;;  %3746 = vmatprep.subr.mxu0 %v4289_v48  ;;  %3781 = vmatprep.subr.mxu1 %v4289_v48  ;;  %v2934_v23 = vld [vmem:[%s7618_s29 + $0x168] sm:$0xff]  ;;  %v2967_v36 = vld [vmem:[%s7618_s29 + $0x1d8] sm:$0xff]  ;;  %v2646_v4 = vmul.f32 %v2645_v16, %v5052_v25  ;;  %v3038_v16 = vld [vmem:[%s7618_s29 + $0x2e0] sm:$0xff] }
 0x24d   :  { %3709 = vmatmul.mubr.f32.vlgmr.msra.gmra.mxu0 %v258_v55  ;;  %3744 = vmatmul.mubr.f32.vlgmr.msra.gmra.mxu1 %v164_v39  ;;  %v2930_v25 = vld [vmem:[%s7618_s29 + $0x148] sm:$0xff]  ;;  %v2928_v19 = vld [vmem:[%s7618_s29 + $0x138] sm:$0xff] }
 0x24e   :  { %v2482_v53 = vmax.f32 %v6137_v44, 0.0  ;;  %v2619_v59 = vadd.f32 %v2618_v47, %v2615_v41  ;;  %3747 = vmatpush3.msra.mxu0 %v2936_v32  ;;  %3782 = vmatpush3.msra.mxu1 %v2971_v57  ;;  %v2965_v47 = vld [vmem:[%s7618_s29 + $0x1c8] sm:$0xff]  ;;  %v2963_v41 = vld [vmem:[%s7618_s29 + $0x1b8] sm:$0xff]  ;;  %v2923_v57 = vld [vmem:[%s7618_s29 + $0x110] sm:$0xff] }
 0x24f   :  { %3748 = vmatprep.subr.mxu0 %v4289_v48  ;;  %3783 = vmatprep.subr.mxu1 %v4289_v48  ;;  %v2926_v55 = vld [vmem:[%s7618_s29 + $0x128] sm:$0xff]  ;;  %v2924_v40 = vld [vmem:[%s7618_s29 + $0x118] sm:$0xff] }
 0x250   :  { %2483 = vrot.lane.b32.xlu0 %v2482_v53, %s7537_s8  ;;  %v2623_v26 = vadd.f32 %v2622_v1, %v2619_v59  ;;  %3749 = vmatpush3.msra.mxu0 %v2935_v27  ;;  %v2927_v1 = vld [vmem:[%s7618_s29 + $0x130] sm:$0xff]  ;;  %v2961_v39 = vld [vmem:[%s7618_s29 + $0x1a8] sm:$0xff]  ;;  %v2925_v59 = vld [vmem:[%s7618_s29 + $0x120] sm:$0xff]  ;;  %v492_v27 = vpop.permute.xlu0 %491 }
 0x251   :  { %3784 = vmatpush3.msra.mxu1 %v2970_v28  ;;  %3750 = vmatprep.subr.mxu0 %v4289_v48  ;;  %v2959_v32 = vld [vmem:[%s7618_s29 + $0x198] sm:$0xff]  ;;  %v2921_v28 = vld [vmem:[%s7618_s29 + $0x100] sm:$0xff]  ;;  %v493_v11 = vmax.f32 %v490_v58, %v492_v27  ;;  %v3005_v58 = vld [vmem:[%s7618_s29 + $0x270] sm:$0xff] }
 0x252   :  { %v2627_v0 = vadd.f32 %v2626_v42, %v2623_v26  ;;  %3785 = vmatprep.subr.mxu1 %v4289_v48  ;;  %3751 = vmatpush3.msra.mxu0 %v2934_v23  ;;  %v2960_v42 = vld [vmem:[%s7618_s29 + $0x1a0] sm:$0xff]  ;;  %v2958_v26 = vld [vmem:[%s7618_s29 + $0x190] sm:$0xff]  ;;  %v3109_v27 = vld [vmem:[%s7618_s29 + $0x3e8] sm:$0xff] }
 0x253   :  { %3786 = vmatpush3.msra.mxu1 %v2969_v21  ;;  %3752 = vmatprep.subr.mxu0 %v4289_v48  ;;  %v3006_v21 = vld [vmem:[%s7618_s29 + $0x278] sm:$0xff] }
 0x254   :  { %v2631_v37 = vadd.f32 %v2630_v10, %v2627_v0  ;;  %3787 = vmatprep.subr.mxu1 %v4289_v48  ;;  %3753 = vmatpush3.msra.mxu0 %v2933_v14  ;;  %v2922_v10 = vld [vmem:[%s7618_s29 + $0x108] sm:$0xff]  ;;  %v658_v0 = vpop.permute.xlu1 %657  ;;  %v3002_v14 = vld [vmem:[%s7618_s29 + $0x258] sm:$0xff] }
 0x255   :  { %3788 = vmatpush3.msra.mxu1 %v2968_v6  ;;  %3754 = vmatprep.subr.mxu0 %v4289_v48  ;;  %v659_v23 = vmax.f32 %v656_v7, %v658_v0  ;;  %v3004_v7 = vld [vmem:[%s7618_s29 + $0x268] sm:$0xff]  ;;  %v3037_v6 = vld [vmem:[%s7618_s29 + $0x2d8] sm:$0xff]  ;;  %v3108_v0 = vld [vmem:[%s7618_s29 + $0x3e0] sm:$0xff] }
 0x256   :  { %v2635_v18 = vadd.f32 %v2634_v24, %v2631_v37  ;;  %3789 = vmatprep.subr.mxu1 %v4289_v48  ;;  %3755 = vmatpush3.msra.mxu0 %v2932_v17  ;;  %v2956_v24 = vld [vmem:[%s7618_s29 + $0x180] sm:$0xff]  ;;  %v3039_v37 = vld [vmem:[%s7618_s29 + $0x2e8] sm:$0xff] }
 0x257   :  { %3790 = vmatpush3.msra.mxu1 %v2967_v36  ;;  %3756 = vmatprep.subr.mxu0 %v4289_v48  ;;  %v3000_v17 = vld [vmem:[%s7618_s29 + $0x248] sm:$0xff] }
 0x258   :  { %v2639_v2 = vadd.f32 %v2638_v50, %v2635_v18  ;;  %3791 = vmatprep.subr.mxu1 %v4289_v48  ;;  %3757 = vmatpush3.msra.mxu0 %v2931_v12  ;;  %v3003_v50 = vld [vmem:[%s7618_s29 + $0x260] sm:$0xff]  ;;  %v3001_v18 = vld [vmem:[%s7618_s29 + $0x250] sm:$0xff]  ;;  %v3035_v36 = vld [vmem:[%s7618_s29 + $0x2c8] sm:$0xff] }
 0x259   :  { %3792 = vmatpush3.msra.mxu1 %v2966_v8  ;;  %3758 = vmatprep.subr.mxu0 %v4289_v48  ;;  %v2998_v12 = vld [vmem:[%s7618_s29 + $0x238] sm:$0xff] }
 0x25a   :  { %v2643_v43 = vadd.f32 %v2642_v5, %v2639_v2  ;;  %3793 = vmatprep.subr.mxu1 %v4289_v48  ;;  %3759 = vmatpush3.msra.mxu0 %v2930_v25  ;;  %v3036_v5 = vld [vmem:[%s7618_s29 + $0x2d0] sm:$0xff]  ;;  %v2999_v2 = vld [vmem:[%s7618_s29 + $0x240] sm:$0xff]  ;;  %v3033_v8 = vld [vmem:[%s7618_s29 + $0x2b8] sm:$0xff] }
 0x25b   :  { %3794 = vmatpush3.msra.mxu1 %v2965_v47  ;;  %3760 = vmatprep.subr.mxu0 %v4289_v48  ;;  %v3032_v25 = vld [vmem:[%s7618_s29 + $0x2b0] sm:$0xff]  ;;  %v2996_v47 = vld [vmem:[%s7618_s29 + $0x228] sm:$0xff] }
 0x25c   :  { %v6233_v38 = vadd.f32 %v2646_v4, %v2643_v43  ;;  %3795 = vmatprep.subr.mxu1 %v4289_v48  ;;  %3761 = vmatpush3.msra.mxu0 %v2929_v20  ;;  %v3034_v4 = vld [vmem:[%s7618_s29 + $0x2c0] sm:$0xff]  ;;  %v2997_v43 = vld [vmem:[%s7618_s29 + $0x230] sm:$0xff]  ;;  %v3031_v20 = vld [vmem:[%s7618_s29 + $0x2a8] sm:$0xff] }
 0x25d   :  { %3796 = vmatpush3.msra.mxu1 %v2964_v3  ;;  %3762 = vmatprep.subr.mxu0 %v4289_v48  ;;  %v2995_v3 = vld [vmem:[%s7618_s29 + $0x220] sm:$0xff] }
 0x25e   :  { %v2648_v62 = vmax.f32 %v6233_v38, 0.0  ;;  %3797 = vmatprep.subr.mxu1 %v4289_v48  ;;  %3763 = vmatpush3.msra.mxu0 %v2928_v19  ;;  %v3030_v19 = vld [vmem:[%s7618_s29 + $0x2a0] sm:$0xff] }
 0x25f   :  { %3798 = vmatpush3.msra.mxu1 %v2963_v41  ;;  %3764 = vmatprep.subr.mxu0 %v4289_v48  ;;  %v2994_v41 = vld [vmem:[%s7618_s29 + $0x218] sm:$0xff] }
 0x260   :  { %2649 = vrot.lane.b32.xlu1 %v2648_v62, %s7537_s8  ;;  %3799 = vmatprep.subr.mxu1 %v4289_v48 }
 0x261   :  { %3765 = vmatpush3.msra.mxu0 %v2927_v1  ;;  %3800 = vmatpush3.msra.mxu1 %v2962_v56  ;;  %v3029_v1 = vld [vmem:[%s7618_s29 + $0x298] sm:$0xff]  ;;  %v2993_v56 = vld [vmem:[%s7618_s29 + $0x210] sm:$0xff] }
 0x262   :  { %3766 = vmatprep.subr.mxu0 %v4289_v48  ;;  %3801 = vmatprep.subr.mxu1 %v4289_v48 }
 0x263   :  { %3767 = vmatpush3.msra.mxu0 %v2926_v55  ;;  %3802 = vmatpush3.msra.mxu1 %v2961_v39  ;;  %v3028_v55 = vld [vmem:[%s7618_s29 + $0x290] sm:$0xff]  ;;  %v2992_v39 = vld [vmem:[%s7618_s29 + $0x208] sm:$0xff] }
 0x264   :  { %3768 = vmatprep.subr.mxu0 %v4289_v48  ;;  %3803 = vmatprep.subr.mxu1 %v4289_v48 }
 0x265   :  { %3769 = vmatpush3.msra.mxu0 %v2925_v59  ;;  %3804 = vmatpush3.msra.mxu1 %v2960_v42  ;;  %v3027_v59 = vld [vmem:[%s7618_s29 + $0x288] sm:$0xff]  ;;  %v824_v42 = vpop.permute.xlu0 %823 }
 0x266   :  { %3770 = vmatprep.subr.mxu0 %v4289_v48  ;;  %3805 = vmatprep.subr.mxu1 %v4289_v48 }
 0x267   :  { %3771 = vmatpush3.msra.mxu0 %v2924_v40  ;;  %3806 = vmatpush3.msra.mxu1 %v2959_v32  ;;  %v2991_v40 = vld [vmem:[%s7618_s29 + $0x200] sm:$0xff]  ;;  %v990_v32 = vpop.permute.xlu1 %989 }
 0x268   :  { %3772 = vmatprep.subr.mxu0 %v4289_v48  ;;  %3807 = vmatprep.subr.mxu1 %v4289_v48 }
 0x269   :  { %3773 = vmatpush3.msra.mxu0 %v2923_v57  ;;  %3808 = vmatpush3.msra.mxu1 %v2958_v26  ;;  %v3026_v57 = vld [vmem:[%s7618_s29 + $0x280] sm:$0xff]  ;;  %v825_v26 = vmax.f32 %v822_v35, %v824_v42  ;;  %v3075_v35 = vld [vmem:[%s7618_s29 + $0x370] sm:$0xff]  ;;  %v3177_v42 = vld [vmem:[%s7618_s29 + $0x4d8] sm:$0xff] }
 0x26a   :  { %3774 = vmatprep.subr.mxu0 %v4289_v48  ;;  %3809 = vmatprep.subr.mxu1 %v4289_v48 }
 0x26b   :  { %3775 = vmatpush3.msra.mxu0 %v2922_v10  ;;  %3810 = vmatpush3.msra.mxu1 %v2957_v30  ;;  %v991_v10 = vmax.f32 %v988_v33, %v990_v32  ;;  %v3076_v30 = vld [vmem:[%s7618_s29 + $0x378] sm:$0xff]  ;;  %v3074_v33 = vld [vmem:[%s7618_s29 + $0x368] sm:$0xff]  ;;  %v3176_v32 = vld [vmem:[%s7618_s29 + $0x4d0] sm:$0xff] }
 0x26c   :  { %3776 = vmatprep.subr.mxu0 %v4289_v48  ;;  %3811 = vmatprep.subr.mxu1 %v4289_v48 }
 0x26d   :  { %3777 = vmatpush3.msra.mxu0 %v2921_v28  ;;  %3778 = vmatprep.mubr.msk.f32.mxu0 %vm4290_vm2, %v4289_v48  ;;  %v3073_v28 = vld [vmem:[%s7618_s29 + $0x360] sm:$0xff] }
 0x26e   :  { %3812 = vmatpush3.msra.mxu1 %v2956_v24  ;;  %3813 = vmatprep.mubr.msk.f32.mxu1 %vm4290_vm2, %v4289_v48  ;;  %v3072_v24 = vld [vmem:[%s7618_s29 + $0x358] sm:$0xff] }
 0x26f   :  { %3779 = vmatmul.mubr.f32.vlgmr.msra.gmra.mxu0 %v493_v11  ;;  %3814 = vmatmul.mubr.f32.vlgmr.msra.gmra.mxu1 %v659_v23  ;;  %v3107_v11 = vld [vmem:[%s7618_s29 + $0x3d8] sm:$0xff]  ;;  %v3071_v23 = vld [vmem:[%s7618_s29 + $0x350] sm:$0xff] }
 0x270   :  { %3816 = vmatprep.subr.mxu0 %v4289_v48  ;;  %3851 = vmatprep.subr.mxu1 %v4289_v48 }
 0x271   :  { %3817 = vmatpush3.msra.mxu0 %v3006_v21  ;;  %3852 = vmatpush3.msra.mxu1 %v3041_v15  ;;  %v3106_v21 = vld [vmem:[%s7618_s29 + $0x3d0] sm:$0xff]  ;;  %v3070_v15 = vld [vmem:[%s7618_s29 + $0x348] sm:$0xff] }
 0x272   :  { %3818 = vmatprep.subr.mxu0 %v4289_v48  ;;  %3853 = vmatprep.subr.mxu1 %v4289_v48 }
 0x273   :  { %3819 = vmatpush3.msra.mxu0 %v3005_v58  ;;  %3854 = vmatpush3.msra.mxu1 %v3040_v51  ;;  %v3105_v58 = vld [vmem:[%s7618_s29 + $0x3c8] sm:$0xff]  ;;  %v3069_v51 = vld [vmem:[%s7618_s29 + $0x340] sm:$0xff] }
 0x274   :  { %3820 = vmatprep.subr.mxu0 %v4289_v48  ;;  %3855 = vmatprep.subr.mxu1 %v4289_v48 }
 0x275   :  { %3821 = vmatpush3.msra.mxu0 %v3004_v7  ;;  %3856 = vmatpush3.msra.mxu1 %v3039_v37  ;;  %v3104_v7 = vld [vmem:[%s7618_s29 + $0x3c0] sm:$0xff]  ;;  %v3068_v37 = vld [vmem:[%s7618_s29 + $0x338] sm:$0xff] }
 0x276   :  { %3822 = vmatprep.subr.mxu0 %v4289_v48  ;;  %3857 = vmatprep.subr.mxu1 %v4289_v48 }
 0x277   :  { %3823 = vmatpush3.msra.mxu0 %v3003_v50  ;;  %3858 = vmatpush3.msra.mxu1 %v3038_v16  ;;  %v3103_v50 = vld [vmem:[%s7618_s29 + $0x3b8] sm:$0xff]  ;;  %v3067_v16 = vld [vmem:[%s7618_s29 + $0x330] sm:$0xff] }
 0x278   :  { %3824 = vmatprep.subr.mxu0 %v4289_v48  ;;  %3859 = vmatprep.subr.mxu1 %v4289_v48 }
 0x279   :  { %3825 = vmatpush3.msra.mxu0 %v3002_v14  ;;  %3860 = vmatpush3.msra.mxu1 %v3037_v6  ;;  %v3102_v14 = vld [vmem:[%s7618_s29 + $0x3b0] sm:$0xff]  ;;  %v3066_v6 = vld [vmem:[%s7618_s29 + $0x328] sm:$0xff] }
 0x27a   :  { %3826 = vmatprep.subr.mxu0 %v4289_v48  ;;  %3861 = vmatprep.subr.mxu1 %v4289_v48 }
 0x27b   :  { %3827 = vmatpush3.msra.mxu0 %v3001_v18  ;;  %3862 = vmatpush3.msra.mxu1 %v3036_v5  ;;  %v3101_v18 = vld [vmem:[%s7618_s29 + $0x3a8] sm:$0xff]  ;;  %v3065_v5 = vld [vmem:[%s7618_s29 + $0x320] sm:$0xff] }
 0x27c   :  { %3828 = vmatprep.subr.mxu0 %v4289_v48  ;;  %3863 = vmatprep.subr.mxu1 %v4289_v48 }
 0x27d   :  { %3829 = vmatpush3.msra.mxu0 %v3000_v17  ;;  %3864 = vmatpush3.msra.mxu1 %v3035_v36  ;;  %v3100_v17 = vld [vmem:[%s7618_s29 + $0x3a0] sm:$0xff]  ;;  %v3064_v36 = vld [vmem:[%s7618_s29 + $0x318] sm:$0xff] }
 0x27e   :  { %3830 = vmatprep.subr.mxu0 %v4289_v48  ;;  %3865 = vmatprep.subr.mxu1 %v4289_v48 }
 0x27f   :  { %3831 = vmatpush3.msra.mxu0 %v2999_v2  ;;  %3866 = vmatpush3.msra.mxu1 %v3034_v4  ;;  %v3099_v2 = vld [vmem:[%s7618_s29 + $0x398] sm:$0xff]  ;;  %v3063_v4 = vld [vmem:[%s7618_s29 + $0x310] sm:$0xff] }
 0x280   :  { %3832 = vmatprep.subr.mxu0 %v4289_v48  ;;  %3867 = vmatprep.subr.mxu1 %v4289_v48 }
 0x281   :  { %3833 = vmatpush3.msra.mxu0 %v2998_v12  ;;  %3868 = vmatpush3.msra.mxu1 %v3033_v8  ;;  %v3098_v12 = vld [vmem:[%s7618_s29 + $0x390] sm:$0xff]  ;;  %v3062_v8 = vld [vmem:[%s7618_s29 + $0x308] sm:$0xff] }
 0x282   :  { %3834 = vmatprep.subr.mxu0 %v4289_v48  ;;  %3869 = vmatprep.subr.mxu1 %v4289_v48 }
 0x283   :  { %3835 = vmatpush3.msra.mxu0 %v2997_v43  ;;  %3870 = vmatpush3.msra.mxu1 %v3032_v25  ;;  %v3097_v43 = vld [vmem:[%s7618_s29 + $0x388] sm:$0xff]  ;;  %v1156_v25 = vpop.permute.xlu0 %1155 }
 0x284   :  { %3836 = vmatprep.subr.mxu0 %v4289_v48  ;;  %3871 = vmatprep.subr.mxu1 %v4289_v48 }
 0x285   :  { %3837 = vmatpush3.msra.mxu0 %v2996_v47  ;;  %3872 = vmatpush3.msra.mxu1 %v3031_v20  ;;  %v3061_v47 = vld [vmem:[%s7618_s29 + $0x300] sm:$0xff]  ;;  %v1322_v20 = vpop.permute.xlu1 %1321 }
 0x286   :  { %3838 = vmatprep.subr.mxu0 %v4289_v48  ;;  %3873 = vmatprep.subr.mxu1 %v4289_v48 }
 0x287   :  { %3839 = vmatpush3.msra.mxu0 %v2995_v3  ;;  %3874 = vmatpush3.msra.mxu1 %v3030_v19  ;;  %v3096_v3 = vld [vmem:[%s7618_s29 + $0x380] sm:$0xff]  ;;  %v1157_v19 = vmax.f32 %v1154_v29, %v1156_v25  ;;  %v3145_v29 = vld [vmem:[%s7618_s29 + $0x470] sm:$0xff] }
 0x288   :  { %3840 = vmatprep.subr.mxu0 %v4289_v48  ;;  %3875 = vmatprep.subr.mxu1 %v4289_v48  ;;  %v3246_v25 = vld [vmem:[%s7618_s29 + $0x5d0] sm:$0xff] }
 0x289   :  { %3841 = vmatpush3.msra.mxu0 %v2994_v41  ;;  %3876 = vmatpush3.msra.mxu1 %v3029_v1  ;;  %v1323_v41 = vmax.f32 %v1320_v13, %v1322_v20  ;;  %v3146_v1 = vld [vmem:[%s7618_s29 + $0x478] sm:$0xff]  ;;  %v3144_v13 = vld [vmem:[%s7618_s29 + $0x468] sm:$0xff] }
 0x28a   :  { %3842 = vmatprep.subr.mxu0 %v4289_v48  ;;  %3877 = vmatprep.subr.mxu1 %v4289_v48  ;;  %v3245_v20 = vld [vmem:[%s7618_s29 + $0x5c8] sm:$0xff] }
 0x28b   :  { %3843 = vmatpush3.msra.mxu0 %v2993_v56  ;;  %3878 = vmatpush3.msra.mxu1 %v3028_v55  ;;  %v3179_v56 = vld [vmem:[%s7618_s29 + $0x4e8] sm:$0xff]  ;;  %v3143_v55 = vld [vmem:[%s7618_s29 + $0x460] sm:$0xff] }
 0x28c   :  { %3844 = vmatprep.subr.mxu0 %v4289_v48  ;;  %3879 = vmatprep.subr.mxu1 %v4289_v48 }
 0x28d   :  { %3845 = vmatpush3.msra.mxu0 %v2992_v39  ;;  %3880 = vmatpush3.msra.mxu1 %v3027_v59  ;;  %v3178_v39 = vld [vmem:[%s7618_s29 + $0x4e0] sm:$0xff]  ;;  %v3142_v59 = vld [vmem:[%s7618_s29 + $0x458] sm:$0xff] }
 0x28e   :  { %3846 = vmatprep.subr.mxu0 %v4289_v48  ;;  %3881 = vmatprep.subr.mxu1 %v4289_v48 }
 0x28f   :  { %3847 = vmatpush3.msra.mxu0 %v2991_v40  ;;  %3848 = vmatprep.mubr.msk.f32.mxu0 %vm4290_vm2, %v4289_v48  ;;  %v3141_v40 = vld [vmem:[%s7618_s29 + $0x450] sm:$0xff] }
 0x290   :  { %3882 = vmatpush3.msra.mxu1 %v3026_v57  ;;  %3883 = vmatprep.mubr.msk.f32.mxu1 %vm4290_vm2, %v4289_v48  ;;  %v3140_v57 = vld [vmem:[%s7618_s29 + $0x448] sm:$0xff] }
 0x291   :  { %3849 = vmatmul.mubr.f32.vlgmr.msra.gmra.mxu0 %v825_v26  ;;  %3884 = vmatmul.mubr.f32.vlgmr.msra.gmra.mxu1 %v991_v10  ;;  %v3175_v26 = vld [vmem:[%s7618_s29 + $0x4c8] sm:$0xff]  ;;  %v3139_v10 = vld [vmem:[%s7618_s29 + $0x440] sm:$0xff] }
 0x292   :  { %3886 = vmatprep.subr.mxu0 %v4289_v48  ;;  %3921 = vmatprep.subr.mxu1 %v4289_v48 }
 0x293   :  { %3887 = vmatpush3.msra.mxu0 %v3076_v30  ;;  %3922 = vmatpush3.msra.mxu1 %v3111_v49  ;;  %v3174_v30 = vld [vmem:[%s7618_s29 + $0x4c0] sm:$0xff]  ;;  %v3138_v49 = vld [vmem:[%s7618_s29 + $0x438] sm:$0xff] }
 0x294   :  { %3888 = vmatprep.subr.mxu0 %v4289_v48  ;;  %3923 = vmatprep.subr.mxu1 %v4289_v48 }
 0x295   :  { %3889 = vmatpush3.msra.mxu0 %v3075_v35  ;;  %3924 = vmatpush3.msra.mxu1 %v3110_v45  ;;  %v3173_v35 = vld [vmem:[%s7618_s29 + $0x4b8] sm:$0xff]  ;;  %v3137_v45 = vld [vmem:[%s7618_s29 + $0x430] sm:$0xff] }
 0x296   :  { %3890 = vmatprep.subr.mxu0 %v4289_v48  ;;  %3925 = vmatprep.subr.mxu1 %v4289_v48 }
 0x297   :  { %3891 = vmatpush3.msra.mxu0 %v3074_v33  ;;  %3926 = vmatpush3.msra.mxu1 %v3109_v27  ;;  %v3172_v33 = vld [vmem:[%s7618_s29 + $0x4b0] sm:$0xff]  ;;  %v3136_v27 = vld [vmem:[%s7618_s29 + $0x428] sm:$0xff] }
 0x298   :  { %3892 = vmatprep.subr.mxu0 %v4289_v48  ;;  %3927 = vmatprep.subr.mxu1 %v4289_v48 }
 0x299   :  { %3893 = vmatpush3.msra.mxu0 %v3073_v28  ;;  %3928 = vmatpush3.msra.mxu1 %v3108_v0  ;;  %v3171_v28 = vld [vmem:[%s7618_s29 + $0x4a8] sm:$0xff]  ;;  %v3135_v0 = vld [vmem:[%s7618_s29 + $0x420] sm:$0xff] }
 0x29a   :  { %3894 = vmatprep.subr.mxu0 %v4289_v48  ;;  %3929 = vmatprep.subr.mxu1 %v4289_v48 }
 0x29b   :  { %3895 = vmatpush3.msra.mxu0 %v3072_v24  ;;  %3930 = vmatpush3.msra.mxu1 %v3107_v11  ;;  %v3170_v24 = vld [vmem:[%s7618_s29 + $0x4a0] sm:$0xff]  ;;  %v3134_v11 = vld [vmem:[%s7618_s29 + $0x418] sm:$0xff] }
 0x29c   :  { %3896 = vmatprep.subr.mxu0 %v4289_v48  ;;  %3931 = vmatprep.subr.mxu1 %v4289_v48 }
 0x29d   :  { %3897 = vmatpush3.msra.mxu0 %v3071_v23  ;;  %3932 = vmatpush3.msra.mxu1 %v3106_v21  ;;  %v3169_v23 = vld [vmem:[%s7618_s29 + $0x498] sm:$0xff]  ;;  %v3133_v21 = vld [vmem:[%s7618_s29 + $0x410] sm:$0xff] }
 0x29e   :  { %3898 = vmatprep.subr.mxu0 %v4289_v48  ;;  %3933 = vmatprep.subr.mxu1 %v4289_v48 }
 0x29f   :  { %3899 = vmatpush3.msra.mxu0 %v3070_v15  ;;  %3934 = vmatpush3.msra.mxu1 %v3105_v58  ;;  %v3168_v15 = vld [vmem:[%s7618_s29 + $0x490] sm:$0xff]  ;;  %v3132_v58 = vld [vmem:[%s7618_s29 + $0x408] sm:$0xff] }
 0x2a0   :  { %3900 = vmatprep.subr.mxu0 %v4289_v48  ;;  %3935 = vmatprep.subr.mxu1 %v4289_v48 }
 0x2a1   :  { %3901 = vmatpush3.msra.mxu0 %v3069_v51  ;;  %3936 = vmatpush3.msra.mxu1 %v3104_v7  ;;  %v3167_v51 = vld [vmem:[%s7618_s29 + $0x488] sm:$0xff]  ;;  %v1488_v7 = vpop.permute.xlu0 %1487 }
 0x2a2   :  { %3902 = vmatprep.subr.mxu0 %v4289_v48  ;;  %3937 = vmatprep.subr.mxu1 %v4289_v48 }
 0x2a3   :  { %3903 = vmatpush3.msra.mxu0 %v3068_v37  ;;  %3938 = vmatpush3.msra.mxu1 %v3103_v50  ;;  %v3131_v37 = vld [vmem:[%s7618_s29 + $0x400] sm:$0xff]  ;;  %v1654_v50 = vpop.permute.xlu1 %1653 }
 0x2a4   :  { %3904 = vmatprep.subr.mxu0 %v4289_v48  ;;  %3939 = vmatprep.subr.mxu1 %v4289_v48 }
 0x2a5   :  { %3905 = vmatpush3.msra.mxu0 %v3067_v16  ;;  %3940 = vmatpush3.msra.mxu1 %v3102_v14  ;;  %v3166_v16 = vld [vmem:[%s7618_s29 + $0x480] sm:$0xff]  ;;  %v1489_v14 = vmax.f32 %v1486_v61, %v1488_v7  ;;  %v3215_v61 = vld [vmem:[%s7618_s29 + $0x570] sm:$0xff] }
 0x2a6   :  { %3906 = vmatprep.subr.mxu0 %v4289_v48  ;;  %3941 = vmatprep.subr.mxu1 %v4289_v48  ;;  %v3316_v7 = vld [vmem:[%s7618_s29 + $0x6d0] sm:$0xff] }
 0x2a7   :  { %3907 = vmatpush3.msra.mxu0 %v3066_v6  ;;  %3942 = vmatpush3.msra.mxu1 %v3101_v18  ;;  %v7620_v6 = vmax.f32 %v5670_v54, 0.0  ;;  %v3250_v54 = vld [vmem:[%s7618_s29 + $0x5f0] sm:$0xff] }
 0x2a8   :  { %3908 = vmatprep.subr.mxu0 %v4289_v48  ;;  %3943 = vmatprep.subr.mxu1 %v4289_v48 }
 0x2a9   :  { %3909 = vmatpush3.msra.mxu0 %v3065_v5  ;;  %3944 = vmatpush3.msra.mxu1 %v3100_v17  ;;  %v1655_v18 = vmax.f32 %v7620_v6, %v1654_v50  ;;  %v3216_v5 = vld [vmem:[%s7618_s29 + $0x578] sm:$0xff]  ;;  %v3214_v17 = vld [vmem:[%s7618_s29 + $0x568] sm:$0xff] }
 0x2aa   :  { %3910 = vmatprep.subr.mxu0 %v4289_v48  ;;  %3945 = vmatprep.subr.mxu1 %v4289_v48  ;;  %v3315_v50 = vld [vmem:[%s7618_s29 + $0x6c8] sm:$0xff]  ;;  %v3278_v6 = vld [vmem:[%s7618_s29 + $0x638] sm:$0xff] }
 0x2ab   :  { %3911 = vmatpush3.msra.mxu0 %v3064_v36  ;;  %3946 = vmatpush3.msra.mxu1 %v3099_v2  ;;  %v3249_v36 = vld [vmem:[%s7618_s29 + $0x5e8] sm:$0xff]  ;;  %v3213_v2 = vld [vmem:[%s7618_s29 + $0x560] sm:$0xff] }
 0x2ac   :  { %3912 = vmatprep.subr.mxu0 %v4289_v48  ;;  %3947 = vmatprep.subr.mxu1 %v4289_v48 }
 0x2ad   :  { %3913 = vmatpush3.msra.mxu0 %v3063_v4  ;;  %3948 = vmatpush3.msra.mxu1 %v3098_v12  ;;  %v3248_v4 = vld [vmem:[%s7618_s29 + $0x5e0] sm:$0xff]  ;;  %v3212_v12 = vld [vmem:[%s7618_s29 + $0x558] sm:$0xff] }
 0x2ae   :  { %3914 = vmatprep.subr.mxu0 %v4289_v48  ;;  %3949 = vmatprep.subr.mxu1 %v4289_v48 }
 0x2af   :  { %3915 = vmatpush3.msra.mxu0 %v3062_v8  ;;  %3950 = vmatpush3.msra.mxu1 %v3097_v43  ;;  %v3247_v8 = vld [vmem:[%s7618_s29 + $0x5d8] sm:$0xff]  ;;  %v3211_v43 = vld [vmem:[%s7618_s29 + $0x550] sm:$0xff] }
 0x2b0   :  { %3916 = vmatprep.subr.mxu0 %v4289_v48  ;;  %3951 = vmatprep.subr.mxu1 %v4289_v48 }
 0x2b1   :  { %3917 = vmatpush3.msra.mxu0 %v3061_v47  ;;  %3918 = vmatprep.mubr.msk.f32.mxu0 %vm4290_vm2, %v4289_v48  ;;  %v3210_v47 = vld [vmem:[%s7618_s29 + $0x548] sm:$0xff] }
 0x2b2   :  { %3952 = vmatpush3.msra.mxu1 %v3096_v3  ;;  %3953 = vmatprep.mubr.msk.f32.mxu1 %vm4290_vm2, %v4289_v48  ;;  %v3209_v3 = vld [vmem:[%s7618_s29 + $0x540] sm:$0xff] }
 0x2b3   :  { %3919 = vmatmul.mubr.f32.vlgmr.msra.gmra.mxu0 %v1157_v19  ;;  %3954 = vmatmul.mubr.f32.vlgmr.msra.gmra.mxu1 %v1323_v41  ;;  %v3244_v19 = vld [vmem:[%s7618_s29 + $0x5c0] sm:$0xff]  ;;  %v3208_v41 = vld [vmem:[%s7618_s29 + $0x538] sm:$0xff] }
 0x2b4   :  { %3956 = vmatprep.subr.mxu0 %v4289_v48  ;;  %3991 = vmatprep.subr.mxu1 %v4289_v48 }
 0x2b5   :  { %3957 = vmatpush3.msra.mxu0 %v3146_v1  ;;  %3992 = vmatpush3.msra.mxu1 %v3181_v34  ;;  %v3243_v1 = vld [vmem:[%s7618_s29 + $0x5b8] sm:$0xff]  ;;  %v3207_v34 = vld [vmem:[%s7618_s29 + $0x530] sm:$0xff] }
 0x2b6   :  { %3958 = vmatprep.subr.mxu0 %v4289_v48  ;;  %3993 = vmatprep.subr.mxu1 %v4289_v48 }
 0x2b7   :  { %3959 = vmatpush3.msra.mxu0 %v3145_v29  ;;  %3994 = vmatpush3.msra.mxu1 %v3180_v46  ;;  %v3242_v29 = vld [vmem:[%s7618_s29 + $0x5b0] sm:$0xff]  ;;  %v3206_v46 = vld [vmem:[%s7618_s29 + $0x528] sm:$0xff] }
 0x2b8   :  { %3960 = vmatprep.subr.mxu0 %v4289_v48  ;;  %3995 = vmatprep.subr.mxu1 %v4289_v48 }
 0x2b9   :  { %3961 = vmatpush3.msra.mxu0 %v3144_v13  ;;  %3996 = vmatpush3.msra.mxu1 %v3179_v56  ;;  %v3241_v13 = vld [vmem:[%s7618_s29 + $0x5a8] sm:$0xff]  ;;  %v3205_v56 = vld [vmem:[%s7618_s29 + $0x520] sm:$0xff] }
 0x2ba   :  { %3962 = vmatprep.subr.mxu0 %v4289_v48  ;;  %3997 = vmatprep.subr.mxu1 %v4289_v48 }
 0x2bb   :  { %3963 = vmatpush3.msra.mxu0 %v3143_v55  ;;  %3998 = vmatpush3.msra.mxu1 %v3178_v39  ;;  %v3240_v55 = vld [vmem:[%s7618_s29 + $0x5a0] sm:$0xff]  ;;  %v3204_v39 = vld [vmem:[%s7618_s29 + $0x518] sm:$0xff] }
 0x2bc   :  { %3964 = vmatprep.subr.mxu0 %v4289_v48  ;;  %3999 = vmatprep.subr.mxu1 %v4289_v48 }
 0x2bd   :  { %3965 = vmatpush3.msra.mxu0 %v3142_v59  ;;  %4000 = vmatpush3.msra.mxu1 %v3177_v42  ;;  %v3239_v59 = vld [vmem:[%s7618_s29 + $0x598] sm:$0xff]  ;;  %v3203_v42 = vld [vmem:[%s7618_s29 + $0x510] sm:$0xff] }
 0x2be   :  { %3966 = vmatprep.subr.mxu0 %v4289_v48  ;;  %4001 = vmatprep.subr.mxu1 %v4289_v48 }
 0x2bf   :  { %3967 = vmatpush3.msra.mxu0 %v3141_v40  ;;  %4002 = vmatpush3.msra.mxu1 %v3176_v32  ;;  %v3238_v40 = vld [vmem:[%s7618_s29 + $0x590] sm:$0xff]  ;;  %v3202_v32 = vld [vmem:[%s7618_s29 + $0x508] sm:$0xff] }
 0x2c0   :  { %3968 = vmatprep.subr.mxu0 %v4289_v48  ;;  %4003 = vmatprep.subr.mxu1 %v4289_v48 }
 0x2c1   :  { %3969 = vmatpush3.msra.mxu0 %v3140_v57  ;;  %4004 = vmatpush3.msra.mxu1 %v3175_v26  ;;  %v3237_v57 = vld [vmem:[%s7618_s29 + $0x588] sm:$0xff]  ;;  %v1820_v26 = vpop.permute.xlu0 %1819 }
 0x2c2   :  { %3970 = vmatprep.subr.mxu0 %v4289_v48  ;;  %4005 = vmatprep.subr.mxu1 %v4289_v48 }
 0x2c3   :  { %3971 = vmatpush3.msra.mxu0 %v3139_v10  ;;  %4006 = vmatpush3.msra.mxu1 %v3174_v30  ;;  %v3201_v10 = vld [vmem:[%s7618_s29 + $0x500] sm:$0xff]  ;;  %v1986_v30 = vpop.permute.xlu1 %1985 }
 0x2c4   :  { %3972 = vmatprep.subr.mxu0 %v4289_v48  ;;  %4007 = vmatprep.subr.mxu1 %v4289_v48 }
 0x2c5   :  { %3973 = vmatpush3.msra.mxu0 %v3138_v49  ;;  %4008 = vmatpush3.msra.mxu1 %v3173_v35  ;;  %v3236_v49 = vld [vmem:[%s7618_s29 + $0x580] sm:$0xff]  ;;  %v7621_v35 = vmax.f32 %v5741_v60, 0.0  ;;  %v3321_v60 = vld [vmem:[%s7618_s29 + $0x6f8] sm:$0xff] }
 0x2c6   :  { %3974 = vmatprep.subr.mxu0 %v4289_v48  ;;  %4009 = vmatprep.subr.mxu1 %v4289_v48 }
 0x2c7   :  { %3975 = vmatpush3.msra.mxu0 %v3137_v45  ;;  %4010 = vmatpush3.msra.mxu1 %v3172_v33  ;;  %v1821_v45 = vmax.f32 %v7621_v35, %v1820_v26  ;;  %v7622_v33 = vmax.f32 %v5812_v52, 0.0  ;;  %v3285_v52 = vld [vmem:[%s7618_s29 + $0x670] sm:$0xff]  ;;  %v3387_v26 = vld [vmem:[%s7618_s29 + $0x7d8] sm:$0xff]  ;;  %v3385_v35 = vld [vmem:[%s7618_s29 + $0x7c8] sm:$0xff] }
 0x2c8   :  { %3976 = vmatprep.subr.mxu0 %v4289_v48  ;;  %4011 = vmatprep.subr.mxu1 %v4289_v48 }
 0x2c9   :  { %3977 = vmatpush3.msra.mxu0 %v3136_v27  ;;  %4012 = vmatpush3.msra.mxu1 %v3171_v28  ;;  %v1987_v27 = vmax.f32 %v7622_v33, %v1986_v30  ;;  %v3286_v28 = vld [vmem:[%s7618_s29 + $0x678] sm:$0xff]  ;;  %v3386_v30 = vld [vmem:[%s7618_s29 + $0x7d0] sm:$0xff]  ;;  %v3384_v33 = vld [vmem:[%s7618_s29 + $0x7c0] sm:$0xff] }
 0x2ca   :  { %3978 = vmatprep.subr.mxu0 %v4289_v48  ;;  %4013 = vmatprep.subr.mxu1 %v4289_v48 }
 0x2cb   :  { %3979 = vmatpush3.msra.mxu0 %v3135_v0  ;;  %4014 = vmatpush3.msra.mxu1 %v3170_v24  ;;  %v3320_v0 = vld [vmem:[%s7618_s29 + $0x6f0] sm:$0xff]  ;;  %v3284_v24 = vld [vmem:[%s7618_s29 + $0x668] sm:$0xff] }
 0x2cc   :  { %3980 = vmatprep.subr.mxu0 %v4289_v48  ;;  %4015 = vmatprep.subr.mxu1 %v4289_v48 }
 0x2cd   :  { %3981 = vmatpush3.msra.mxu0 %v3134_v11  ;;  %4016 = vmatpush3.msra.mxu1 %v3169_v23  ;;  %v3319_v11 = vld [vmem:[%s7618_s29 + $0x6e8] sm:$0xff]  ;;  %v3283_v23 = vld [vmem:[%s7618_s29 + $0x660] sm:$0xff] }
 0x2ce   :  { %3982 = vmatprep.subr.mxu0 %v4289_v48  ;;  %4017 = vmatprep.subr.mxu1 %v4289_v48 }
 0x2cf   :  { %3983 = vmatpush3.msra.mxu0 %v3133_v21  ;;  %4018 = vmatpush3.msra.mxu1 %v3168_v15  ;;  %v3318_v21 = vld [vmem:[%s7618_s29 + $0x6e0] sm:$0xff]  ;;  %v3282_v15 = vld [vmem:[%s7618_s29 + $0x658] sm:$0xff] }
 0x2d0   :  { %3984 = vmatprep.subr.mxu0 %v4289_v48  ;;  %4019 = vmatprep.subr.mxu1 %v4289_v48 }
 0x2d1   :  { %3985 = vmatpush3.msra.mxu0 %v3132_v58  ;;  %4020 = vmatpush3.msra.mxu1 %v3167_v51  ;;  %v3317_v58 = vld [vmem:[%s7618_s29 + $0x6d8] sm:$0xff]  ;;  %v3281_v51 = vld [vmem:[%s7618_s29 + $0x650] sm:$0xff] }
 0x2d2   :  { %3986 = vmatprep.subr.mxu0 %v4289_v48  ;;  %4021 = vmatprep.subr.mxu1 %v4289_v48 }
 0x2d3   :  { %3987 = vmatpush3.msra.mxu0 %v3131_v37  ;;  %3988 = vmatprep.mubr.msk.f32.mxu0 %vm4290_vm2, %v4289_v48  ;;  %v3280_v37 = vld [vmem:[%s7618_s29 + $0x648] sm:$0xff] }
 0x2d4   :  { %4022 = vmatpush3.msra.mxu1 %v3166_v16  ;;  %4023 = vmatprep.mubr.msk.f32.mxu1 %vm4290_vm2, %v4289_v48  ;;  %v3279_v16 = vld [vmem:[%s7618_s29 + $0x640] sm:$0xff] }
 0x2d5   :  { %3989 = vmatmul.mubr.f32.vlgmr.msra.gmra.mxu0 %v1489_v14  ;;  %4024 = vmatmul.mubr.f32.vlgmr.msra.gmra.mxu1 %v1655_v18  ;;  %v3314_v14 = vld [vmem:[%s7618_s29 + $0x6c0] sm:$0xff]  ;;  %v3313_v18 = vld [vmem:[%s7618_s29 + $0x6b8] sm:$0xff] }
 0x2d6   :  { %4026 = vmatprep.subr.mxu0 %v4289_v48  ;;  %4061 = vmatprep.subr.mxu1 %v4289_v48 }
 0x2d7   :  { %4027 = vmatpush3.msra.mxu0 %v3216_v5  ;;  %4062 = vmatpush3.msra.mxu1 %v3251_v9  ;;  %v3277_v5 = vld [vmem:[%s7618_s29 + $0x630] sm:$0xff] }
 0x2d8   :  { %4028 = vmatprep.subr.mxu0 %v4289_v48  ;;  %4063 = vmatprep.subr.mxu1 %v4289_v48  ;;  %v3312_v9 = vld [vmem:[%s7618_s29 + $0x6b0] sm:$0xff] }
 0x2d9   :  { %4029 = vmatpush3.msra.mxu0 %v3215_v61  ;;  %4064 = vmatpush3.msra.mxu1 %v3250_v54  ;;  %v3276_v61 = vld [vmem:[%s7618_s29 + $0x628] sm:$0xff] }
 0x2da   :  { %4030 = vmatprep.subr.mxu0 %v4289_v48  ;;  %4065 = vmatprep.subr.mxu1 %v4289_v48  ;;  %v3311_v54 = vld [vmem:[%s7618_s29 + $0x6a8] sm:$0xff] }
 0x2db   :  { %4031 = vmatpush3.msra.mxu0 %v3214_v17  ;;  %4066 = vmatpush3.msra.mxu1 %v3249_v36  ;;  %v3275_v17 = vld [vmem:[%s7618_s29 + $0x620] sm:$0xff] }
 0x2dc   :  { %4032 = vmatprep.subr.mxu0 %v4289_v48  ;;  %4067 = vmatprep.subr.mxu1 %v4289_v48  ;;  %v3310_v36 = vld [vmem:[%s7618_s29 + $0x6a0] sm:$0xff] }
 0x2dd   :  { %4033 = vmatpush3.msra.mxu0 %v3213_v2  ;;  %4068 = vmatpush3.msra.mxu1 %v3248_v4  ;;  %v3274_v2 = vld [vmem:[%s7618_s29 + $0x618] sm:$0xff] }
 0x2de   :  { %4034 = vmatprep.subr.mxu0 %v4289_v48  ;;  %4069 = vmatprep.subr.mxu1 %v4289_v48 }
 0x2df   :  { %4035 = vmatpush3.msra.mxu0 %v3212_v12  ;;  %4070 = vmatpush3.msra.mxu1 %v3247_v8  ;;  %v3309_v8 = vld [vmem:[%s7618_s29 + $0x698] sm:$0xff] }
 0x2e0   :  { %4036 = vmatprep.subr.mxu0 %v4289_v48  ;;  %4071 = vmatprep.subr.mxu1 %v4289_v48 }
 0x2e1   :  { %4037 = vmatpush3.msra.mxu0 %v3211_v43  ;;  %4072 = vmatpush3.msra.mxu1 %v3246_v25  ;;  %v3273_v25 = vld [vmem:[%s7618_s29 + $0x610] sm:$0xff] }
 0x2e2   :  { %4038 = vmatprep.subr.mxu0 %v4289_v48  ;;  %4073 = vmatprep.subr.mxu1 %v4289_v48 }
 0x2e3   :  { %4039 = vmatpush3.msra.mxu0 %v3210_v47  ;;  %4074 = vmatpush3.msra.mxu1 %v3245_v20 }
 0x2e4   :  { %4040 = vmatprep.subr.mxu0 %v4289_v48  ;;  %4075 = vmatprep.subr.mxu1 %v4289_v48 }
 0x2e5   :  { %4041 = vmatpush3.msra.mxu0 %v3209_v3  ;;  %4076 = vmatpush3.msra.mxu1 %v3244_v19  ;;  %v3308_v3 = vld [vmem:[%s7618_s29 + $0x690] sm:$0xff]  ;;  %v3272_v19 = vld [vmem:[%s7618_s29 + $0x608] sm:$0xff] }
 0x2e6   :  { %4042 = vmatprep.subr.mxu0 %v4289_v48  ;;  %4077 = vmatprep.subr.mxu1 %v4289_v48 }
 0x2e7   :  { %4043 = vmatpush3.msra.mxu0 %v3208_v41  ;;  %4078 = vmatpush3.msra.mxu1 %v3243_v1  ;;  %v3307_v41 = vld [vmem:[%s7618_s29 + $0x688] sm:$0xff]  ;;  %v2152_v1 = vpop.permute.xlu0 %2151 }
 0x2e8   :  { %4044 = vmatprep.subr.mxu0 %v4289_v48  ;;  %4079 = vmatprep.subr.mxu1 %v4289_v48 }
 0x2e9   :  { %4045 = vmatpush3.msra.mxu0 %v3207_v34  ;;  %4080 = vmatpush3.msra.mxu1 %v3242_v29  ;;  %v3271_v34 = vld [vmem:[%s7618_s29 + $0x600] sm:$0xff]  ;;  %v2318_v29 = vpop.permute.xlu1 %2317 }
 0x2ea   :  { %4046 = vmatprep.subr.mxu0 %v4289_v48  ;;  %4081 = vmatprep.subr.mxu1 %v4289_v48 }
 0x2eb   :  { %4047 = vmatpush3.msra.mxu0 %v3206_v46  ;;  %4082 = vmatpush3.msra.mxu1 %v3241_v13  ;;  %v3306_v46 = vld [vmem:[%s7618_s29 + $0x680] sm:$0xff]  ;;  %v7623_v13 = vmax.f32 %v5925_v31, 0.0  ;;  %v3391_v31 = vld [vmem:[%s7618_s29 + $0x7f8] sm:$0xff] }
 0x2ec   :  { %4048 = vmatprep.subr.mxu0 %v4289_v48  ;;  %4083 = vmatprep.subr.mxu1 %v4289_v48 }
 0x2ed   :  { %4049 = vmatpush3.msra.mxu0 %v3205_v56  ;;  %4084 = vmatpush3.msra.mxu1 %v3240_v55  ;;  %v2153_v56 = vmax.f32 %v7623_v13, %v2152_v1  ;;  %v2319_v55 = vmax.f32 %v2316_v63, %v2318_v29  ;;  %v3390_v63 = vld [vmem:[%s7618_s29 + $0x7f0] sm:$0xff]  ;;  %v2752_v29 = vld [vmem:[%s7624_s16 + $0x18] sm:$0xff]  ;;  %v2750_v13 = vld [vmem:[%s7624_s16 + $0x8] sm:$0xff] }
 0x2ee   :  { %4050 = vmatprep.subr.mxu0 %v4289_v48  ;;  %4085 = vmatprep.subr.mxu1 %v4289_v48 }
 0x2ef   :  { %4051 = vmatpush3.msra.mxu0 %v3204_v39  ;;  %4086 = vmatpush3.msra.mxu1 %v3239_v59  ;;  %v3356_v39 = vld [vmem:[%s7618_s29 + $0x778] sm:$0xff]  ;;  %v3354_v59 = vld [vmem:[%s7618_s29 + $0x768] sm:$0xff] }
 0x2f0   :  { %4052 = vmatprep.subr.mxu0 %v4289_v48  ;;  %4087 = vmatprep.subr.mxu1 %v4289_v48 }
 0x2f1   :  { %4053 = vmatpush3.msra.mxu0 %v3203_v42  ;;  %4088 = vmatpush3.msra.mxu1 %v3238_v40  ;;  %v3389_v42 = vld [vmem:[%s7618_s29 + $0x7e8] sm:$0xff]  ;;  %v3353_v40 = vld [vmem:[%s7618_s29 + $0x760] sm:$0xff] }
 0x2f2   :  { %4054 = vmatprep.subr.mxu0 %v4289_v48  ;;  %4089 = vmatprep.subr.mxu1 %v4289_v48 }
 0x2f3   :  { %4055 = vmatpush3.msra.mxu0 %v3202_v32  ;;  %4090 = vmatpush3.msra.mxu1 %v3237_v57  ;;  %v3388_v32 = vld [vmem:[%s7618_s29 + $0x7e0] sm:$0xff]  ;;  %v3352_v57 = vld [vmem:[%s7618_s29 + $0x758] sm:$0xff] }
 0x2f4   :  { %4056 = vmatprep.subr.mxu0 %v4289_v48  ;;  %4091 = vmatprep.subr.mxu1 %v4289_v48 }
 0x2f5   :  { %4057 = vmatpush3.msra.mxu0 %v3201_v10  ;;  %4058 = vmatprep.mubr.msk.f32.mxu0 %vm4290_vm2, %v4289_v48  ;;  %v3351_v10 = vld [vmem:[%s7618_s29 + $0x750] sm:$0xff] }
 0x2f6   :  { %4092 = vmatpush3.msra.mxu1 %v3236_v49  ;;  %4093 = vmatprep.mubr.msk.f32.mxu1 %vm4290_vm2, %v4289_v48  ;;  %v3350_v49 = vld [vmem:[%s7618_s29 + $0x748] sm:$0xff] }
 0x2f7   :  { %4059 = vmatmul.mubr.f32.vlgmr.msra.gmra.mxu0 %v1821_v45  ;;  %4094 = vmatmul.mubr.f32.vlgmr.msra.gmra.mxu1 %v1987_v27  ;;  %v3349_v45 = vld [vmem:[%s7618_s29 + $0x740] sm:$0xff]  ;;  %v3348_v27 = vld [vmem:[%s7618_s29 + $0x738] sm:$0xff] }
 0x2f8   :  { %4096 = vmatprep.subr.mxu0 %v4289_v48  ;;  %4131 = vmatprep.subr.mxu1 %v4289_v48 }
 0x2f9   :  { %4097 = vmatpush3.msra.mxu0 %v3286_v28  ;;  %4132 = vmatpush3.msra.mxu1 %v3321_v60  ;;  %v3383_v28 = vld [vmem:[%s7618_s29 + $0x7b8] sm:$0xff]  ;;  %v3347_v60 = vld [vmem:[%s7618_s29 + $0x730] sm:$0xff] }
 0x2fa   :  { %4098 = vmatprep.subr.mxu0 %v4289_v48  ;;  %4133 = vmatprep.subr.mxu1 %v4289_v48 }
 0x2fb   :  { %4099 = vmatpush3.msra.mxu0 %v3285_v52  ;;  %4134 = vmatpush3.msra.mxu1 %v3320_v0  ;;  %v3382_v52 = vld [vmem:[%s7618_s29 + $0x7b0] sm:$0xff]  ;;  %v3346_v0 = vld [vmem:[%s7618_s29 + $0x728] sm:$0xff] }
 0x2fc   :  { %4100 = vmatprep.subr.mxu0 %v4289_v48  ;;  %4135 = vmatprep.subr.mxu1 %v4289_v48 }
 0x2fd   :  { %4101 = vmatpush3.msra.mxu0 %v3284_v24  ;;  %4136 = vmatpush3.msra.mxu1 %v3319_v11  ;;  %v3381_v24 = vld [vmem:[%s7618_s29 + $0x7a8] sm:$0xff]  ;;  %v3345_v11 = vld [vmem:[%s7618_s29 + $0x720] sm:$0xff] }
 0x2fe   :  { %4102 = vmatprep.subr.mxu0 %v4289_v48  ;;  %4137 = vmatprep.subr.mxu1 %v4289_v48 }
 0x2ff   :  { %4103 = vmatpush3.msra.mxu0 %v3283_v23  ;;  %4138 = vmatpush3.msra.mxu1 %v3318_v21  ;;  %v3380_v23 = vld [vmem:[%s7618_s29 + $0x7a0] sm:$0xff] }
 0x300   :  { %4104 = vmatprep.subr.mxu0 %v4289_v48  ;;  %4139 = vmatprep.subr.mxu1 %v4289_v48 }
 0x301   :  { %4105 = vmatpush3.msra.mxu0 %v3282_v15  ;;  %4140 = vmatpush3.msra.mxu1 %v3317_v58  ;;  %v3344_v15 = vld [vmem:[%s7618_s29 + $0x718] sm:$0xff] }
 0x302   :  { %4106 = vmatprep.subr.mxu0 %v4289_v48  ;;  %4141 = vmatprep.subr.mxu1 %v4289_v48 }
 0x303   :  { %4107 = vmatpush3.msra.mxu0 %v3281_v51  ;;  %4142 = vmatpush3.msra.mxu1 %v3316_v7  ;;  %v3379_v7 = vld [vmem:[%s7618_s29 + $0x798] sm:$0xff] }
 0x304   :  { %4108 = vmatprep.subr.mxu0 %v4289_v48  ;;  %4143 = vmatprep.subr.mxu1 %v4289_v48 }
 0x305   :  { %4109 = vmatpush3.msra.mxu0 %v3280_v37  ;;  %4144 = vmatpush3.msra.mxu1 %v3315_v50  ;;  %v3343_v50 = vld [vmem:[%s7618_s29 + $0x710] sm:$0xff] }
 0x306   :  { %4110 = vmatprep.subr.mxu0 %v4289_v48  ;;  %4145 = vmatprep.subr.mxu1 %v4289_v48 }
 0x307   :  { %4111 = vmatpush3.msra.mxu0 %v3279_v16  ;;  %4146 = vmatpush3.msra.mxu1 %v3314_v14 }
 0x308   :  { %4112 = vmatprep.subr.mxu0 %v4289_v48  ;;  %4147 = vmatprep.subr.mxu1 %v4289_v48 }
 0x309   :  { %4113 = vmatpush3.msra.mxu0 %v3278_v6  ;;  %4148 = vmatpush3.msra.mxu1 %v3313_v18  ;;  %v3378_v6 = vld [vmem:[%s7618_s29 + $0x790] sm:$0xff]  ;;  %v3342_v18 = vld [vmem:[%s7618_s29 + $0x708] sm:$0xff] }
 0x30a   :  { %4114 = vmatprep.subr.mxu0 %v4289_v48  ;;  %4149 = vmatprep.subr.mxu1 %v4289_v48 }
 0x30b   :  { %4115 = vmatpush3.msra.mxu0 %v3277_v5  ;;  %4150 = vmatpush3.msra.mxu1 %v3312_v9  ;;  %v3377_v5 = vld [vmem:[%s7618_s29 + $0x788] sm:$0xff]  ;;  %v2484_v9 = vpop.permute.xlu0 %2483 }
 0x30c   :  { %4116 = vmatprep.subr.mxu0 %v4289_v48  ;;  %4151 = vmatprep.subr.mxu1 %v4289_v48 }
 0x30d   :  { %4117 = vmatpush3.msra.mxu0 %v3276_v61  ;;  %4152 = vmatpush3.msra.mxu1 %v3311_v54  ;;  %v342_v4 = vpop.f32.mrf.mxu0  ;;  %v412_v12 = vpop.f32.mrf.mxu1  ;;  %v3341_v61 = vld [vmem:[%s7618_s29 + $0x700] sm:$0xff] }
 0x30e   :  { %4118 = vmatprep.subr.mxu0 %v4289_v48  ;;  %4153 = vmatprep.subr.mxu1 %v4289_v48  ;;  %v6967_v43 = vadd.f32 %v412_v12, %v342_v4  ;;  %v2650_v54 = vpop.permute.xlu1 %2649 }
 0x30f   :  { %4119 = vmatpush3.msra.mxu0 %v3275_v17  ;;  %4154 = vmatpush3.msra.mxu1 %v3310_v36  ;;  %v3710_v47 = vpop.f32.mrf.mxu0  ;;  %v3745_v20 = vpop.f32.mrf.mxu1  ;;  %v3376_v17 = vld [vmem:[%s7618_s29 + $0x780] sm:$0xff]  ;;  %v2485_v36 = vmax.f32 %v2482_v53, %v2484_v9 }
 0x310   :  { %4120 = vmatprep.subr.mxu0 %v4289_v48  ;;  %4155 = vmatprep.subr.mxu1 %v4289_v48 }
 0x311   :  { %4121 = vmatpush3.msra.mxu0 %v3274_v2  ;;  %4156 = vmatpush3.msra.mxu1 %v3309_v8  ;;  %v2651_v2 = vmax.f32 %v2648_v62, %v2650_v54  ;;  %v2756_v8 = vld [vmem:[%s7624_s16 + $0x38] sm:$0xff] }
 0x312   :  { %4122 = vmatprep.subr.mxu0 %v4289_v48  ;;  %4157 = vmatprep.subr.mxu1 %v4289_v48 }
 0x313   :  { %4123 = vmatpush3.msra.mxu0 %v3273_v25  ;;  %4158 = vmatpush3.msra.mxu1 %v3308_v3  ;;  %v2754_v25 = vld [vmem:[%s7624_s16 + $0x28] sm:$0xff] }
 0x314   :  { %4124 = vmatprep.subr.mxu0 %v4289_v48  ;;  %4159 = vmatprep.subr.mxu1 %v4289_v48 }
 0x315   :  { %4125 = vmatpush3.msra.mxu0 %v3272_v19  ;;  %4160 = vmatpush3.msra.mxu1 %v3307_v41 }
 0x316   :  { %4126 = vmatprep.subr.mxu0 %v4289_v48  ;;  %4161 = vmatprep.subr.mxu1 %v4289_v48 }
 0x317   :  { %4127 = vmatpush3.msra.mxu0 %v3271_v34  ;;  %4128 = vmatprep.mubr.msk.f32.mxu0 %vm4290_vm2, %v4289_v48  ;;  %v2753_v34 = vld [vmem:[%s7624_s16 + $0x20] sm:$0xff] }
 0x318   :  { %4162 = vmatpush3.msra.mxu1 %v3306_v46  ;;  %4163 = vmatprep.mubr.msk.f32.mxu1 %vm4290_vm2, %v4289_v48  ;;  %v2751_v46 = vld [vmem:[%s7624_s16 + $0x10] sm:$0xff] }
 0x319   :  { %4129 = vmatmul.mubr.f32.vlgmr.msra.gmra.mxu0 %v2153_v56  ;;  %4164 = vmatmul.mubr.f32.vlgmr.msra.gmra.mxu1 %v2319_v55  ;;  %v2749_v56 = vld [vmem:[%s7624_s16] sm:$0xff] }
 0x31a   :  { %4166 = vmatprep.subr.mxu0 %v4289_v48  ;;  %4201 = vmatprep.subr.mxu1 %v4289_v48 }
 0x31b   :  { %4167 = vmatpush3.msra.mxu0 %v3356_v39  ;;  %4202 = vmatpush3.msra.mxu1 %v3391_v31 }
 0x31c   :  { %4168 = vmatprep.subr.mxu0 %v4289_v48  ;;  %4203 = vmatprep.subr.mxu1 %v4289_v48 }
 0x31d   :  { %4169 = vmatpush3.msra.mxu0 %v3355_v22  ;;  %4204 = vmatpush3.msra.mxu1 %v3390_v63 }
 0x31e   :  { %4170 = vmatprep.subr.mxu0 %v4289_v48  ;;  %4205 = vmatprep.subr.mxu1 %v4289_v48 }
 0x31f   :  { %4171 = vmatpush3.msra.mxu0 %v3354_v59  ;;  %4206 = vmatpush3.msra.mxu1 %v3389_v42 }
 0x320   :  { %4172 = vmatprep.subr.mxu0 %v4289_v48  ;;  %4207 = vmatprep.subr.mxu1 %v4289_v48 }
 0x321   :  { %4173 = vmatpush3.msra.mxu0 %v3353_v40  ;;  %4208 = vmatpush3.msra.mxu1 %v3388_v32 }
 0x322   :  { %4174 = vmatprep.subr.mxu0 %v4289_v48  ;;  %4209 = vmatprep.subr.mxu1 %v4289_v48 }
 0x323   :  { %4175 = vmatpush3.msra.mxu0 %v3352_v57  ;;  %4210 = vmatpush3.msra.mxu1 %v3387_v26 }
 0x324   :  { %4176 = vmatprep.subr.mxu0 %v4289_v48  ;;  %4211 = vmatprep.subr.mxu1 %v4289_v48 }
 0x325   :  { %4177 = vmatpush3.msra.mxu0 %v3351_v10  ;;  %4212 = vmatpush3.msra.mxu1 %v3386_v30 }
 0x326   :  { %4178 = vmatprep.subr.mxu0 %v4289_v48  ;;  %4213 = vmatprep.subr.mxu1 %v4289_v48 }
 0x327   :  { %4179 = vmatpush3.msra.mxu0 %v3350_v49  ;;  %4214 = vmatpush3.msra.mxu1 %v3385_v35 }
 0x328   :  { %4180 = vmatprep.subr.mxu0 %v4289_v48  ;;  %4215 = vmatprep.subr.mxu1 %v4289_v48 }
 0x329   :  { %4181 = vmatpush3.msra.mxu0 %v3349_v45  ;;  %4216 = vmatpush3.msra.mxu1 %v3384_v33 }
 0x32a   :  { %4182 = vmatprep.subr.mxu0 %v4289_v48  ;;  %4217 = vmatprep.subr.mxu1 %v4289_v48 }
 0x32b   :  { %4183 = vmatpush3.msra.mxu0 %v3348_v27  ;;  %4218 = vmatpush3.msra.mxu1 %v3383_v28 }
 0x32c   :  { %4184 = vmatprep.subr.mxu0 %v4289_v48  ;;  %4219 = vmatprep.subr.mxu1 %v4289_v48 }
 0x32d   :  { %4185 = vmatpush3.msra.mxu0 %v3347_v60  ;;  %4220 = vmatpush3.msra.mxu1 %v3382_v52  ;;  %v3392_v52 = vld [vmem:[%s7625_s20] ss:$0 sm:$0xff] }
 0x32e   :  { %4186 = vmatprep.subr.mxu0 %v4289_v48  ;;  %4221 = vmatprep.subr.mxu1 %v4289_v48 }
 0x32f   :  { %4187 = vmatpush3.msra.mxu0 %v3346_v0  ;;  %v577_v21 = vpop.f32.mrf.mxu0  ;;  %4222 = vmatpush3.msra.mxu1 %v3381_v24  ;;  %v743_v51 = vpop.f32.mrf.mxu1 }
 0x330   :  { %4188 = vmatprep.subr.mxu0 %v4289_v48  ;;  %v581_v58 = vadd.f32 %v577_v21, %v6967_v43  ;;  %4223 = vmatprep.subr.mxu1 %v4289_v48  ;;  %v2755_v43 = vld [vmem:[%s7624_s16 + $0x30] sm:$0xff] }
 0x331   :  { %4189 = vmatpush3.msra.mxu0 %v3345_v11  ;;  %v3780_v37 = vpop.f32.mrf.mxu0  ;;  %4224 = vmatpush3.msra.mxu1 %v3380_v23  ;;  %v3815_v14 = vpop.f32.mrf.mxu1 }
 0x332   :  { %4190 = vmatprep.subr.mxu0 %v4289_v48  ;;  %v747_v16 = vadd.f32 %v743_v51, %v581_v58  ;;  %4225 = vmatprep.subr.mxu1 %v4289_v48 }
 0x333   :  { %4191 = vmatpush3.msra.mxu0 %v3344_v15  ;;  %4226 = vmatpush3.msra.mxu1 %v3379_v7  ;;  %v3393_v15 = vld [vmem:[%s7626_s25] ss:$0 sm:$0xff] }
 0x334   :  { %4192 = vmatprep.subr.mxu0 %v4289_v48  ;;  %4227 = vmatprep.subr.mxu1 %v4289_v48 }
 0x335   :  { %4193 = vmatpush3.msra.mxu0 %v3343_v50  ;;  %4228 = vmatpush3.msra.mxu1 %v3378_v6 }
 0x336   :  { %4194 = vmatprep.subr.mxu0 %v4289_v48  ;;  %4229 = vmatprep.subr.mxu1 %v4289_v48 }
 0x337   :  { %4195 = vmatpush3.msra.mxu0 %v3342_v18  ;;  %4230 = vmatpush3.msra.mxu1 %v3377_v5 }
 0x338   :  { %4196 = vmatprep.subr.mxu0 %v4289_v48  ;;  %4231 = vmatprep.subr.mxu1 %v4289_v48 }
 0x339   :  { %4197 = vmatpush3.msra.mxu0 %v3341_v61  ;;  %4198 = vmatprep.mubr.msk.f32.mxu0 %vm4290_vm2, %v4289_v48 }
 0x33a   :  { %4232 = vmatpush3.msra.mxu1 %v3376_v17  ;;  %4233 = vmatprep.mubr.msk.f32.mxu1 %vm4290_vm2, %v4289_v48 }
 0x33b   :  { %4199 = vmatmul.mubr.f32.vlgmr.msra.gmra.mxu0 %v2485_v36  ;;  %4234 = vmatmul.mubr.f32.vlgmr.msra.gmra.mxu1 %v2651_v2 }
 0x33c   :  { %4236 = vmatprep.subr.mxu0 %v4289_v48  ;;  %4252 = vmatprep.mubr.msk.f32.mxu0 %vm4290_vm2, %v4289_v48 }
 0x33d   :  { %4237 = vmatpush3.msra.mxu0 %v2756_v8 }
 0x33e   :  { %4238 = vmatprep.subr.mxu0 %v4289_v48 }
 0x33f   :  { %4239 = vmatpush3.msra.mxu0 %v2755_v43 }
 0x340   :  { %4240 = vmatprep.subr.mxu0 %v4289_v48 }
 0x341   :  { %4241 = vmatpush3.msra.mxu0 %v2754_v25 }
 0x342   :  { %4242 = vmatprep.subr.mxu0 %v4289_v48 }
 0x343   :  { %4243 = vmatpush3.msra.mxu0 %v2753_v34 }
 0x344   :  { %4244 = vmatprep.subr.mxu0 %v4289_v48 }
 0x345   :  { %4245 = vmatpush3.msra.mxu0 %v2752_v29 }
 0x346   :  { %4246 = vmatprep.subr.mxu0 %v4289_v48 }
 0x347   :  { %4247 = vmatpush3.msra.mxu0 %v2751_v46 }
 0x348   :  { %4248 = vmatprep.subr.mxu0 %v4289_v48 }
 0x349   :  { %4249 = vmatpush3.msra.mxu0 %v2750_v13 }
 0x34a   :  { %4250 = vmatprep.subr.mxu0 %v4289_v48 }
 0x34b   :  { %4251 = vmatpush3.msra.mxu0 %v2749_v56 }
 0x351   :  { %v909_v44 = vpop.f32.mrf.mxu0  ;;  %v1075_v4 = vpop.f32.mrf.mxu1 }
 0x352   :  { %v913_v53 = vadd.f32 %v909_v44, %v747_v16 }
 0x353   :  { %v3850_v12 = vpop.f32.mrf.mxu0  ;;  %v3885_v62 = vpop.f32.mrf.mxu1 }
 0x354   :  { %v1079_v38 = vadd.f32 %v1075_v4, %v913_v53 }
 0x373   :  { %v1241_v47 = vpop.f32.mrf.mxu0  ;;  %v1407_v3 = vpop.f32.mrf.mxu1 }
 0x374   :  { %v1245_v20 = vadd.f32 %v1241_v47, %v1079_v38 }
 0x375   :  { %v3920_v19 = vpop.f32.mrf.mxu0  ;;  %v3955_v1 = vpop.f32.mrf.mxu1 }
 0x376   :  { %v1411_v41 = vadd.f32 %v1407_v3, %v1245_v20 }
 0x395   :  { %v1573_v55 = vpop.f32.mrf.mxu0  ;;  %v1739_v31 = vpop.f32.mrf.mxu1 }
 0x396   :  { %v1577_v39 = vadd.f32 %v1573_v55, %v1411_v41 }
 0x397   :  { %v3990_v22 = vpop.f32.mrf.mxu0  ;;  %v4025_v59 = vpop.f32.mrf.mxu1 }
 0x398   :  { %v1743_v63 = vadd.f32 %v1739_v31, %v1577_v39 }
 0x3b7   :  { %v1905_v42 = vpop.f32.mrf.mxu0  ;;  %v2071_v40 = vpop.f32.mrf.mxu1 }
 0x3b8   :  { %v1909_v35 = vadd.f32 %v1905_v42, %v1743_v63 }
 0x3b9   :  { %v4060_v32 = vpop.f32.mrf.mxu0  ;;  %v4095_v57 = vpop.f32.mrf.mxu1 }
 0x3ba   :  { %v2075_v45 = vadd.f32 %v2071_v40, %v1909_v35 }
 0x3d9   :  { %v2237_v26 = vpop.f32.mrf.mxu0  ;;  %v2403_v10 = vpop.f32.mrf.mxu1 }
 0x3da   :  { %v2241_v33 = vadd.f32 %v2237_v26, %v2075_v45 }
 0x3db   :  { %v4130_v30 = vpop.f32.mrf.mxu0  ;;  %v4165_v49 = vpop.f32.mrf.mxu1 }
 0x3dc   :  { %v2407_v27 = vadd.f32 %v2403_v10, %v2241_v33 }
 0x3fb   :  { %v2569_v48 = vpop.f32.mrf.mxu0  ;;  %v2735_v60 = vpop.f32.mrf.mxu1 }
 0x3fc   :  { %v2573_v28 = vadd.f32 %v2569_v48, %v2407_v27 }
 0x3fd   :  { %v4200_v0 = vpop.f32.mrf.mxu0  ;;  %v4235_v11 = vpop.f32.mrf.mxu1 }
 0x3fe   :  { %v2739_v24 = vadd.f32 %v2735_v60, %v2573_v28 }
 0x400   :  { %v2747_v23 = vadd.f32 %v3392_v52, %v2739_v24 }
 0x402   :  { %v2748_v21 = vmax.f32 %v2747_v23, 0.0 }
 0x404   :  { %4253 = vmatmul.mubr.msk.f32.vlgmr.msra.gmra.mxu0 %vm2764_vm3, %v2748_v21 }
 0x4c4   :  { %v2834_v58 = vpop.f32.mrf.mxu0 }
 0x4c5   :  { %v2835_v51 = vadd.f32 %v3393_v15, %v2834_v58 }
 0x4c6   :  { %v4254_v7 = vpop.f32.mrf.mxu0 }
 0x4c7   :  { %2838 = vst [vmem:[%s7627_s27] sm:$0xff] %v2835_v51 }
 0x4c8   :  { %2843 = vsyncpa [#allocation3], 1 }

</bundles_post_ra>
